<compile_context>
chip_gen: v7x
topology: tpu7x:2x2x1
jax: 0.10.0
libtpu: 0.0.40
codegen_flags: <defaults>
</compile_context>

<pallas_src>
import jax
import jax.numpy as jnp
from jax import lax
from jax.experimental import pallas as pl
from jax.experimental.pallas import tpu as pltpu

KSIZE = 7
PAD = 3  # padding for kernel_size=7 (matches the PyTorch module, bias=False)


def _spatial_attention_kernel(x_ref, w_ref, out_ref, shifted_ref):
    """One batch element per grid step.

    x_ref       : (1, C, H, W)      unpadded input block (VMEM)
    w_ref       : (2*K*K,)          conv weights, layout [ci*K*K + di*K + dj] (SMEM)
    out_ref     : (1, C, H, W)
    shifted_ref : (2, K, H+2P, W)   lane-pre-shifted, row-padded stat planes (VMEM, f32)
    """
    c = x_ref.shape[1]
    h = out_ref.shape[2]
    w = out_ref.shape[3]

    # Zero the scratch every step: the unwritten halo rows / lane strips must
    # read as the conv's zero padding, and with a "parallel" batch axis we
    # cannot rely on a previous grid step having initialised the scratch.
    shifted_ref[...] = jnp.zeros_like(shifted_ref)

    x = x_ref[0]                                               # (C, H, W), input dtype

    # Channel statistics: plain VPU reductions over the leading axis.
    # The sum accumulates in f32 without materialising an f32 copy of x.
    avg = jnp.sum(x, axis=0, dtype=jnp.float32) * (1.0 / c)    # (H, W) f32
    mx = jnp.max(x, axis=0).astype(jnp.float32)                # (H, W) f32

    # Hoist the lane (dj) shifts out of the 98-tap loop: build the 14
    # lane-shifted, row-padded planes once.
    #   shifted[ci, dj, i_p, j] = stat_padded[ci, i_p, j + dj]
    for ci, stat in enumerate((avg, mx)):
        for dj in range(KSIZE):
            a = max(0, PAD - dj)                  # dest lane range [a, b)
            b = min(w, w + PAD - dj)
            if a < b:
                shifted_ref[ci, dj, PAD:PAD + h, a:b] = (
                    stat[:, a + dj - PAD:b + dj - PAD])

    # 7x7, 2-channel conv as unrolled scalar*vector multiply-adds; the inner
    # loop only takes cheap row (sublane) offsets of already-shifted planes.
    acc = w_ref[0] * shifted_ref[0, 0, 0:h, :]                 # init from tap 0
    for ci in range(2):
        for di in range(KSIZE):
            for dj in range(KSIZE):
                if ci == 0 and di == 0 and dj == 0:
                    continue
                wgt = w_ref[ci * KSIZE * KSIZE + di * KSIZE + dj]  # SMEM scalar
                acc = acc + wgt * shifted_ref[ci, dj, di:di + h, :]

    y = jax.nn.sigmoid(acc)                                    # EUP exp + recip

    # Attention map broadcast over channels; x is read back lane-aligned.
    out_ref[0] = (x * y.astype(x.dtype)[None, :, :]).astype(out_ref.dtype)


def spatial_attention_forward(x, conv_weight):
    """x: (B, C, H, W); conv_weight: (1, 2, K, K) (PyTorch conv1.weight layout)."""
    b, c, h, w = x.shape
    w_flat = jnp.asarray(conv_weight, jnp.float32).reshape(-1)   # (2*K*K,)

    return pl.pallas_call(
        _spatial_attention_kernel,
        out_shape=jax.ShapeDtypeStruct((b, c, h, w), x.dtype),
        grid_spec=pltpu.PrefetchScalarGridSpec(
            num_scalar_prefetch=0,
            grid=(b,),
            in_specs=[
                pl.BlockSpec((1, c, h, w), lambda i: (i, 0, 0, 0)),
                pl.BlockSpec(memory_space=pltpu.MemorySpace.SMEM),
            ],
            out_specs=pl.BlockSpec((1, c, h, w), lambda i: (i, 0, 0, 0)),
            scratch_shapes=[
                pltpu.VMEM((2, KSIZE, h + 2 * PAD, w), jnp.float32),
            ],
        ),
        compiler_params=pltpu.CompilerParams(
            dimension_semantics=("parallel",),
            # Only matters for large full-image blocks; tiny for the test.
            vmem_limit_bytes=64 * 1024 * 1024),
    )(x, w_flat)


def _spatial_attention_reference(x, conv_weight):
    # Pure-JAX reference with identical math (sanity check).
    avg = jnp.mean(x, axis=1, keepdims=True)
    mx = jnp.max(x, axis=1, keepdims=True)
    s = jnp.concatenate([avg, mx], axis=1)                       # (B,2,H,W)
    conv = lax.conv_general_dilated(
        s, jnp.asarray(conv_weight, jnp.float32),
        window_strides=(1, 1), padding=((PAD, PAD), (PAD, PAD)),
        dimension_numbers=("NCHW", "OIHW", "NCHW"),
        precision=lax.Precision.HIGHEST)
    return jax.nn.sigmoid(conv) * x


if __name__ == "__main__":
    b, c, h, w = 2, 4, 16, 16

    key = jax.random.PRNGKey(0)
    kx, kw = jax.random.split(key)
    x = jax.random.normal(kx, (b, c, h, w), dtype=jnp.float32)
    # nn.Conv2d(2, 1, 7, bias=False) default init ~ U(-1/sqrt(2*7*7), +)
    bound = (2 * KSIZE * KSIZE) ** -0.5
    conv_w = jax.random.uniform(kw, (1, 2, KSIZE, KSIZE), jnp.float32,
                                minval=-bound, maxval=bound)

    out = jax.block_until_ready(spatial_attention_forward(x, conv_w))
    assert out.shape == (b, c, h, w), out.shape
    assert bool(jnp.all(jnp.isfinite(out)))

    ref = jax.block_until_ready(_spatial_attention_reference(x, conv_w))
    max_err = float(jnp.max(jnp.abs(out - ref)))
    assert jnp.allclose(out, ref, rtol=1e-4, atol=1e-4), max_err

    print("KERNEL_OK")
</pallas_src>

<mosaic_0001>
module attributes {stable_mosaic.version = 11 : i64} {
  func.func @_spatial_attention_kernel(%arg0: i32, %arg1: memref<1x4x16x16xf32, #tpu.memory_space<vmem>>, %arg2: memref<98xf32, #tpu.memory_space<smem>>, %arg3: memref<1x4x16x16xf32, #tpu.memory_space<vmem>>, %arg4: memref<2x7x22x16xf32, #tpu.memory_space<vmem>>) attributes {dimension_semantics = [#tpu.dimension_semantics<parallel>], iteration_bounds = array<i64: 2>, scalar_prefetch = 0 : i64, scratch_operands = 1 : i64, tpu.core_type = #tpu.core_type<tc>, window_params = [{transform_indices = @transform_0, window_bounds = array<i64: 1, 4, 16, 16>}, {transform_indices = @transform_1, window_bounds = array<i64: 98>}, {transform_indices = @transform_2, window_bounds = array<i64: 1, 4, 16, 16>}]} {
    %cst = arith.constant 0.000000e+00 : f32
    %0 = vector.broadcast %cst : f32 to vector<2x7x22x16xf32>
    %c0 = arith.constant 0 : index
    %c0_0 = arith.constant 0 : index
    %c0_1 = arith.constant 0 : index
    %c0_2 = arith.constant 0 : index
    %1 = vector.load %arg4[%c0, %c0_0, %c0_1, %c0_2] : memref<2x7x22x16xf32, #tpu.memory_space<vmem>>, vector<2x7x22x16xf32>
    tpu.vector_store %arg4[%c0, %c0_0, %c0_1, %c0_2], %0 {strides = array<i32>} : memref<2x7x22x16xf32, #tpu.memory_space<vmem>>, vector<2x7x22x16xf32>,
    %c0_3 = arith.constant 0 : index
    %c0_4 = arith.constant 0 : index
    %c0_5 = arith.constant 0 : index
    %c0_6 = arith.constant 0 : index
    %2 = vector.load %arg1[%c0_3, %c0_4, %c0_5, %c0_6] : memref<1x4x16x16xf32, #tpu.memory_space<vmem>>, vector<1x4x16x16xf32>
    %3 = vector.shape_cast %2 : vector<1x4x16x16xf32> to vector<4x16x16xf32>
    %cst_7 = arith.constant dense<0.000000e+00> : vector<16x16xf32>
    %4 = vector.multi_reduction <add>, %3, %cst_7 [0] : vector<4x16x16xf32> to vector<16x16xf32>
    %cst_8 = arith.constant 2.500000e-01 : f32
    %5 = vector.broadcast %cst_8 : f32 to vector<16x16xf32>
    %6 = arith.mulf %4, %5 : vector<16x16xf32>
    %cst_9 = arith.constant dense<0xFF800000> : vector<16x16xf32>
    %7 = vector.multi_reduction <maximumf>, %3, %cst_9 [0] : vector<4x16x16xf32> to vector<16x16xf32>
    %8 = vector.extract_strided_slice %6 {offsets = [0, 0], sizes = [16, 13], strides = [1, 1]} : vector<16x16xf32> to vector<16x13xf32>
    %c0_10 = arith.constant 0 : index
    %c0_11 = arith.constant 0 : index
    %c3 = arith.constant 3 : index
    %c3_12 = arith.constant 3 : index
    %9 = vector.load %arg4[%c0_10, %c0_11, %c3, %c3_12] : memref<2x7x22x16xf32, #tpu.memory_space<vmem>>, vector<1x1x16x13xf32>
    %10 = vector.shape_cast %9 : vector<1x1x16x13xf32> to vector<16x13xf32>
    %11 = vector.shape_cast %8 : vector<16x13xf32> to vector<1x1x16x13xf32>
    tpu.vector_store %arg4[%c0_10, %c0_11, %c3, %c3_12], %11 {strides = array<i32>} : memref<2x7x22x16xf32, #tpu.memory_space<vmem>>, vector<1x1x16x13xf32>,
    %12 = vector.extract_strided_slice %6 {offsets = [0, 0], sizes = [16, 14], strides = [1, 1]} : vector<16x16xf32> to vector<16x14xf32>
    %c0_13 = arith.constant 0 : index
    %c1 = arith.constant 1 : index
    %c3_14 = arith.constant 3 : index
    %c2 = arith.constant 2 : index
    %13 = vector.load %arg4[%c0_13, %c1, %c3_14, %c2] : memref<2x7x22x16xf32, #tpu.memory_space<vmem>>, vector<1x1x16x14xf32>
    %14 = vector.shape_cast %13 : vector<1x1x16x14xf32> to vector<16x14xf32>
    %15 = vector.shape_cast %12 : vector<16x14xf32> to vector<1x1x16x14xf32>
    tpu.vector_store %arg4[%c0_13, %c1, %c3_14, %c2], %15 {strides = array<i32>} : memref<2x7x22x16xf32, #tpu.memory_space<vmem>>, vector<1x1x16x14xf32>,
    %16 = vector.extract_strided_slice %6 {offsets = [0, 0], sizes = [16, 15], strides = [1, 1]} : vector<16x16xf32> to vector<16x15xf32>
    %c0_15 = arith.constant 0 : index
    %c2_16 = arith.constant 2 : index
    %c3_17 = arith.constant 3 : index
    %c1_18 = arith.constant 1 : index
    %17 = vector.load %arg4[%c0_15, %c2_16, %c3_17, %c1_18] : memref<2x7x22x16xf32, #tpu.memory_space<vmem>>, vector<1x1x16x15xf32>
    %18 = vector.shape_cast %17 : vector<1x1x16x15xf32> to vector<16x15xf32>
    %19 = vector.shape_cast %16 : vector<16x15xf32> to vector<1x1x16x15xf32>
    tpu.vector_store %arg4[%c0_15, %c2_16, %c3_17, %c1_18], %19 {strides = array<i32>} : memref<2x7x22x16xf32, #tpu.memory_space<vmem>>, vector<1x1x16x15xf32>,
    %c0_19 = arith.constant 0 : index
    %c3_20 = arith.constant 3 : index
    %c3_21 = arith.constant 3 : index
    %c0_22 = arith.constant 0 : index
    %20 = vector.load %arg4[%c0_19, %c3_20, %c3_21, %c0_22] : memref<2x7x22x16xf32, #tpu.memory_space<vmem>>, vector<1x1x16x16xf32>
    %21 = vector.shape_cast %20 : vector<1x1x16x16xf32> to vector<16x16xf32>
    %22 = vector.shape_cast %6 : vector<16x16xf32> to vector<1x1x16x16xf32>
    tpu.vector_store %arg4[%c0_19, %c3_20, %c3_21, %c0_22], %22 {strides = array<i32>} : memref<2x7x22x16xf32, #tpu.memory_space<vmem>>, vector<1x1x16x16xf32>,
    %23 = vector.extract_strided_slice %6 {offsets = [0, 1], sizes = [16, 15], strides = [1, 1]} : vector<16x16xf32> to vector<16x15xf32>
    %c0_23 = arith.constant 0 : index
    %c4 = arith.constant 4 : index
    %c3_24 = arith.constant 3 : index
    %c0_25 = arith.constant 0 : index
    %24 = vector.load %arg4[%c0_23, %c4, %c3_24, %c0_25] : memref<2x7x22x16xf32, #tpu.memory_space<vmem>>, vector<1x1x16x15xf32>
    %25 = vector.shape_cast %24 : vector<1x1x16x15xf32> to vector<16x15xf32>
    %26 = vector.shape_cast %23 : vector<16x15xf32> to vector<1x1x16x15xf32>
    tpu.vector_store %arg4[%c0_23, %c4, %c3_24, %c0_25], %26 {strides = array<i32>} : memref<2x7x22x16xf32, #tpu.memory_space<vmem>>, vector<1x1x16x15xf32>,
    %27 = vector.extract_strided_slice %6 {offsets = [0, 2], sizes = [16, 14], strides = [1, 1]} : vector<16x16xf32> to vector<16x14xf32>
    %c0_26 = arith.constant 0 : index
    %c5 = arith.constant 5 : index
    %c3_27 = arith.constant 3 : index
    %c0_28 = arith.constant 0 : index
    %28 = vector.load %arg4[%c0_26, %c5, %c3_27, %c0_28] : memref<2x7x22x16xf32, #tpu.memory_space<vmem>>, vector<1x1x16x14xf32>
    %29 = vector.shape_cast %28 : vector<1x1x16x14xf32> to vector<16x14xf32>
    %30 = vector.shape_cast %27 : vector<16x14xf32> to vector<1x1x16x14xf32>
    tpu.vector_store %arg4[%c0_26, %c5, %c3_27, %c0_28], %30 {strides = array<i32>} : memref<2x7x22x16xf32, #tpu.memory_space<vmem>>, vector<1x1x16x14xf32>,
    %31 = vector.extract_strided_slice %6 {offsets = [0, 3], sizes = [16, 13], strides = [1, 1]} : vector<16x16xf32> to vector<16x13xf32>
    %c0_29 = arith.constant 0 : index
    %c6 = arith.constant 6 : index
    %c3_30 = arith.constant 3 : index
    %c0_31 = arith.constant 0 : index
    %32 = vector.load %arg4[%c0_29, %c6, %c3_30, %c0_31] : memref<2x7x22x16xf32, #tpu.memory_space<vmem>>, vector<1x1x16x13xf32>
    %33 = vector.shape_cast %32 : vector<1x1x16x13xf32> to vector<16x13xf32>
    %34 = vector.shape_cast %31 : vector<16x13xf32> to vector<1x1x16x13xf32>
    tpu.vector_store %arg4[%c0_29, %c6, %c3_30, %c0_31], %34 {strides = array<i32>} : memref<2x7x22x16xf32, #tpu.memory_space<vmem>>, vector<1x1x16x13xf32>,
    %35 = vector.extract_strided_slice %7 {offsets = [0, 0], sizes = [16, 13], strides = [1, 1]} : vector<16x16xf32> to vector<16x13xf32>
    %c1_32 = arith.constant 1 : index
    %c0_33 = arith.constant 0 : index
    %c3_34 = arith.constant 3 : index
    %c3_35 = arith.constant 3 : index
    %36 = vector.load %arg4[%c1_32, %c0_33, %c3_34, %c3_35] : memref<2x7x22x16xf32, #tpu.memory_space<vmem>>, vector<1x1x16x13xf32>
    %37 = vector.shape_cast %36 : vector<1x1x16x13xf32> to vector<16x13xf32>
    %38 = vector.shape_cast %35 : vector<16x13xf32> to vector<1x1x16x13xf32>
    tpu.vector_store %arg4[%c1_32, %c0_33, %c3_34, %c3_35], %38 {strides = array<i32>} : memref<2x7x22x16xf32, #tpu.memory_space<vmem>>, vector<1x1x16x13xf32>,
    %39 = vector.extract_strided_slice %7 {offsets = [0, 0], sizes = [16, 14], strides = [1, 1]} : vector<16x16xf32> to vector<16x14xf32>
    %c1_36 = arith.constant 1 : index
    %c1_37 = arith.constant 1 : index
    %c3_38 = arith.constant 3 : index
    %c2_39 = arith.constant 2 : index
    %40 = vector.load %arg4[%c1_36, %c1_37, %c3_38, %c2_39] : memref<2x7x22x16xf32, #tpu.memory_space<vmem>>, vector<1x1x16x14xf32>
    %41 = vector.shape_cast %40 : vector<1x1x16x14xf32> to vector<16x14xf32>
    %42 = vector.shape_cast %39 : vector<16x14xf32> to vector<1x1x16x14xf32>
    tpu.vector_store %arg4[%c1_36, %c1_37, %c3_38, %c2_39], %42 {strides = array<i32>} : memref<2x7x22x16xf32, #tpu.memory_space<vmem>>, vector<1x1x16x14xf32>,
    %43 = vector.extract_strided_slice %7 {offsets = [0, 0], sizes = [16, 15], strides = [1, 1]} : vector<16x16xf32> to vector<16x15xf32>
    %c1_40 = arith.constant 1 : index
    %c2_41 = arith.constant 2 : index
    %c3_42 = arith.constant 3 : index
    %c1_43 = arith.constant 1 : index
    %44 = vector.load %arg4[%c1_40, %c2_41, %c3_42, %c1_43] : memref<2x7x22x16xf32, #tpu.memory_space<vmem>>, vector<1x1x16x15xf32>
    %45 = vector.shape_cast %44 : vector<1x1x16x15xf32> to vector<16x15xf32>
    %46 = vector.shape_cast %43 : vector<16x15xf32> to vector<1x1x16x15xf32>
    tpu.vector_store %arg4[%c1_40, %c2_41, %c3_42, %c1_43], %46 {strides = array<i32>} : memref<2x7x22x16xf32, #tpu.memory_space<vmem>>, vector<1x1x16x15xf32>,
    %c1_44 = arith.constant 1 : index
    %c3_45 = arith.constant 3 : index
    %c3_46 = arith.constant 3 : index
    %c0_47 = arith.constant 0 : index
    %47 = vector.load %arg4[%c1_44, %c3_45, %c3_46, %c0_47] : memref<2x7x22x16xf32, #tpu.memory_space<vmem>>, vector<1x1x16x16xf32>
    %48 = vector.shape_cast %47 : vector<1x1x16x16xf32> to vector<16x16xf32>
    %49 = vector.shape_cast %7 : vector<16x16xf32> to vector<1x1x16x16xf32>
    tpu.vector_store %arg4[%c1_44, %c3_45, %c3_46, %c0_47], %49 {strides = array<i32>} : memref<2x7x22x16xf32, #tpu.memory_space<vmem>>, vector<1x1x16x16xf32>,
    %50 = vector.extract_strided_slice %7 {offsets = [0, 1], sizes = [16, 15], strides = [1, 1]} : vector<16x16xf32> to vector<16x15xf32>
    %c1_48 = arith.constant 1 : index
    %c4_49 = arith.constant 4 : index
    %c3_50 = arith.constant 3 : index
    %c0_51 = arith.constant 0 : index
    %51 = vector.load %arg4[%c1_48, %c4_49, %c3_50, %c0_51] : memref<2x7x22x16xf32, #tpu.memory_space<vmem>>, vector<1x1x16x15xf32>
    %52 = vector.shape_cast %51 : vector<1x1x16x15xf32> to vector<16x15xf32>
    %53 = vector.shape_cast %50 : vector<16x15xf32> to vector<1x1x16x15xf32>
    tpu.vector_store %arg4[%c1_48, %c4_49, %c3_50, %c0_51], %53 {strides = array<i32>} : memref<2x7x22x16xf32, #tpu.memory_space<vmem>>, vector<1x1x16x15xf32>,
    %54 = vector.extract_strided_slice %7 {offsets = [0, 2], sizes = [16, 14], strides = [1, 1]} : vector<16x16xf32> to vector<16x14xf32>
    %c1_52 = arith.constant 1 : index
    %c5_53 = arith.constant 5 : index
    %c3_54 = arith.constant 3 : index
    %c0_55 = arith.constant 0 : index
    %55 = vector.load %arg4[%c1_52, %c5_53, %c3_54, %c0_55] : memref<2x7x22x16xf32, #tpu.memory_space<vmem>>, vector<1x1x16x14xf32>
    %56 = vector.shape_cast %55 : vector<1x1x16x14xf32> to vector<16x14xf32>
    %57 = vector.shape_cast %54 : vector<16x14xf32> to vector<1x1x16x14xf32>
    tpu.vector_store %arg4[%c1_52, %c5_53, %c3_54, %c0_55], %57 {strides = array<i32>} : memref<2x7x22x16xf32, #tpu.memory_space<vmem>>, vector<1x1x16x14xf32>,
    %58 = vector.extract_strided_slice %7 {offsets = [0, 3], sizes = [16, 13], strides = [1, 1]} : vector<16x16xf32> to vector<16x13xf32>
    %c1_56 = arith.constant 1 : index
    %c6_57 = arith.constant 6 : index
    %c3_58 = arith.constant 3 : index
    %c0_59 = arith.constant 0 : index
    %59 = vector.load %arg4[%c1_56, %c6_57, %c3_58, %c0_59] : memref<2x7x22x16xf32, #tpu.memory_space<vmem>>, vector<1x1x16x13xf32>
    %60 = vector.shape_cast %59 : vector<1x1x16x13xf32> to vector<16x13xf32>
    %61 = vector.shape_cast %58 : vector<16x13xf32> to vector<1x1x16x13xf32>
    tpu.vector_store %arg4[%c1_56, %c6_57, %c3_58, %c0_59], %61 {strides = array<i32>} : memref<2x7x22x16xf32, #tpu.memory_space<vmem>>, vector<1x1x16x13xf32>,
    %c0_60 = arith.constant 0 : index
    %62 = memref.load %arg2[%c0_60] : memref<98xf32, #tpu.memory_space<smem>>
    %c0_61 = arith.constant 0 : index
    %c0_62 = arith.constant 0 : index
    %c0_63 = arith.constant 0 : index
    %c0_64 = arith.constant 0 : index
    %63 = vector.load %arg4[%c0_61, %c0_62, %c0_63, %c0_64] : memref<2x7x22x16xf32, #tpu.memory_space<vmem>>, vector<1x1x16x16xf32>
    %64 = vector.shape_cast %63 : vector<1x1x16x16xf32> to vector<16x16xf32>
    %65 = vector.broadcast %62 : f32 to vector<16x16xf32>
    %66 = arith.mulf %65, %64 : vector<16x16xf32>
    %c1_65 = arith.constant 1 : index
    %67 = memref.load %arg2[%c1_65] : memref<98xf32, #tpu.memory_space<smem>>
    %c0_66 = arith.constant 0 : index
    %c1_67 = arith.constant 1 : index
    %c0_68 = arith.constant 0 : index
    %c0_69 = arith.constant 0 : index
    %68 = vector.load %arg4[%c0_66, %c1_67, %c0_68, %c0_69] : memref<2x7x22x16xf32, #tpu.memory_space<vmem>>, vector<1x1x16x16xf32>
    %69 = vector.shape_cast %68 : vector<1x1x16x16xf32> to vector<16x16xf32>
    %70 = vector.broadcast %67 : f32 to vector<16x16xf32>
    %71 = arith.mulf %70, %69 : vector<16x16xf32>
    %72 = arith.addf %66, %71 : vector<16x16xf32>
    %c2_70 = arith.constant 2 : index
    %73 = memref.load %arg2[%c2_70] : memref<98xf32, #tpu.memory_space<smem>>
    %c0_71 = arith.constant 0 : index
    %c2_72 = arith.constant 2 : index
    %c0_73 = arith.constant 0 : index
    %c0_74 = arith.constant 0 : index
    %74 = vector.load %arg4[%c0_71, %c2_72, %c0_73, %c0_74] : memref<2x7x22x16xf32, #tpu.memory_space<vmem>>, vector<1x1x16x16xf32>
    %75 = vector.shape_cast %74 : vector<1x1x16x16xf32> to vector<16x16xf32>
    %76 = vector.broadcast %73 : f32 to vector<16x16xf32>
    %77 = arith.mulf %76, %75 : vector<16x16xf32>
    %78 = arith.addf %72, %77 : vector<16x16xf32>
    %c3_75 = arith.constant 3 : index
    %79 = memref.load %arg2[%c3_75] : memref<98xf32, #tpu.memory_space<smem>>
    %c0_76 = arith.constant 0 : index
    %c3_77 = arith.constant 3 : index
    %c0_78 = arith.constant 0 : index
    %c0_79 = arith.constant 0 : index
    %80 = vector.load %arg4[%c0_76, %c3_77, %c0_78, %c0_79] : memref<2x7x22x16xf32, #tpu.memory_space<vmem>>, vector<1x1x16x16xf32>
    %81 = vector.shape_cast %80 : vector<1x1x16x16xf32> to vector<16x16xf32>
    %82 = vector.broadcast %79 : f32 to vector<16x16xf32>
    %83 = arith.mulf %82, %81 : vector<16x16xf32>
    %84 = arith.addf %78, %83 : vector<16x16xf32>
    %c4_80 = arith.constant 4 : index
    %85 = memref.load %arg2[%c4_80] : memref<98xf32, #tpu.memory_space<smem>>
    %c0_81 = arith.constant 0 : index
    %c4_82 = arith.constant 4 : index
    %c0_83 = arith.constant 0 : index
    %c0_84 = arith.constant 0 : index
    %86 = vector.load %arg4[%c0_81, %c4_82, %c0_83, %c0_84] : memref<2x7x22x16xf32, #tpu.memory_space<vmem>>, vector<1x1x16x16xf32>
    %87 = vector.shape_cast %86 : vector<1x1x16x16xf32> to vector<16x16xf32>
    %88 = vector.broadcast %85 : f32 to vector<16x16xf32>
    %89 = arith.mulf %88, %87 : vector<16x16xf32>
    %90 = arith.addf %84, %89 : vector<16x16xf32>
    %c5_85 = arith.constant 5 : index
    %91 = memref.load %arg2[%c5_85] : memref<98xf32, #tpu.memory_space<smem>>
    %c0_86 = arith.constant 0 : index
    %c5_87 = arith.constant 5 : index
    %c0_88 = arith.constant 0 : index
    %c0_89 = arith.constant 0 : index
    %92 = vector.load %arg4[%c0_86, %c5_87, %c0_88, %c0_89] : memref<2x7x22x16xf32, #tpu.memory_space<vmem>>, vector<1x1x16x16xf32>
    %93 = vector.shape_cast %92 : vector<1x1x16x16xf32> to vector<16x16xf32>
    %94 = vector.broadcast %91 : f32 to vector<16x16xf32>
    %95 = arith.mulf %94, %93 : vector<16x16xf32>
    %96 = arith.addf %90, %95 : vector<16x16xf32>
    %c6_90 = arith.constant 6 : index
    %97 = memref.load %arg2[%c6_90] : memref<98xf32, #tpu.memory_space<smem>>
    %c0_91 = arith.constant 0 : index
    %c6_92 = arith.constant 6 : index
    %c0_93 = arith.constant 0 : index
    %c0_94 = arith.constant 0 : index
    %98 = vector.load %arg4[%c0_91, %c6_92, %c0_93, %c0_94] : memref<2x7x22x16xf32, #tpu.memory_space<vmem>>, vector<1x1x16x16xf32>
    %99 = vector.shape_cast %98 : vector<1x1x16x16xf32> to vector<16x16xf32>
    %100 = vector.broadcast %97 : f32 to vector<16x16xf32>
    %101 = arith.mulf %100, %99 : vector<16x16xf32>
    %102 = arith.addf %96, %101 : vector<16x16xf32>
    %c7 = arith.constant 7 : index
    %103 = memref.load %arg2[%c7] : memref<98xf32, #tpu.memory_space<smem>>
    %c0_95 = arith.constant 0 : index
    %c0_96 = arith.constant 0 : index
    %c1_97 = arith.constant 1 : index
    %c0_98 = arith.constant 0 : index
    %104 = vector.load %arg4[%c0_95, %c0_96, %c1_97, %c0_98] : memref<2x7x22x16xf32, #tpu.memory_space<vmem>>, vector<1x1x16x16xf32>
    %105 = vector.shape_cast %104 : vector<1x1x16x16xf32> to vector<16x16xf32>
    %106 = vector.broadcast %103 : f32 to vector<16x16xf32>
    %107 = arith.mulf %106, %105 : vector<16x16xf32>
    %108 = arith.addf %102, %107 : vector<16x16xf32>
    %c8 = arith.constant 8 : index
    %109 = memref.load %arg2[%c8] : memref<98xf32, #tpu.memory_space<smem>>
    %c0_99 = arith.constant 0 : index
    %c1_100 = arith.constant 1 : index
    %c1_101 = arith.constant 1 : index
    %c0_102 = arith.constant 0 : index
    %110 = vector.load %arg4[%c0_99, %c1_100, %c1_101, %c0_102] : memref<2x7x22x16xf32, #tpu.memory_space<vmem>>, vector<1x1x16x16xf32>
    %111 = vector.shape_cast %110 : vector<1x1x16x16xf32> to vector<16x16xf32>
    %112 = vector.broadcast %109 : f32 to vector<16x16xf32>
    %113 = arith.mulf %112, %111 : vector<16x16xf32>
    %114 = arith.addf %108, %113 : vector<16x16xf32>
    %c9 = arith.constant 9 : index
    %115 = memref.load %arg2[%c9] : memref<98xf32, #tpu.memory_space<smem>>
    %c0_103 = arith.constant 0 : index
    %c2_104 = arith.constant 2 : index
    %c1_105 = arith.constant 1 : index
    %c0_106 = arith.constant 0 : index
    %116 = vector.load %arg4[%c0_103, %c2_104, %c1_105, %c0_106] : memref<2x7x22x16xf32, #tpu.memory_space<vmem>>, vector<1x1x16x16xf32>
    %117 = vector.shape_cast %116 : vector<1x1x16x16xf32> to vector<16x16xf32>
    %118 = vector.broadcast %115 : f32 to vector<16x16xf32>
    %119 = arith.mulf %118, %117 : vector<16x16xf32>
    %120 = arith.addf %114, %119 : vector<16x16xf32>
    %c10 = arith.constant 10 : index
    %121 = memref.load %arg2[%c10] : memref<98xf32, #tpu.memory_space<smem>>
    %c0_107 = arith.constant 0 : index
    %c3_108 = arith.constant 3 : index
    %c1_109 = arith.constant 1 : index
    %c0_110 = arith.constant 0 : index
    %122 = vector.load %arg4[%c0_107, %c3_108, %c1_109, %c0_110] : memref<2x7x22x16xf32, #tpu.memory_space<vmem>>, vector<1x1x16x16xf32>
    %123 = vector.shape_cast %122 : vector<1x1x16x16xf32> to vector<16x16xf32>
    %124 = vector.broadcast %121 : f32 to vector<16x16xf32>
    %125 = arith.mulf %124, %123 : vector<16x16xf32>
    %126 = arith.addf %120, %125 : vector<16x16xf32>
    %c11 = arith.constant 11 : index
    %127 = memref.load %arg2[%c11] : memref<98xf32, #tpu.memory_space<smem>>
    %c0_111 = arith.constant 0 : index
    %c4_112 = arith.constant 4 : index
    %c1_113 = arith.constant 1 : index
    %c0_114 = arith.constant 0 : index
    %128 = vector.load %arg4[%c0_111, %c4_112, %c1_113, %c0_114] : memref<2x7x22x16xf32, #tpu.memory_space<vmem>>, vector<1x1x16x16xf32>
    %129 = vector.shape_cast %128 : vector<1x1x16x16xf32> to vector<16x16xf32>
    %130 = vector.broadcast %127 : f32 to vector<16x16xf32>
    %131 = arith.mulf %130, %129 : vector<16x16xf32>
    %132 = arith.addf %126, %131 : vector<16x16xf32>
    %c12 = arith.constant 12 : index
    %133 = memref.load %arg2[%c12] : memref<98xf32, #tpu.memory_space<smem>>
    %c0_115 = arith.constant 0 : index
    %c5_116 = arith.constant 5 : index
    %c1_117 = arith.constant 1 : index
    %c0_118 = arith.constant 0 : index
    %134 = vector.load %arg4[%c0_115, %c5_116, %c1_117, %c0_118] : memref<2x7x22x16xf32, #tpu.memory_space<vmem>>, vector<1x1x16x16xf32>
    %135 = vector.shape_cast %134 : vector<1x1x16x16xf32> to vector<16x16xf32>
    %136 = vector.broadcast %133 : f32 to vector<16x16xf32>
    %137 = arith.mulf %136, %135 : vector<16x16xf32>
    %138 = arith.addf %132, %137 : vector<16x16xf32>
    %c13 = arith.constant 13 : index
    %139 = memref.load %arg2[%c13] : memref<98xf32, #tpu.memory_space<smem>>
    %c0_119 = arith.constant 0 : index
    %c6_120 = arith.constant 6 : index
    %c1_121 = arith.constant 1 : index
    %c0_122 = arith.constant 0 : index
    %140 = vector.load %arg4[%c0_119, %c6_120, %c1_121, %c0_122] : memref<2x7x22x16xf32, #tpu.memory_space<vmem>>, vector<1x1x16x16xf32>
    %141 = vector.shape_cast %140 : vector<1x1x16x16xf32> to vector<16x16xf32>
    %142 = vector.broadcast %139 : f32 to vector<16x16xf32>
    %143 = arith.mulf %142, %141 : vector<16x16xf32>
    %144 = arith.addf %138, %143 : vector<16x16xf32>
    %c14 = arith.constant 14 : index
    %145 = memref.load %arg2[%c14] : memref<98xf32, #tpu.memory_space<smem>>
    %c0_123 = arith.constant 0 : index
    %c0_124 = arith.constant 0 : index
    %c2_125 = arith.constant 2 : index
    %c0_126 = arith.constant 0 : index
    %146 = vector.load %arg4[%c0_123, %c0_124, %c2_125, %c0_126] : memref<2x7x22x16xf32, #tpu.memory_space<vmem>>, vector<1x1x16x16xf32>
    %147 = vector.shape_cast %146 : vector<1x1x16x16xf32> to vector<16x16xf32>
    %148 = vector.broadcast %145 : f32 to vector<16x16xf32>
    %149 = arith.mulf %148, %147 : vector<16x16xf32>
    %150 = arith.addf %144, %149 : vector<16x16xf32>
    %c15 = arith.constant 15 : index
    %151 = memref.load %arg2[%c15] : memref<98xf32, #tpu.memory_space<smem>>
    %c0_127 = arith.constant 0 : index
    %c1_128 = arith.constant 1 : index
    %c2_129 = arith.constant 2 : index
    %c0_130 = arith.constant 0 : index
    %152 = vector.load %arg4[%c0_127, %c1_128, %c2_129, %c0_130] : memref<2x7x22x16xf32, #tpu.memory_space<vmem>>, vector<1x1x16x16xf32>
    %153 = vector.shape_cast %152 : vector<1x1x16x16xf32> to vector<16x16xf32>
    %154 = vector.broadcast %151 : f32 to vector<16x16xf32>
    %155 = arith.mulf %154, %153 : vector<16x16xf32>
    %156 = arith.addf %150, %155 : vector<16x16xf32>
    %c16 = arith.constant 16 : index
    %157 = memref.load %arg2[%c16] : memref<98xf32, #tpu.memory_space<smem>>
    %c0_131 = arith.constant 0 : index
    %c2_132 = arith.constant 2 : index
    %c2_133 = arith.constant 2 : index
    %c0_134 = arith.constant 0 : index
    %158 = vector.load %arg4[%c0_131, %c2_132, %c2_133, %c0_134] : memref<2x7x22x16xf32, #tpu.memory_space<vmem>>, vector<1x1x16x16xf32>
    %159 = vector.shape_cast %158 : vector<1x1x16x16xf32> to vector<16x16xf32>
    %160 = vector.broadcast %157 : f32 to vector<16x16xf32>
    %161 = arith.mulf %160, %159 : vector<16x16xf32>
    %162 = arith.addf %156, %161 : vector<16x16xf32>
    %c17 = arith.constant 17 : index
    %163 = memref.load %arg2[%c17] : memref<98xf32, #tpu.memory_space<smem>>
    %c0_135 = arith.constant 0 : index
    %c3_136 = arith.constant 3 : index
    %c2_137 = arith.constant 2 : index
    %c0_138 = arith.constant 0 : index
    %164 = vector.load %arg4[%c0_135, %c3_136, %c2_137, %c0_138] : memref<2x7x22x16xf32, #tpu.memory_space<vmem>>, vector<1x1x16x16xf32>
    %165 = vector.shape_cast %164 : vector<1x1x16x16xf32> to vector<16x16xf32>
    %166 = vector.broadcast %163 : f32 to vector<16x16xf32>
    %167 = arith.mulf %166, %165 : vector<16x16xf32>
    %168 = arith.addf %162, %167 : vector<16x16xf32>
    %c18 = arith.constant 18 : index
    %169 = memref.load %arg2[%c18] : memref<98xf32, #tpu.memory_space<smem>>
    %c0_139 = arith.constant 0 : index
    %c4_140 = arith.constant 4 : index
    %c2_141 = arith.constant 2 : index
    %c0_142 = arith.constant 0 : index
    %170 = vector.load %arg4[%c0_139, %c4_140, %c2_141, %c0_142] : memref<2x7x22x16xf32, #tpu.memory_space<vmem>>, vector<1x1x16x16xf32>
    %171 = vector.shape_cast %170 : vector<1x1x16x16xf32> to vector<16x16xf32>
    %172 = vector.broadcast %169 : f32 to vector<16x16xf32>
    %173 = arith.mulf %172, %171 : vector<16x16xf32>
    %174 = arith.addf %168, %173 : vector<16x16xf32>
    %c19 = arith.constant 19 : index
    %175 = memref.load %arg2[%c19] : memref<98xf32, #tpu.memory_space<smem>>
    %c0_143 = arith.constant 0 : index
    %c5_144 = arith.constant 5 : index
    %c2_145 = arith.constant 2 : index
    %c0_146 = arith.constant 0 : index
    %176 = vector.load %arg4[%c0_143, %c5_144, %c2_145, %c0_146] : memref<2x7x22x16xf32, #tpu.memory_space<vmem>>, vector<1x1x16x16xf32>
    %177 = vector.shape_cast %176 : vector<1x1x16x16xf32> to vector<16x16xf32>
    %178 = vector.broadcast %175 : f32 to vector<16x16xf32>
    %179 = arith.mulf %178, %177 : vector<16x16xf32>
    %180 = arith.addf %174, %179 : vector<16x16xf32>
    %c20 = arith.constant 20 : index
    %181 = memref.load %arg2[%c20] : memref<98xf32, #tpu.memory_space<smem>>
    %c0_147 = arith.constant 0 : index
    %c6_148 = arith.constant 6 : index
    %c2_149 = arith.constant 2 : index
    %c0_150 = arith.constant 0 : index
    %182 = vector.load %arg4[%c0_147, %c6_148, %c2_149, %c0_150] : memref<2x7x22x16xf32, #tpu.memory_space<vmem>>, vector<1x1x16x16xf32>
    %183 = vector.shape_cast %182 : vector<1x1x16x16xf32> to vector<16x16xf32>
    %184 = vector.broadcast %181 : f32 to vector<16x16xf32>
    %185 = arith.mulf %184, %183 : vector<16x16xf32>
    %186 = arith.addf %180, %185 : vector<16x16xf32>
    %c21 = arith.constant 21 : index
    %187 = memref.load %arg2[%c21] : memref<98xf32, #tpu.memory_space<smem>>
    %c0_151 = arith.constant 0 : index
    %c0_152 = arith.constant 0 : index
    %c3_153 = arith.constant 3 : index
    %c0_154 = arith.constant 0 : index
    %188 = vector.load %arg4[%c0_151, %c0_152, %c3_153, %c0_154] : memref<2x7x22x16xf32, #tpu.memory_space<vmem>>, vector<1x1x16x16xf32>
    %189 = vector.shape_cast %188 : vector<1x1x16x16xf32> to vector<16x16xf32>
    %190 = vector.broadcast %187 : f32 to vector<16x16xf32>
    %191 = arith.mulf %190, %189 : vector<16x16xf32>
    %192 = arith.addf %186, %191 : vector<16x16xf32>
    %c22 = arith.constant 22 : index
    %193 = memref.load %arg2[%c22] : memref<98xf32, #tpu.memory_space<smem>>
    %c0_155 = arith.constant 0 : index
    %c1_156 = arith.constant 1 : index
    %c3_157 = arith.constant 3 : index
    %c0_158 = arith.constant 0 : index
    %194 = vector.load %arg4[%c0_155, %c1_156, %c3_157, %c0_158] : memref<2x7x22x16xf32, #tpu.memory_space<vmem>>, vector<1x1x16x16xf32>
    %195 = vector.shape_cast %194 : vector<1x1x16x16xf32> to vector<16x16xf32>
    %196 = vector.broadcast %193 : f32 to vector<16x16xf32>
    %197 = arith.mulf %196, %195 : vector<16x16xf32>
    %198 = arith.addf %192, %197 : vector<16x16xf32>
    %c23 = arith.constant 23 : index
    %199 = memref.load %arg2[%c23] : memref<98xf32, #tpu.memory_space<smem>>
    %c0_159 = arith.constant 0 : index
    %c2_160 = arith.constant 2 : index
    %c3_161 = arith.constant 3 : index
    %c0_162 = arith.constant 0 : index
    %200 = vector.load %arg4[%c0_159, %c2_160, %c3_161, %c0_162] : memref<2x7x22x16xf32, #tpu.memory_space<vmem>>, vector<1x1x16x16xf32>
    %201 = vector.shape_cast %200 : vector<1x1x16x16xf32> to vector<16x16xf32>
    %202 = vector.broadcast %199 : f32 to vector<16x16xf32>
    %203 = arith.mulf %202, %201 : vector<16x16xf32>
    %204 = arith.addf %198, %203 : vector<16x16xf32>
    %c24 = arith.constant 24 : index
    %205 = memref.load %arg2[%c24] : memref<98xf32, #tpu.memory_space<smem>>
    %c0_163 = arith.constant 0 : index
    %c3_164 = arith.constant 3 : index
    %c3_165 = arith.constant 3 : index
    %c0_166 = arith.constant 0 : index
    %206 = vector.load %arg4[%c0_163, %c3_164, %c3_165, %c0_166] : memref<2x7x22x16xf32, #tpu.memory_space<vmem>>, vector<1x1x16x16xf32>
    %207 = vector.shape_cast %206 : vector<1x1x16x16xf32> to vector<16x16xf32>
    %208 = vector.broadcast %205 : f32 to vector<16x16xf32>
    %209 = arith.mulf %208, %207 : vector<16x16xf32>
    %210 = arith.addf %204, %209 : vector<16x16xf32>
    %c25 = arith.constant 25 : index
    %211 = memref.load %arg2[%c25] : memref<98xf32, #tpu.memory_space<smem>>
    %c0_167 = arith.constant 0 : index
    %c4_168 = arith.constant 4 : index
    %c3_169 = arith.constant 3 : index
    %c0_170 = arith.constant 0 : index
    %212 = vector.load %arg4[%c0_167, %c4_168, %c3_169, %c0_170] : memref<2x7x22x16xf32, #tpu.memory_space<vmem>>, vector<1x1x16x16xf32>
    %213 = vector.shape_cast %212 : vector<1x1x16x16xf32> to vector<16x16xf32>
    %214 = vector.broadcast %211 : f32 to vector<16x16xf32>
    %215 = arith.mulf %214, %213 : vector<16x16xf32>
    %216 = arith.addf %210, %215 : vector<16x16xf32>
    %c26 = arith.constant 26 : index
    %217 = memref.load %arg2[%c26] : memref<98xf32, #tpu.memory_space<smem>>
    %c0_171 = arith.constant 0 : index
    %c5_172 = arith.constant 5 : index
    %c3_173 = arith.constant 3 : index
    %c0_174 = arith.constant 0 : index
    %218 = vector.load %arg4[%c0_171, %c5_172, %c3_173, %c0_174] : memref<2x7x22x16xf32, #tpu.memory_space<vmem>>, vector<1x1x16x16xf32>
    %219 = vector.shape_cast %218 : vector<1x1x16x16xf32> to vector<16x16xf32>
    %220 = vector.broadcast %217 : f32 to vector<16x16xf32>
    %221 = arith.mulf %220, %219 : vector<16x16xf32>
    %222 = arith.addf %216, %221 : vector<16x16xf32>
    %c27 = arith.constant 27 : index
    %223 = memref.load %arg2[%c27] : memref<98xf32, #tpu.memory_space<smem>>
    %c0_175 = arith.constant 0 : index
    %c6_176 = arith.constant 6 : index
    %c3_177 = arith.constant 3 : index
    %c0_178 = arith.constant 0 : index
    %224 = vector.load %arg4[%c0_175, %c6_176, %c3_177, %c0_178] : memref<2x7x22x16xf32, #tpu.memory_space<vmem>>, vector<1x1x16x16xf32>
    %225 = vector.shape_cast %224 : vector<1x1x16x16xf32> to vector<16x16xf32>
    %226 = vector.broadcast %223 : f32 to vector<16x16xf32>
    %227 = arith.mulf %226, %225 : vector<16x16xf32>
    %228 = arith.addf %222, %227 : vector<16x16xf32>
    %c28 = arith.constant 28 : index
    %229 = memref.load %arg2[%c28] : memref<98xf32, #tpu.memory_space<smem>>
    %c0_179 = arith.constant 0 : index
    %c0_180 = arith.constant 0 : index
    %c4_181 = arith.constant 4 : index
    %c0_182 = arith.constant 0 : index
    %230 = vector.load %arg4[%c0_179, %c0_180, %c4_181, %c0_182] : memref<2x7x22x16xf32, #tpu.memory_space<vmem>>, vector<1x1x16x16xf32>
    %231 = vector.shape_cast %230 : vector<1x1x16x16xf32> to vector<16x16xf32>
    %232 = vector.broadcast %229 : f32 to vector<16x16xf32>
    %233 = arith.mulf %232, %231 : vector<16x16xf32>
    %234 = arith.addf %228, %233 : vector<16x16xf32>
    %c29 = arith.constant 29 : index
    %235 = memref.load %arg2[%c29] : memref<98xf32, #tpu.memory_space<smem>>
    %c0_183 = arith.constant 0 : index
    %c1_184 = arith.constant 1 : index
    %c4_185 = arith.constant 4 : index
    %c0_186 = arith.constant 0 : index
    %236 = vector.load %arg4[%c0_183, %c1_184, %c4_185, %c0_186] : memref<2x7x22x16xf32, #tpu.memory_space<vmem>>, vector<1x1x16x16xf32>
    %237 = vector.shape_cast %236 : vector<1x1x16x16xf32> to vector<16x16xf32>
    %238 = vector.broadcast %235 : f32 to vector<16x16xf32>
    %239 = arith.mulf %238, %237 : vector<16x16xf32>
    %240 = arith.addf %234, %239 : vector<16x16xf32>
    %c30 = arith.constant 30 : index
    %241 = memref.load %arg2[%c30] : memref<98xf32, #tpu.memory_space<smem>>
    %c0_187 = arith.constant 0 : index
    %c2_188 = arith.constant 2 : index
    %c4_189 = arith.constant 4 : index
    %c0_190 = arith.constant 0 : index
    %242 = vector.load %arg4[%c0_187, %c2_188, %c4_189, %c0_190] : memref<2x7x22x16xf32, #tpu.memory_space<vmem>>, vector<1x1x16x16xf32>
    %243 = vector.shape_cast %242 : vector<1x1x16x16xf32> to vector<16x16xf32>
    %244 = vector.broadcast %241 : f32 to vector<16x16xf32>
    %245 = arith.mulf %244, %243 : vector<16x16xf32>
    %246 = arith.addf %240, %245 : vector<16x16xf32>
    %c31 = arith.constant 31 : index
    %247 = memref.load %arg2[%c31] : memref<98xf32, #tpu.memory_space<smem>>
    %c0_191 = arith.constant 0 : index
    %c3_192 = arith.constant 3 : index
    %c4_193 = arith.constant 4 : index
    %c0_194 = arith.constant 0 : index
    %248 = vector.load %arg4[%c0_191, %c3_192, %c4_193, %c0_194] : memref<2x7x22x16xf32, #tpu.memory_space<vmem>>, vector<1x1x16x16xf32>
    %249 = vector.shape_cast %248 : vector<1x1x16x16xf32> to vector<16x16xf32>
    %250 = vector.broadcast %247 : f32 to vector<16x16xf32>
    %251 = arith.mulf %250, %249 : vector<16x16xf32>
    %252 = arith.addf %246, %251 : vector<16x16xf32>
    %c32 = arith.constant 32 : index
    %253 = memref.load %arg2[%c32] : memref<98xf32, #tpu.memory_space<smem>>
    %c0_195 = arith.constant 0 : index
    %c4_196 = arith.constant 4 : index
    %c4_197 = arith.constant 4 : index
    %c0_198 = arith.constant 0 : index
    %254 = vector.load %arg4[%c0_195, %c4_196, %c4_197, %c0_198] : memref<2x7x22x16xf32, #tpu.memory_space<vmem>>, vector<1x1x16x16xf32>
    %255 = vector.shape_cast %254 : vector<1x1x16x16xf32> to vector<16x16xf32>
    %256 = vector.broadcast %253 : f32 to vector<16x16xf32>
    %257 = arith.mulf %256, %255 : vector<16x16xf32>
    %258 = arith.addf %252, %257 : vector<16x16xf32>
    %c33 = arith.constant 33 : index
    %259 = memref.load %arg2[%c33] : memref<98xf32, #tpu.memory_space<smem>>
    %c0_199 = arith.constant 0 : index
    %c5_200 = arith.constant 5 : index
    %c4_201 = arith.constant 4 : index
    %c0_202 = arith.constant 0 : index
    %260 = vector.load %arg4[%c0_199, %c5_200, %c4_201, %c0_202] : memref<2x7x22x16xf32, #tpu.memory_space<vmem>>, vector<1x1x16x16xf32>
    %261 = vector.shape_cast %260 : vector<1x1x16x16xf32> to vector<16x16xf32>
    %262 = vector.broadcast %259 : f32 to vector<16x16xf32>
    %263 = arith.mulf %262, %261 : vector<16x16xf32>
    %264 = arith.addf %258, %263 : vector<16x16xf32>
    %c34 = arith.constant 34 : index
    %265 = memref.load %arg2[%c34] : memref<98xf32, #tpu.memory_space<smem>>
    %c0_203 = arith.constant 0 : index
    %c6_204 = arith.constant 6 : index
    %c4_205 = arith.constant 4 : index
    %c0_206 = arith.constant 0 : index
    %266 = vector.load %arg4[%c0_203, %c6_204, %c4_205, %c0_206] : memref<2x7x22x16xf32, #tpu.memory_space<vmem>>, vector<1x1x16x16xf32>
    %267 = vector.shape_cast %266 : vector<1x1x16x16xf32> to vector<16x16xf32>
    %268 = vector.broadcast %265 : f32 to vector<16x16xf32>
    %269 = arith.mulf %268, %267 : vector<16x16xf32>
    %270 = arith.addf %264, %269 : vector<16x16xf32>
    %c35 = arith.constant 35 : index
    %271 = memref.load %arg2[%c35] : memref<98xf32, #tpu.memory_space<smem>>
    %c0_207 = arith.constant 0 : index
    %c0_208 = arith.constant 0 : index
    %c5_209 = arith.constant 5 : index
    %c0_210 = arith.constant 0 : index
    %272 = vector.load %arg4[%c0_207, %c0_208, %c5_209, %c0_210] : memref<2x7x22x16xf32, #tpu.memory_space<vmem>>, vector<1x1x16x16xf32>
    %273 = vector.shape_cast %272 : vector<1x1x16x16xf32> to vector<16x16xf32>
    %274 = vector.broadcast %271 : f32 to vector<16x16xf32>
    %275 = arith.mulf %274, %273 : vector<16x16xf32>
    %276 = arith.addf %270, %275 : vector<16x16xf32>
    %c36 = arith.constant 36 : index
    %277 = memref.load %arg2[%c36] : memref<98xf32, #tpu.memory_space<smem>>
    %c0_211 = arith.constant 0 : index
    %c1_212 = arith.constant 1 : index
    %c5_213 = arith.constant 5 : index
    %c0_214 = arith.constant 0 : index
    %278 = vector.load %arg4[%c0_211, %c1_212, %c5_213, %c0_214] : memref<2x7x22x16xf32, #tpu.memory_space<vmem>>, vector<1x1x16x16xf32>
    %279 = vector.shape_cast %278 : vector<1x1x16x16xf32> to vector<16x16xf32>
    %280 = vector.broadcast %277 : f32 to vector<16x16xf32>
    %281 = arith.mulf %280, %279 : vector<16x16xf32>
    %282 = arith.addf %276, %281 : vector<16x16xf32>
    %c37 = arith.constant 37 : index
    %283 = memref.load %arg2[%c37] : memref<98xf32, #tpu.memory_space<smem>>
    %c0_215 = arith.constant 0 : index
    %c2_216 = arith.constant 2 : index
    %c5_217 = arith.constant 5 : index
    %c0_218 = arith.constant 0 : index
    %284 = vector.load %arg4[%c0_215, %c2_216, %c5_217, %c0_218] : memref<2x7x22x16xf32, #tpu.memory_space<vmem>>, vector<1x1x16x16xf32>
    %285 = vector.shape_cast %284 : vector<1x1x16x16xf32> to vector<16x16xf32>
    %286 = vector.broadcast %283 : f32 to vector<16x16xf32>
    %287 = arith.mulf %286, %285 : vector<16x16xf32>
    %288 = arith.addf %282, %287 : vector<16x16xf32>
    %c38 = arith.constant 38 : index
    %289 = memref.load %arg2[%c38] : memref<98xf32, #tpu.memory_space<smem>>
    %c0_219 = arith.constant 0 : index
    %c3_220 = arith.constant 3 : index
    %c5_221 = arith.constant 5 : index
    %c0_222 = arith.constant 0 : index
    %290 = vector.load %arg4[%c0_219, %c3_220, %c5_221, %c0_222] : memref<2x7x22x16xf32, #tpu.memory_space<vmem>>, vector<1x1x16x16xf32>
    %291 = vector.shape_cast %290 : vector<1x1x16x16xf32> to vector<16x16xf32>
    %292 = vector.broadcast %289 : f32 to vector<16x16xf32>
    %293 = arith.mulf %292, %291 : vector<16x16xf32>
    %294 = arith.addf %288, %293 : vector<16x16xf32>
    %c39 = arith.constant 39 : index
    %295 = memref.load %arg2[%c39] : memref<98xf32, #tpu.memory_space<smem>>
    %c0_223 = arith.constant 0 : index
    %c4_224 = arith.constant 4 : index
    %c5_225 = arith.constant 5 : index
    %c0_226 = arith.constant 0 : index
    %296 = vector.load %arg4[%c0_223, %c4_224, %c5_225, %c0_226] : memref<2x7x22x16xf32, #tpu.memory_space<vmem>>, vector<1x1x16x16xf32>
    %297 = vector.shape_cast %296 : vector<1x1x16x16xf32> to vector<16x16xf32>
    %298 = vector.broadcast %295 : f32 to vector<16x16xf32>
    %299 = arith.mulf %298, %297 : vector<16x16xf32>
    %300 = arith.addf %294, %299 : vector<16x16xf32>
    %c40 = arith.constant 40 : index
    %301 = memref.load %arg2[%c40] : memref<98xf32, #tpu.memory_space<smem>>
    %c0_227 = arith.constant 0 : index
    %c5_228 = arith.constant 5 : index
    %c5_229 = arith.constant 5 : index
    %c0_230 = arith.constant 0 : index
    %302 = vector.load %arg4[%c0_227, %c5_228, %c5_229, %c0_230] : memref<2x7x22x16xf32, #tpu.memory_space<vmem>>, vector<1x1x16x16xf32>
    %303 = vector.shape_cast %302 : vector<1x1x16x16xf32> to vector<16x16xf32>
    %304 = vector.broadcast %301 : f32 to vector<16x16xf32>
    %305 = arith.mulf %304, %303 : vector<16x16xf32>
    %306 = arith.addf %300, %305 : vector<16x16xf32>
    %c41 = arith.constant 41 : index
    %307 = memref.load %arg2[%c41] : memref<98xf32, #tpu.memory_space<smem>>
    %c0_231 = arith.constant 0 : index
    %c6_232 = arith.constant 6 : index
    %c5_233 = arith.constant 5 : index
    %c0_234 = arith.constant 0 : index
    %308 = vector.load %arg4[%c0_231, %c6_232, %c5_233, %c0_234] : memref<2x7x22x16xf32, #tpu.memory_space<vmem>>, vector<1x1x16x16xf32>
    %309 = vector.shape_cast %308 : vector<1x1x16x16xf32> to vector<16x16xf32>
    %310 = vector.broadcast %307 : f32 to vector<16x16xf32>
    %311 = arith.mulf %310, %309 : vector<16x16xf32>
    %312 = arith.addf %306, %311 : vector<16x16xf32>
    %c42 = arith.constant 42 : index
    %313 = memref.load %arg2[%c42] : memref<98xf32, #tpu.memory_space<smem>>
    %c0_235 = arith.constant 0 : index
    %c0_236 = arith.constant 0 : index
    %c6_237 = arith.constant 6 : index
    %c0_238 = arith.constant 0 : index
    %314 = vector.load %arg4[%c0_235, %c0_236, %c6_237, %c0_238] : memref<2x7x22x16xf32, #tpu.memory_space<vmem>>, vector<1x1x16x16xf32>
    %315 = vector.shape_cast %314 : vector<1x1x16x16xf32> to vector<16x16xf32>
    %316 = vector.broadcast %313 : f32 to vector<16x16xf32>
    %317 = arith.mulf %316, %315 : vector<16x16xf32>
    %318 = arith.addf %312, %317 : vector<16x16xf32>
    %c43 = arith.constant 43 : index
    %319 = memref.load %arg2[%c43] : memref<98xf32, #tpu.memory_space<smem>>
    %c0_239 = arith.constant 0 : index
    %c1_240 = arith.constant 1 : index
    %c6_241 = arith.constant 6 : index
    %c0_242 = arith.constant 0 : index
    %320 = vector.load %arg4[%c0_239, %c1_240, %c6_241, %c0_242] : memref<2x7x22x16xf32, #tpu.memory_space<vmem>>, vector<1x1x16x16xf32>
    %321 = vector.shape_cast %320 : vector<1x1x16x16xf32> to vector<16x16xf32>
    %322 = vector.broadcast %319 : f32 to vector<16x16xf32>
    %323 = arith.mulf %322, %321 : vector<16x16xf32>
    %324 = arith.addf %318, %323 : vector<16x16xf32>
    %c44 = arith.constant 44 : index
    %325 = memref.load %arg2[%c44] : memref<98xf32, #tpu.memory_space<smem>>
    %c0_243 = arith.constant 0 : index
    %c2_244 = arith.constant 2 : index
    %c6_245 = arith.constant 6 : index
    %c0_246 = arith.constant 0 : index
    %326 = vector.load %arg4[%c0_243, %c2_244, %c6_245, %c0_246] : memref<2x7x22x16xf32, #tpu.memory_space<vmem>>, vector<1x1x16x16xf32>
    %327 = vector.shape_cast %326 : vector<1x1x16x16xf32> to vector<16x16xf32>
    %328 = vector.broadcast %325 : f32 to vector<16x16xf32>
    %329 = arith.mulf %328, %327 : vector<16x16xf32>
    %330 = arith.addf %324, %329 : vector<16x16xf32>
    %c45 = arith.constant 45 : index
    %331 = memref.load %arg2[%c45] : memref<98xf32, #tpu.memory_space<smem>>
    %c0_247 = arith.constant 0 : index
    %c3_248 = arith.constant 3 : index
    %c6_249 = arith.constant 6 : index
    %c0_250 = arith.constant 0 : index
    %332 = vector.load %arg4[%c0_247, %c3_248, %c6_249, %c0_250] : memref<2x7x22x16xf32, #tpu.memory_space<vmem>>, vector<1x1x16x16xf32>
    %333 = vector.shape_cast %332 : vector<1x1x16x16xf32> to vector<16x16xf32>
    %334 = vector.broadcast %331 : f32 to vector<16x16xf32>
    %335 = arith.mulf %334, %333 : vector<16x16xf32>
    %336 = arith.addf %330, %335 : vector<16x16xf32>
    %c46 = arith.constant 46 : index
    %337 = memref.load %arg2[%c46] : memref<98xf32, #tpu.memory_space<smem>>
    %c0_251 = arith.constant 0 : index
    %c4_252 = arith.constant 4 : index
    %c6_253 = arith.constant 6 : index
    %c0_254 = arith.constant 0 : index
    %338 = vector.load %arg4[%c0_251, %c4_252, %c6_253, %c0_254] : memref<2x7x22x16xf32, #tpu.memory_space<vmem>>, vector<1x1x16x16xf32>
    %339 = vector.shape_cast %338 : vector<1x1x16x16xf32> to vector<16x16xf32>
    %340 = vector.broadcast %337 : f32 to vector<16x16xf32>
    %341 = arith.mulf %340, %339 : vector<16x16xf32>
    %342 = arith.addf %336, %341 : vector<16x16xf32>
    %c47 = arith.constant 47 : index
    %343 = memref.load %arg2[%c47] : memref<98xf32, #tpu.memory_space<smem>>
    %c0_255 = arith.constant 0 : index
    %c5_256 = arith.constant 5 : index
    %c6_257 = arith.constant 6 : index
    %c0_258 = arith.constant 0 : index
    %344 = vector.load %arg4[%c0_255, %c5_256, %c6_257, %c0_258] : memref<2x7x22x16xf32, #tpu.memory_space<vmem>>, vector<1x1x16x16xf32>
    %345 = vector.shape_cast %344 : vector<1x1x16x16xf32> to vector<16x16xf32>
    %346 = vector.broadcast %343 : f32 to vector<16x16xf32>
    %347 = arith.mulf %346, %345 : vector<16x16xf32>
    %348 = arith.addf %342, %347 : vector<16x16xf32>
    %c48 = arith.constant 48 : index
    %349 = memref.load %arg2[%c48] : memref<98xf32, #tpu.memory_space<smem>>
    %c0_259 = arith.constant 0 : index
    %c6_260 = arith.constant 6 : index
    %c6_261 = arith.constant 6 : index
    %c0_262 = arith.constant 0 : index
    %350 = vector.load %arg4[%c0_259, %c6_260, %c6_261, %c0_262] : memref<2x7x22x16xf32, #tpu.memory_space<vmem>>, vector<1x1x16x16xf32>
    %351 = vector.shape_cast %350 : vector<1x1x16x16xf32> to vector<16x16xf32>
    %352 = vector.broadcast %349 : f32 to vector<16x16xf32>
    %353 = arith.mulf %352, %351 : vector<16x16xf32>
    %354 = arith.addf %348, %353 : vector<16x16xf32>
    %c49 = arith.constant 49 : index
    %355 = memref.load %arg2[%c49] : memref<98xf32, #tpu.memory_space<smem>>
    %c1_263 = arith.constant 1 : index
    %c0_264 = arith.constant 0 : index
    %c0_265 = arith.constant 0 : index
    %c0_266 = arith.constant 0 : index
    %356 = vector.load %arg4[%c1_263, %c0_264, %c0_265, %c0_266] : memref<2x7x22x16xf32, #tpu.memory_space<vmem>>, vector<1x1x16x16xf32>
    %357 = vector.shape_cast %356 : vector<1x1x16x16xf32> to vector<16x16xf32>
    %358 = vector.broadcast %355 : f32 to vector<16x16xf32>
    %359 = arith.mulf %358, %357 : vector<16x16xf32>
    %360 = arith.addf %354, %359 : vector<16x16xf32>
    %c50 = arith.constant 50 : index
    %361 = memref.load %arg2[%c50] : memref<98xf32, #tpu.memory_space<smem>>
    %c1_267 = arith.constant 1 : index
    %c1_268 = arith.constant 1 : index
    %c0_269 = arith.constant 0 : index
    %c0_270 = arith.constant 0 : index
    %362 = vector.load %arg4[%c1_267, %c1_268, %c0_269, %c0_270] : memref<2x7x22x16xf32, #tpu.memory_space<vmem>>, vector<1x1x16x16xf32>
    %363 = vector.shape_cast %362 : vector<1x1x16x16xf32> to vector<16x16xf32>
    %364 = vector.broadcast %361 : f32 to vector<16x16xf32>
    %365 = arith.mulf %364, %363 : vector<16x16xf32>
    %366 = arith.addf %360, %365 : vector<16x16xf32>
    %c51 = arith.constant 51 : index
    %367 = memref.load %arg2[%c51] : memref<98xf32, #tpu.memory_space<smem>>
    %c1_271 = arith.constant 1 : index
    %c2_272 = arith.constant 2 : index
    %c0_273 = arith.constant 0 : index
    %c0_274 = arith.constant 0 : index
    %368 = vector.load %arg4[%c1_271, %c2_272, %c0_273, %c0_274] : memref<2x7x22x16xf32, #tpu.memory_space<vmem>>, vector<1x1x16x16xf32>
    %369 = vector.shape_cast %368 : vector<1x1x16x16xf32> to vector<16x16xf32>
    %370 = vector.broadcast %367 : f32 to vector<16x16xf32>
    %371 = arith.mulf %370, %369 : vector<16x16xf32>
    %372 = arith.addf %366, %371 : vector<16x16xf32>
    %c52 = arith.constant 52 : index
    %373 = memref.load %arg2[%c52] : memref<98xf32, #tpu.memory_space<smem>>
    %c1_275 = arith.constant 1 : index
    %c3_276 = arith.constant 3 : index
    %c0_277 = arith.constant 0 : index
    %c0_278 = arith.constant 0 : index
    %374 = vector.load %arg4[%c1_275, %c3_276, %c0_277, %c0_278] : memref<2x7x22x16xf32, #tpu.memory_space<vmem>>, vector<1x1x16x16xf32>
    %375 = vector.shape_cast %374 : vector<1x1x16x16xf32> to vector<16x16xf32>
    %376 = vector.broadcast %373 : f32 to vector<16x16xf32>
    %377 = arith.mulf %376, %375 : vector<16x16xf32>
    %378 = arith.addf %372, %377 : vector<16x16xf32>
    %c53 = arith.constant 53 : index
    %379 = memref.load %arg2[%c53] : memref<98xf32, #tpu.memory_space<smem>>
    %c1_279 = arith.constant 1 : index
    %c4_280 = arith.constant 4 : index
    %c0_281 = arith.constant 0 : index
    %c0_282 = arith.constant 0 : index
    %380 = vector.load %arg4[%c1_279, %c4_280, %c0_281, %c0_282] : memref<2x7x22x16xf32, #tpu.memory_space<vmem>>, vector<1x1x16x16xf32>
    %381 = vector.shape_cast %380 : vector<1x1x16x16xf32> to vector<16x16xf32>
    %382 = vector.broadcast %379 : f32 to vector<16x16xf32>
    %383 = arith.mulf %382, %381 : vector<16x16xf32>
    %384 = arith.addf %378, %383 : vector<16x16xf32>
    %c54 = arith.constant 54 : index
    %385 = memref.load %arg2[%c54] : memref<98xf32, #tpu.memory_space<smem>>
    %c1_283 = arith.constant 1 : index
    %c5_284 = arith.constant 5 : index
    %c0_285 = arith.constant 0 : index
    %c0_286 = arith.constant 0 : index
    %386 = vector.load %arg4[%c1_283, %c5_284, %c0_285, %c0_286] : memref<2x7x22x16xf32, #tpu.memory_space<vmem>>, vector<1x1x16x16xf32>
    %387 = vector.shape_cast %386 : vector<1x1x16x16xf32> to vector<16x16xf32>
    %388 = vector.broadcast %385 : f32 to vector<16x16xf32>
    %389 = arith.mulf %388, %387 : vector<16x16xf32>
    %390 = arith.addf %384, %389 : vector<16x16xf32>
    %c55 = arith.constant 55 : index
    %391 = memref.load %arg2[%c55] : memref<98xf32, #tpu.memory_space<smem>>
    %c1_287 = arith.constant 1 : index
    %c6_288 = arith.constant 6 : index
    %c0_289 = arith.constant 0 : index
    %c0_290 = arith.constant 0 : index
    %392 = vector.load %arg4[%c1_287, %c6_288, %c0_289, %c0_290] : memref<2x7x22x16xf32, #tpu.memory_space<vmem>>, vector<1x1x16x16xf32>
    %393 = vector.shape_cast %392 : vector<1x1x16x16xf32> to vector<16x16xf32>
    %394 = vector.broadcast %391 : f32 to vector<16x16xf32>
    %395 = arith.mulf %394, %393 : vector<16x16xf32>
    %396 = arith.addf %390, %395 : vector<16x16xf32>
    %c56 = arith.constant 56 : index
    %397 = memref.load %arg2[%c56] : memref<98xf32, #tpu.memory_space<smem>>
    %c1_291 = arith.constant 1 : index
    %c0_292 = arith.constant 0 : index
    %c1_293 = arith.constant 1 : index
    %c0_294 = arith.constant 0 : index
    %398 = vector.load %arg4[%c1_291, %c0_292, %c1_293, %c0_294] : memref<2x7x22x16xf32, #tpu.memory_space<vmem>>, vector<1x1x16x16xf32>
    %399 = vector.shape_cast %398 : vector<1x1x16x16xf32> to vector<16x16xf32>
    %400 = vector.broadcast %397 : f32 to vector<16x16xf32>
    %401 = arith.mulf %400, %399 : vector<16x16xf32>
    %402 = arith.addf %396, %401 : vector<16x16xf32>
    %c57 = arith.constant 57 : index
    %403 = memref.load %arg2[%c57] : memref<98xf32, #tpu.memory_space<smem>>
    %c1_295 = arith.constant 1 : index
    %c1_296 = arith.constant 1 : index
    %c1_297 = arith.constant 1 : index
    %c0_298 = arith.constant 0 : index
    %404 = vector.load %arg4[%c1_295, %c1_296, %c1_297, %c0_298] : memref<2x7x22x16xf32, #tpu.memory_space<vmem>>, vector<1x1x16x16xf32>
    %405 = vector.shape_cast %404 : vector<1x1x16x16xf32> to vector<16x16xf32>
    %406 = vector.broadcast %403 : f32 to vector<16x16xf32>
    %407 = arith.mulf %406, %405 : vector<16x16xf32>
    %408 = arith.addf %402, %407 : vector<16x16xf32>
    %c58 = arith.constant 58 : index
    %409 = memref.load %arg2[%c58] : memref<98xf32, #tpu.memory_space<smem>>
    %c1_299 = arith.constant 1 : index
    %c2_300 = arith.constant 2 : index
    %c1_301 = arith.constant 1 : index
    %c0_302 = arith.constant 0 : index
    %410 = vector.load %arg4[%c1_299, %c2_300, %c1_301, %c0_302] : memref<2x7x22x16xf32, #tpu.memory_space<vmem>>, vector<1x1x16x16xf32>
    %411 = vector.shape_cast %410 : vector<1x1x16x16xf32> to vector<16x16xf32>
    %412 = vector.broadcast %409 : f32 to vector<16x16xf32>
    %413 = arith.mulf %412, %411 : vector<16x16xf32>
    %414 = arith.addf %408, %413 : vector<16x16xf32>
    %c59 = arith.constant 59 : index
    %415 = memref.load %arg2[%c59] : memref<98xf32, #tpu.memory_space<smem>>
    %c1_303 = arith.constant 1 : index
    %c3_304 = arith.constant 3 : index
    %c1_305 = arith.constant 1 : index
    %c0_306 = arith.constant 0 : index
    %416 = vector.load %arg4[%c1_303, %c3_304, %c1_305, %c0_306] : memref<2x7x22x16xf32, #tpu.memory_space<vmem>>, vector<1x1x16x16xf32>
    %417 = vector.shape_cast %416 : vector<1x1x16x16xf32> to vector<16x16xf32>
    %418 = vector.broadcast %415 : f32 to vector<16x16xf32>
    %419 = arith.mulf %418, %417 : vector<16x16xf32>
    %420 = arith.addf %414, %419 : vector<16x16xf32>
    %c60 = arith.constant 60 : index
    %421 = memref.load %arg2[%c60] : memref<98xf32, #tpu.memory_space<smem>>
    %c1_307 = arith.constant 1 : index
    %c4_308 = arith.constant 4 : index
    %c1_309 = arith.constant 1 : index
    %c0_310 = arith.constant 0 : index
    %422 = vector.load %arg4[%c1_307, %c4_308, %c1_309, %c0_310] : memref<2x7x22x16xf32, #tpu.memory_space<vmem>>, vector<1x1x16x16xf32>
    %423 = vector.shape_cast %422 : vector<1x1x16x16xf32> to vector<16x16xf32>
    %424 = vector.broadcast %421 : f32 to vector<16x16xf32>
    %425 = arith.mulf %424, %423 : vector<16x16xf32>
    %426 = arith.addf %420, %425 : vector<16x16xf32>
    %c61 = arith.constant 61 : index
    %427 = memref.load %arg2[%c61] : memref<98xf32, #tpu.memory_space<smem>>
    %c1_311 = arith.constant 1 : index
    %c5_312 = arith.constant 5 : index
    %c1_313 = arith.constant 1 : index
    %c0_314 = arith.constant 0 : index
    %428 = vector.load %arg4[%c1_311, %c5_312, %c1_313, %c0_314] : memref<2x7x22x16xf32, #tpu.memory_space<vmem>>, vector<1x1x16x16xf32>
    %429 = vector.shape_cast %428 : vector<1x1x16x16xf32> to vector<16x16xf32>
    %430 = vector.broadcast %427 : f32 to vector<16x16xf32>
    %431 = arith.mulf %430, %429 : vector<16x16xf32>
    %432 = arith.addf %426, %431 : vector<16x16xf32>
    %c62 = arith.constant 62 : index
    %433 = memref.load %arg2[%c62] : memref<98xf32, #tpu.memory_space<smem>>
    %c1_315 = arith.constant 1 : index
    %c6_316 = arith.constant 6 : index
    %c1_317 = arith.constant 1 : index
    %c0_318 = arith.constant 0 : index
    %434 = vector.load %arg4[%c1_315, %c6_316, %c1_317, %c0_318] : memref<2x7x22x16xf32, #tpu.memory_space<vmem>>, vector<1x1x16x16xf32>
    %435 = vector.shape_cast %434 : vector<1x1x16x16xf32> to vector<16x16xf32>
    %436 = vector.broadcast %433 : f32 to vector<16x16xf32>
    %437 = arith.mulf %436, %435 : vector<16x16xf32>
    %438 = arith.addf %432, %437 : vector<16x16xf32>
    %c63 = arith.constant 63 : index
    %439 = memref.load %arg2[%c63] : memref<98xf32, #tpu.memory_space<smem>>
    %c1_319 = arith.constant 1 : index
    %c0_320 = arith.constant 0 : index
    %c2_321 = arith.constant 2 : index
    %c0_322 = arith.constant 0 : index
    %440 = vector.load %arg4[%c1_319, %c0_320, %c2_321, %c0_322] : memref<2x7x22x16xf32, #tpu.memory_space<vmem>>, vector<1x1x16x16xf32>
    %441 = vector.shape_cast %440 : vector<1x1x16x16xf32> to vector<16x16xf32>
    %442 = vector.broadcast %439 : f32 to vector<16x16xf32>
    %443 = arith.mulf %442, %441 : vector<16x16xf32>
    %444 = arith.addf %438, %443 : vector<16x16xf32>
    %c64 = arith.constant 64 : index
    %445 = memref.load %arg2[%c64] : memref<98xf32, #tpu.memory_space<smem>>
    %c1_323 = arith.constant 1 : index
    %c1_324 = arith.constant 1 : index
    %c2_325 = arith.constant 2 : index
    %c0_326 = arith.constant 0 : index
    %446 = vector.load %arg4[%c1_323, %c1_324, %c2_325, %c0_326] : memref<2x7x22x16xf32, #tpu.memory_space<vmem>>, vector<1x1x16x16xf32>
    %447 = vector.shape_cast %446 : vector<1x1x16x16xf32> to vector<16x16xf32>
    %448 = vector.broadcast %445 : f32 to vector<16x16xf32>
    %449 = arith.mulf %448, %447 : vector<16x16xf32>
    %450 = arith.addf %444, %449 : vector<16x16xf32>
    %c65 = arith.constant 65 : index
    %451 = memref.load %arg2[%c65] : memref<98xf32, #tpu.memory_space<smem>>
    %c1_327 = arith.constant 1 : index
    %c2_328 = arith.constant 2 : index
    %c2_329 = arith.constant 2 : index
    %c0_330 = arith.constant 0 : index
    %452 = vector.load %arg4[%c1_327, %c2_328, %c2_329, %c0_330] : memref<2x7x22x16xf32, #tpu.memory_space<vmem>>, vector<1x1x16x16xf32>
    %453 = vector.shape_cast %452 : vector<1x1x16x16xf32> to vector<16x16xf32>
    %454 = vector.broadcast %451 : f32 to vector<16x16xf32>
    %455 = arith.mulf %454, %453 : vector<16x16xf32>
    %456 = arith.addf %450, %455 : vector<16x16xf32>
    %c66 = arith.constant 66 : index
    %457 = memref.load %arg2[%c66] : memref<98xf32, #tpu.memory_space<smem>>
    %c1_331 = arith.constant 1 : index
    %c3_332 = arith.constant 3 : index
    %c2_333 = arith.constant 2 : index
    %c0_334 = arith.constant 0 : index
    %458 = vector.load %arg4[%c1_331, %c3_332, %c2_333, %c0_334] : memref<2x7x22x16xf32, #tpu.memory_space<vmem>>, vector<1x1x16x16xf32>
    %459 = vector.shape_cast %458 : vector<1x1x16x16xf32> to vector<16x16xf32>
    %460 = vector.broadcast %457 : f32 to vector<16x16xf32>
    %461 = arith.mulf %460, %459 : vector<16x16xf32>
    %462 = arith.addf %456, %461 : vector<16x16xf32>
    %c67 = arith.constant 67 : index
    %463 = memref.load %arg2[%c67] : memref<98xf32, #tpu.memory_space<smem>>
    %c1_335 = arith.constant 1 : index
    %c4_336 = arith.constant 4 : index
    %c2_337 = arith.constant 2 : index
    %c0_338 = arith.constant 0 : index
    %464 = vector.load %arg4[%c1_335, %c4_336, %c2_337, %c0_338] : memref<2x7x22x16xf32, #tpu.memory_space<vmem>>, vector<1x1x16x16xf32>
    %465 = vector.shape_cast %464 : vector<1x1x16x16xf32> to vector<16x16xf32>
    %466 = vector.broadcast %463 : f32 to vector<16x16xf32>
    %467 = arith.mulf %466, %465 : vector<16x16xf32>
    %468 = arith.addf %462, %467 : vector<16x16xf32>
    %c68 = arith.constant 68 : index
    %469 = memref.load %arg2[%c68] : memref<98xf32, #tpu.memory_space<smem>>
    %c1_339 = arith.constant 1 : index
    %c5_340 = arith.constant 5 : index
    %c2_341 = arith.constant 2 : index
    %c0_342 = arith.constant 0 : index
    %470 = vector.load %arg4[%c1_339, %c5_340, %c2_341, %c0_342] : memref<2x7x22x16xf32, #tpu.memory_space<vmem>>, vector<1x1x16x16xf32>
    %471 = vector.shape_cast %470 : vector<1x1x16x16xf32> to vector<16x16xf32>
    %472 = vector.broadcast %469 : f32 to vector<16x16xf32>
    %473 = arith.mulf %472, %471 : vector<16x16xf32>
    %474 = arith.addf %468, %473 : vector<16x16xf32>
    %c69 = arith.constant 69 : index
    %475 = memref.load %arg2[%c69] : memref<98xf32, #tpu.memory_space<smem>>
    %c1_343 = arith.constant 1 : index
    %c6_344 = arith.constant 6 : index
    %c2_345 = arith.constant 2 : index
    %c0_346 = arith.constant 0 : index
    %476 = vector.load %arg4[%c1_343, %c6_344, %c2_345, %c0_346] : memref<2x7x22x16xf32, #tpu.memory_space<vmem>>, vector<1x1x16x16xf32>
    %477 = vector.shape_cast %476 : vector<1x1x16x16xf32> to vector<16x16xf32>
    %478 = vector.broadcast %475 : f32 to vector<16x16xf32>
    %479 = arith.mulf %478, %477 : vector<16x16xf32>
    %480 = arith.addf %474, %479 : vector<16x16xf32>
    %c70 = arith.constant 70 : index
    %481 = memref.load %arg2[%c70] : memref<98xf32, #tpu.memory_space<smem>>
    %c1_347 = arith.constant 1 : index
    %c0_348 = arith.constant 0 : index
    %c3_349 = arith.constant 3 : index
    %c0_350 = arith.constant 0 : index
    %482 = vector.load %arg4[%c1_347, %c0_348, %c3_349, %c0_350] : memref<2x7x22x16xf32, #tpu.memory_space<vmem>>, vector<1x1x16x16xf32>
    %483 = vector.shape_cast %482 : vector<1x1x16x16xf32> to vector<16x16xf32>
    %484 = vector.broadcast %481 : f32 to vector<16x16xf32>
    %485 = arith.mulf %484, %483 : vector<16x16xf32>
    %486 = arith.addf %480, %485 : vector<16x16xf32>
    %c71 = arith.constant 71 : index
    %487 = memref.load %arg2[%c71] : memref<98xf32, #tpu.memory_space<smem>>
    %c1_351 = arith.constant 1 : index
    %c1_352 = arith.constant 1 : index
    %c3_353 = arith.constant 3 : index
    %c0_354 = arith.constant 0 : index
    %488 = vector.load %arg4[%c1_351, %c1_352, %c3_353, %c0_354] : memref<2x7x22x16xf32, #tpu.memory_space<vmem>>, vector<1x1x16x16xf32>
    %489 = vector.shape_cast %488 : vector<1x1x16x16xf32> to vector<16x16xf32>
    %490 = vector.broadcast %487 : f32 to vector<16x16xf32>
    %491 = arith.mulf %490, %489 : vector<16x16xf32>
    %492 = arith.addf %486, %491 : vector<16x16xf32>
    %c72 = arith.constant 72 : index
    %493 = memref.load %arg2[%c72] : memref<98xf32, #tpu.memory_space<smem>>
    %c1_355 = arith.constant 1 : index
    %c2_356 = arith.constant 2 : index
    %c3_357 = arith.constant 3 : index
    %c0_358 = arith.constant 0 : index
    %494 = vector.load %arg4[%c1_355, %c2_356, %c3_357, %c0_358] : memref<2x7x22x16xf32, #tpu.memory_space<vmem>>, vector<1x1x16x16xf32>
    %495 = vector.shape_cast %494 : vector<1x1x16x16xf32> to vector<16x16xf32>
    %496 = vector.broadcast %493 : f32 to vector<16x16xf32>
    %497 = arith.mulf %496, %495 : vector<16x16xf32>
    %498 = arith.addf %492, %497 : vector<16x16xf32>
    %c73 = arith.constant 73 : index
    %499 = memref.load %arg2[%c73] : memref<98xf32, #tpu.memory_space<smem>>
    %c1_359 = arith.constant 1 : index
    %c3_360 = arith.constant 3 : index
    %c3_361 = arith.constant 3 : index
    %c0_362 = arith.constant 0 : index
    %500 = vector.load %arg4[%c1_359, %c3_360, %c3_361, %c0_362] : memref<2x7x22x16xf32, #tpu.memory_space<vmem>>, vector<1x1x16x16xf32>
    %501 = vector.shape_cast %500 : vector<1x1x16x16xf32> to vector<16x16xf32>
    %502 = vector.broadcast %499 : f32 to vector<16x16xf32>
    %503 = arith.mulf %502, %501 : vector<16x16xf32>
    %504 = arith.addf %498, %503 : vector<16x16xf32>
    %c74 = arith.constant 74 : index
    %505 = memref.load %arg2[%c74] : memref<98xf32, #tpu.memory_space<smem>>
    %c1_363 = arith.constant 1 : index
    %c4_364 = arith.constant 4 : index
    %c3_365 = arith.constant 3 : index
    %c0_366 = arith.constant 0 : index
    %506 = vector.load %arg4[%c1_363, %c4_364, %c3_365, %c0_366] : memref<2x7x22x16xf32, #tpu.memory_space<vmem>>, vector<1x1x16x16xf32>
    %507 = vector.shape_cast %506 : vector<1x1x16x16xf32> to vector<16x16xf32>
    %508 = vector.broadcast %505 : f32 to vector<16x16xf32>
    %509 = arith.mulf %508, %507 : vector<16x16xf32>
    %510 = arith.addf %504, %509 : vector<16x16xf32>
    %c75 = arith.constant 75 : index
    %511 = memref.load %arg2[%c75] : memref<98xf32, #tpu.memory_space<smem>>
    %c1_367 = arith.constant 1 : index
    %c5_368 = arith.constant 5 : index
    %c3_369 = arith.constant 3 : index
    %c0_370 = arith.constant 0 : index
    %512 = vector.load %arg4[%c1_367, %c5_368, %c3_369, %c0_370] : memref<2x7x22x16xf32, #tpu.memory_space<vmem>>, vector<1x1x16x16xf32>
    %513 = vector.shape_cast %512 : vector<1x1x16x16xf32> to vector<16x16xf32>
    %514 = vector.broadcast %511 : f32 to vector<16x16xf32>
    %515 = arith.mulf %514, %513 : vector<16x16xf32>
    %516 = arith.addf %510, %515 : vector<16x16xf32>
    %c76 = arith.constant 76 : index
    %517 = memref.load %arg2[%c76] : memref<98xf32, #tpu.memory_space<smem>>
    %c1_371 = arith.constant 1 : index
    %c6_372 = arith.constant 6 : index
    %c3_373 = arith.constant 3 : index
    %c0_374 = arith.constant 0 : index
    %518 = vector.load %arg4[%c1_371, %c6_372, %c3_373, %c0_374] : memref<2x7x22x16xf32, #tpu.memory_space<vmem>>, vector<1x1x16x16xf32>
    %519 = vector.shape_cast %518 : vector<1x1x16x16xf32> to vector<16x16xf32>
    %520 = vector.broadcast %517 : f32 to vector<16x16xf32>
    %521 = arith.mulf %520, %519 : vector<16x16xf32>
    %522 = arith.addf %516, %521 : vector<16x16xf32>
    %c77 = arith.constant 77 : index
    %523 = memref.load %arg2[%c77] : memref<98xf32, #tpu.memory_space<smem>>
    %c1_375 = arith.constant 1 : index
    %c0_376 = arith.constant 0 : index
    %c4_377 = arith.constant 4 : index
    %c0_378 = arith.constant 0 : index
    %524 = vector.load %arg4[%c1_375, %c0_376, %c4_377, %c0_378] : memref<2x7x22x16xf32, #tpu.memory_space<vmem>>, vector<1x1x16x16xf32>
    %525 = vector.shape_cast %524 : vector<1x1x16x16xf32> to vector<16x16xf32>
    %526 = vector.broadcast %523 : f32 to vector<16x16xf32>
    %527 = arith.mulf %526, %525 : vector<16x16xf32>
    %528 = arith.addf %522, %527 : vector<16x16xf32>
    %c78 = arith.constant 78 : index
    %529 = memref.load %arg2[%c78] : memref<98xf32, #tpu.memory_space<smem>>
    %c1_379 = arith.constant 1 : index
    %c1_380 = arith.constant 1 : index
    %c4_381 = arith.constant 4 : index
    %c0_382 = arith.constant 0 : index
    %530 = vector.load %arg4[%c1_379, %c1_380, %c4_381, %c0_382] : memref<2x7x22x16xf32, #tpu.memory_space<vmem>>, vector<1x1x16x16xf32>
    %531 = vector.shape_cast %530 : vector<1x1x16x16xf32> to vector<16x16xf32>
    %532 = vector.broadcast %529 : f32 to vector<16x16xf32>
    %533 = arith.mulf %532, %531 : vector<16x16xf32>
    %534 = arith.addf %528, %533 : vector<16x16xf32>
    %c79 = arith.constant 79 : index
    %535 = memref.load %arg2[%c79] : memref<98xf32, #tpu.memory_space<smem>>
    %c1_383 = arith.constant 1 : index
    %c2_384 = arith.constant 2 : index
    %c4_385 = arith.constant 4 : index
    %c0_386 = arith.constant 0 : index
    %536 = vector.load %arg4[%c1_383, %c2_384, %c4_385, %c0_386] : memref<2x7x22x16xf32, #tpu.memory_space<vmem>>, vector<1x1x16x16xf32>
    %537 = vector.shape_cast %536 : vector<1x1x16x16xf32> to vector<16x16xf32>
    %538 = vector.broadcast %535 : f32 to vector<16x16xf32>
    %539 = arith.mulf %538, %537 : vector<16x16xf32>
    %540 = arith.addf %534, %539 : vector<16x16xf32>
    %c80 = arith.constant 80 : index
    %541 = memref.load %arg2[%c80] : memref<98xf32, #tpu.memory_space<smem>>
    %c1_387 = arith.constant 1 : index
    %c3_388 = arith.constant 3 : index
    %c4_389 = arith.constant 4 : index
    %c0_390 = arith.constant 0 : index
    %542 = vector.load %arg4[%c1_387, %c3_388, %c4_389, %c0_390] : memref<2x7x22x16xf32, #tpu.memory_space<vmem>>, vector<1x1x16x16xf32>
    %543 = vector.shape_cast %542 : vector<1x1x16x16xf32> to vector<16x16xf32>
    %544 = vector.broadcast %541 : f32 to vector<16x16xf32>
    %545 = arith.mulf %544, %543 : vector<16x16xf32>
    %546 = arith.addf %540, %545 : vector<16x16xf32>
    %c81 = arith.constant 81 : index
    %547 = memref.load %arg2[%c81] : memref<98xf32, #tpu.memory_space<smem>>
    %c1_391 = arith.constant 1 : index
    %c4_392 = arith.constant 4 : index
    %c4_393 = arith.constant 4 : index
    %c0_394 = arith.constant 0 : index
    %548 = vector.load %arg4[%c1_391, %c4_392, %c4_393, %c0_394] : memref<2x7x22x16xf32, #tpu.memory_space<vmem>>, vector<1x1x16x16xf32>
    %549 = vector.shape_cast %548 : vector<1x1x16x16xf32> to vector<16x16xf32>
    %550 = vector.broadcast %547 : f32 to vector<16x16xf32>
    %551 = arith.mulf %550, %549 : vector<16x16xf32>
    %552 = arith.addf %546, %551 : vector<16x16xf32>
    %c82 = arith.constant 82 : index
    %553 = memref.load %arg2[%c82] : memref<98xf32, #tpu.memory_space<smem>>
    %c1_395 = arith.constant 1 : index
    %c5_396 = arith.constant 5 : index
    %c4_397 = arith.constant 4 : index
    %c0_398 = arith.constant 0 : index
    %554 = vector.load %arg4[%c1_395, %c5_396, %c4_397, %c0_398] : memref<2x7x22x16xf32, #tpu.memory_space<vmem>>, vector<1x1x16x16xf32>
    %555 = vector.shape_cast %554 : vector<1x1x16x16xf32> to vector<16x16xf32>
    %556 = vector.broadcast %553 : f32 to vector<16x16xf32>
    %557 = arith.mulf %556, %555 : vector<16x16xf32>
    %558 = arith.addf %552, %557 : vector<16x16xf32>
    %c83 = arith.constant 83 : index
    %559 = memref.load %arg2[%c83] : memref<98xf32, #tpu.memory_space<smem>>
    %c1_399 = arith.constant 1 : index
    %c6_400 = arith.constant 6 : index
    %c4_401 = arith.constant 4 : index
    %c0_402 = arith.constant 0 : index
    %560 = vector.load %arg4[%c1_399, %c6_400, %c4_401, %c0_402] : memref<2x7x22x16xf32, #tpu.memory_space<vmem>>, vector<1x1x16x16xf32>
    %561 = vector.shape_cast %560 : vector<1x1x16x16xf32> to vector<16x16xf32>
    %562 = vector.broadcast %559 : f32 to vector<16x16xf32>
    %563 = arith.mulf %562, %561 : vector<16x16xf32>
    %564 = arith.addf %558, %563 : vector<16x16xf32>
    %c84 = arith.constant 84 : index
    %565 = memref.load %arg2[%c84] : memref<98xf32, #tpu.memory_space<smem>>
    %c1_403 = arith.constant 1 : index
    %c0_404 = arith.constant 0 : index
    %c5_405 = arith.constant 5 : index
    %c0_406 = arith.constant 0 : index
    %566 = vector.load %arg4[%c1_403, %c0_404, %c5_405, %c0_406] : memref<2x7x22x16xf32, #tpu.memory_space<vmem>>, vector<1x1x16x16xf32>
    %567 = vector.shape_cast %566 : vector<1x1x16x16xf32> to vector<16x16xf32>
    %568 = vector.broadcast %565 : f32 to vector<16x16xf32>
    %569 = arith.mulf %568, %567 : vector<16x16xf32>
    %570 = arith.addf %564, %569 : vector<16x16xf32>
    %c85 = arith.constant 85 : index
    %571 = memref.load %arg2[%c85] : memref<98xf32, #tpu.memory_space<smem>>
    %c1_407 = arith.constant 1 : index
    %c1_408 = arith.constant 1 : index
    %c5_409 = arith.constant 5 : index
    %c0_410 = arith.constant 0 : index
    %572 = vector.load %arg4[%c1_407, %c1_408, %c5_409, %c0_410] : memref<2x7x22x16xf32, #tpu.memory_space<vmem>>, vector<1x1x16x16xf32>
    %573 = vector.shape_cast %572 : vector<1x1x16x16xf32> to vector<16x16xf32>
    %574 = vector.broadcast %571 : f32 to vector<16x16xf32>
    %575 = arith.mulf %574, %573 : vector<16x16xf32>
    %576 = arith.addf %570, %575 : vector<16x16xf32>
    %c86 = arith.constant 86 : index
    %577 = memref.load %arg2[%c86] : memref<98xf32, #tpu.memory_space<smem>>
    %c1_411 = arith.constant 1 : index
    %c2_412 = arith.constant 2 : index
    %c5_413 = arith.constant 5 : index
    %c0_414 = arith.constant 0 : index
    %578 = vector.load %arg4[%c1_411, %c2_412, %c5_413, %c0_414] : memref<2x7x22x16xf32, #tpu.memory_space<vmem>>, vector<1x1x16x16xf32>
    %579 = vector.shape_cast %578 : vector<1x1x16x16xf32> to vector<16x16xf32>
    %580 = vector.broadcast %577 : f32 to vector<16x16xf32>
    %581 = arith.mulf %580, %579 : vector<16x16xf32>
    %582 = arith.addf %576, %581 : vector<16x16xf32>
    %c87 = arith.constant 87 : index
    %583 = memref.load %arg2[%c87] : memref<98xf32, #tpu.memory_space<smem>>
    %c1_415 = arith.constant 1 : index
    %c3_416 = arith.constant 3 : index
    %c5_417 = arith.constant 5 : index
    %c0_418 = arith.constant 0 : index
    %584 = vector.load %arg4[%c1_415, %c3_416, %c5_417, %c0_418] : memref<2x7x22x16xf32, #tpu.memory_space<vmem>>, vector<1x1x16x16xf32>
    %585 = vector.shape_cast %584 : vector<1x1x16x16xf32> to vector<16x16xf32>
    %586 = vector.broadcast %583 : f32 to vector<16x16xf32>
    %587 = arith.mulf %586, %585 : vector<16x16xf32>
    %588 = arith.addf %582, %587 : vector<16x16xf32>
    %c88 = arith.constant 88 : index
    %589 = memref.load %arg2[%c88] : memref<98xf32, #tpu.memory_space<smem>>
    %c1_419 = arith.constant 1 : index
    %c4_420 = arith.constant 4 : index
    %c5_421 = arith.constant 5 : index
    %c0_422 = arith.constant 0 : index
    %590 = vector.load %arg4[%c1_419, %c4_420, %c5_421, %c0_422] : memref<2x7x22x16xf32, #tpu.memory_space<vmem>>, vector<1x1x16x16xf32>
    %591 = vector.shape_cast %590 : vector<1x1x16x16xf32> to vector<16x16xf32>
    %592 = vector.broadcast %589 : f32 to vector<16x16xf32>
    %593 = arith.mulf %592, %591 : vector<16x16xf32>
    %594 = arith.addf %588, %593 : vector<16x16xf32>
    %c89 = arith.constant 89 : index
    %595 = memref.load %arg2[%c89] : memref<98xf32, #tpu.memory_space<smem>>
    %c1_423 = arith.constant 1 : index
    %c5_424 = arith.constant 5 : index
    %c5_425 = arith.constant 5 : index
    %c0_426 = arith.constant 0 : index
    %596 = vector.load %arg4[%c1_423, %c5_424, %c5_425, %c0_426] : memref<2x7x22x16xf32, #tpu.memory_space<vmem>>, vector<1x1x16x16xf32>
    %597 = vector.shape_cast %596 : vector<1x1x16x16xf32> to vector<16x16xf32>
    %598 = vector.broadcast %595 : f32 to vector<16x16xf32>
    %599 = arith.mulf %598, %597 : vector<16x16xf32>
    %600 = arith.addf %594, %599 : vector<16x16xf32>
    %c90 = arith.constant 90 : index
    %601 = memref.load %arg2[%c90] : memref<98xf32, #tpu.memory_space<smem>>
    %c1_427 = arith.constant 1 : index
    %c6_428 = arith.constant 6 : index
    %c5_429 = arith.constant 5 : index
    %c0_430 = arith.constant 0 : index
    %602 = vector.load %arg4[%c1_427, %c6_428, %c5_429, %c0_430] : memref<2x7x22x16xf32, #tpu.memory_space<vmem>>, vector<1x1x16x16xf32>
    %603 = vector.shape_cast %602 : vector<1x1x16x16xf32> to vector<16x16xf32>
    %604 = vector.broadcast %601 : f32 to vector<16x16xf32>
    %605 = arith.mulf %604, %603 : vector<16x16xf32>
    %606 = arith.addf %600, %605 : vector<16x16xf32>
    %c91 = arith.constant 91 : index
    %607 = memref.load %arg2[%c91] : memref<98xf32, #tpu.memory_space<smem>>
    %c1_431 = arith.constant 1 : index
    %c0_432 = arith.constant 0 : index
    %c6_433 = arith.constant 6 : index
    %c0_434 = arith.constant 0 : index
    %608 = vector.load %arg4[%c1_431, %c0_432, %c6_433, %c0_434] : memref<2x7x22x16xf32, #tpu.memory_space<vmem>>, vector<1x1x16x16xf32>
    %609 = vector.shape_cast %608 : vector<1x1x16x16xf32> to vector<16x16xf32>
    %610 = vector.broadcast %607 : f32 to vector<16x16xf32>
    %611 = arith.mulf %610, %609 : vector<16x16xf32>
    %612 = arith.addf %606, %611 : vector<16x16xf32>
    %c92 = arith.constant 92 : index
    %613 = memref.load %arg2[%c92] : memref<98xf32, #tpu.memory_space<smem>>
    %c1_435 = arith.constant 1 : index
    %c1_436 = arith.constant 1 : index
    %c6_437 = arith.constant 6 : index
    %c0_438 = arith.constant 0 : index
    %614 = vector.load %arg4[%c1_435, %c1_436, %c6_437, %c0_438] : memref<2x7x22x16xf32, #tpu.memory_space<vmem>>, vector<1x1x16x16xf32>
    %615 = vector.shape_cast %614 : vector<1x1x16x16xf32> to vector<16x16xf32>
    %616 = vector.broadcast %613 : f32 to vector<16x16xf32>
    %617 = arith.mulf %616, %615 : vector<16x16xf32>
    %618 = arith.addf %612, %617 : vector<16x16xf32>
    %c93 = arith.constant 93 : index
    %619 = memref.load %arg2[%c93] : memref<98xf32, #tpu.memory_space<smem>>
    %c1_439 = arith.constant 1 : index
    %c2_440 = arith.constant 2 : index
    %c6_441 = arith.constant 6 : index
    %c0_442 = arith.constant 0 : index
    %620 = vector.load %arg4[%c1_439, %c2_440, %c6_441, %c0_442] : memref<2x7x22x16xf32, #tpu.memory_space<vmem>>, vector<1x1x16x16xf32>
    %621 = vector.shape_cast %620 : vector<1x1x16x16xf32> to vector<16x16xf32>
    %622 = vector.broadcast %619 : f32 to vector<16x16xf32>
    %623 = arith.mulf %622, %621 : vector<16x16xf32>
    %624 = arith.addf %618, %623 : vector<16x16xf32>
    %c94 = arith.constant 94 : index
    %625 = memref.load %arg2[%c94] : memref<98xf32, #tpu.memory_space<smem>>
    %c1_443 = arith.constant 1 : index
    %c3_444 = arith.constant 3 : index
    %c6_445 = arith.constant 6 : index
    %c0_446 = arith.constant 0 : index
    %626 = vector.load %arg4[%c1_443, %c3_444, %c6_445, %c0_446] : memref<2x7x22x16xf32, #tpu.memory_space<vmem>>, vector<1x1x16x16xf32>
    %627 = vector.shape_cast %626 : vector<1x1x16x16xf32> to vector<16x16xf32>
    %628 = vector.broadcast %625 : f32 to vector<16x16xf32>
    %629 = arith.mulf %628, %627 : vector<16x16xf32>
    %630 = arith.addf %624, %629 : vector<16x16xf32>
    %c95 = arith.constant 95 : index
    %631 = memref.load %arg2[%c95] : memref<98xf32, #tpu.memory_space<smem>>
    %c1_447 = arith.constant 1 : index
    %c4_448 = arith.constant 4 : index
    %c6_449 = arith.constant 6 : index
    %c0_450 = arith.constant 0 : index
    %632 = vector.load %arg4[%c1_447, %c4_448, %c6_449, %c0_450] : memref<2x7x22x16xf32, #tpu.memory_space<vmem>>, vector<1x1x16x16xf32>
    %633 = vector.shape_cast %632 : vector<1x1x16x16xf32> to vector<16x16xf32>
    %634 = vector.broadcast %631 : f32 to vector<16x16xf32>
    %635 = arith.mulf %634, %633 : vector<16x16xf32>
    %636 = arith.addf %630, %635 : vector<16x16xf32>
    %c96 = arith.constant 96 : index
    %637 = memref.load %arg2[%c96] : memref<98xf32, #tpu.memory_space<smem>>
    %c1_451 = arith.constant 1 : index
    %c5_452 = arith.constant 5 : index
    %c6_453 = arith.constant 6 : index
    %c0_454 = arith.constant 0 : index
    %638 = vector.load %arg4[%c1_451, %c5_452, %c6_453, %c0_454] : memref<2x7x22x16xf32, #tpu.memory_space<vmem>>, vector<1x1x16x16xf32>
    %639 = vector.shape_cast %638 : vector<1x1x16x16xf32> to vector<16x16xf32>
    %640 = vector.broadcast %637 : f32 to vector<16x16xf32>
    %641 = arith.mulf %640, %639 : vector<16x16xf32>
    %642 = arith.addf %636, %641 : vector<16x16xf32>
    %c97 = arith.constant 97 : index
    %643 = memref.load %arg2[%c97] : memref<98xf32, #tpu.memory_space<smem>>
    %c1_455 = arith.constant 1 : index
    %c6_456 = arith.constant 6 : index
    %c6_457 = arith.constant 6 : index
    %c0_458 = arith.constant 0 : index
    %644 = vector.load %arg4[%c1_455, %c6_456, %c6_457, %c0_458] : memref<2x7x22x16xf32, #tpu.memory_space<vmem>>, vector<1x1x16x16xf32>
    %645 = vector.shape_cast %644 : vector<1x1x16x16xf32> to vector<16x16xf32>
    %646 = vector.broadcast %643 : f32 to vector<16x16xf32>
    %647 = arith.mulf %646, %645 : vector<16x16xf32>
    %648 = arith.addf %642, %647 : vector<16x16xf32>
    %649 = arith.negf %648 : vector<16x16xf32>
    %650 = math.exp %649 : vector<16x16xf32>
    %cst_459 = arith.constant 1.000000e+00 : f32
    %651 = vector.broadcast %cst_459 : f32 to vector<16x16xf32>
    %652 = arith.addf %651, %650 : vector<16x16xf32>
    %653 = arith.divf %651, %652 : vector<16x16xf32>
    %654 = vector.shape_cast %653 : vector<16x16xf32> to vector<1x16x16xf32>
    %655 = vector.broadcast %654 : vector<1x16x16xf32> to vector<4x16x16xf32>
    %656 = arith.mulf %3, %655 : vector<4x16x16xf32>
    %c0_460 = arith.constant 0 : index
    %c0_461 = arith.constant 0 : index
    %c0_462 = arith.constant 0 : index
    %c0_463 = arith.constant 0 : index
    %657 = vector.load %arg3[%c0_460, %c0_461, %c0_462, %c0_463] : memref<1x4x16x16xf32, #tpu.memory_space<vmem>>, vector<1x4x16x16xf32>
    %658 = vector.shape_cast %657 : vector<1x4x16x16xf32> to vector<4x16x16xf32>
    %659 = vector.shape_cast %656 : vector<4x16x16xf32> to vector<1x4x16x16xf32>
    tpu.vector_store %arg3[%c0_460, %c0_461, %c0_462, %c0_463], %659 {strides = array<i32>} : memref<1x4x16x16xf32, #tpu.memory_space<vmem>>, vector<1x4x16x16xf32>,
    return
  }
  func.func @transform_0(%arg0: i32) -> (i32, i32, i32, i32) {
    %c0_i32 = arith.constant 0 : i32
    %c0_i32_0 = arith.constant 0 : i32
    %c0_i32_1 = arith.constant 0 : i32
    %c0_i32_2 = arith.constant 0 : i32
    return %arg0, %c0_i32, %c0_i32_0, %c0_i32_1 : i32, i32, i32, i32
  }
  func.func @transform_1(%arg0: i32) -> i32 {
    %c0_i32 = arith.constant 0 : i32
    %c0_i32_0 = arith.constant 0 : i32
    return %c0_i32 : i32
  }
  func.func @transform_2(%arg0: i32) -> (i32, i32, i32, i32) {
    %c0_i32 = arith.constant 0 : i32
    %c0_i32_0 = arith.constant 0 : i32
    %c0_i32_1 = arith.constant 0 : i32
    %c0_i32_2 = arith.constant 0 : i32
    return %arg0, %c0_i32, %c0_i32_0, %c0_i32_1 : i32, i32, i32, i32
  }
}

</mosaic_0001>

<bundles_post_ra>
// kernel: tpu_custom_call.1
= control target key start
LH: loop header
LB: loop body
LE: loop exit
PB: predicated region body
PF: predicated region fallthrough
CT: control target
= control target key end

     0   :  { %7 = vsyncpa [#allocation4], 0  ;;  %s2243_s0 = inlined_call_operand.hbm [shape: f32[2,4,16,16], index: 0, kind: input, shape index: {}]   ;;  %s2244_s1 = inlined_call_operand.hbm [shape: f32[98], index: 1, kind: input, shape index: {}]   ;;  %s2245_s2 = inlined_call_operand.hbm [shape: f32[2,4,16,16], index: 2, kind: output, shape index: {}]  }
   0x1   :  { %9 = vsyncpa [#allocation4 + $0x1], 0 }
   0x2   :  { %10 = vsyncpa [#allocation6], 0 }
   0x3   :  { %11 = vsyncpa [#allocation5], 0 }
   0x4   :  { %13 = vsyncpa [#allocation5 + $0x1], 0  ;;  %s1633_s9 = smov 0   ;;  %s1635_s10 = smov 0  }
   0x5   :  { %s1637_s11 = smov 0   ;;  %s1639_s12 = smov 0  }
   0x6 LB: > { %s1654_s13 = sadd.s32 4294967295, %s1602_s12   ;;  %s1288_s14 = sadd.s32 4294967294, %s1602_s12   ;;  %s1602_s12 = sphi %s1639_s12, %s2265_s12   ;;  %s1598_s11 = sphi %s1637_s11, %s2264_s11   ;;  %s1594_s10 = sphi %s1635_s10, %s2263_s10   ;;  %s1590_s9 = sphi %s1633_s9, %s2262_s9  }
   0x7   : > { %s1658_s15 = sadd.s32 1, %s1602_s12   ;;  %s26_s16 = sadd.s32 1, %s1598_s11 }
   0x8   : > { %s23_s17 = ssub.s32 %s1602_s12, %s1658_s15  ;;  %p33_p0 = scmp.ne.s32.totalorder %s1598_s11, %s1594_s10 }
   0x9   : > { %p24_p1 = scmp.eq.s32.totalorder %s23_s17, 0  ;;  %p34_p2 = scmp.eq.s32.totalorder %s1602_s12, 0 }
   0xa   : > { %p39_p3 = scmp.ne.s32.totalorder %s1594_s10, %s1590_s9  ;;  %p2246_p4 = scmp.eq.s32.totalorder %s1654_s13, 0 }
   0xb   : > { %s1670_s18 = scalar_select %p24_p1, %s1598_s11, %s26_s16  }
   0xc   : > { %p1672_p5 = por %p34_p2, %p33_p0  ;;  %p1678_p6 = por %p2246_p4, %p39_p3 }
   0xd   : > { %p84_p7 = scmp.eq.s32.totalorder %s1654_s13, 1  ;;  %p90_p8 = scmp.eq.s32.totalorder %s1288_s14, 1 }
   0xe   : > { %s2250_s20 = scalar_select %p1678_p6, 1, 0 }
   0xf   : > { %p1289_p9 = scmp.ge.s32.totalorder %s1602_s12, 1  ;;  %p97_p10 = scmp.lt.s32.totalorder %s1602_s12, 3 }
  0x10   : > { %p1685_p11 = por %p84_p7, %p33_p0  ;;  %p1689_p12 = por %p90_p8, %p39_p3 }
  0x11   : > { %p1693_p13 = pnand %p1289_p9, %p97_p10  ;;  %p1426_p4 = scmp.lt.s32.totalorder %s1602_s12, 2 }
  0x12   : > { %s2251_s21 = scalar_select %p1685_p11, 1, 0 }
  0x13   : > { %s2252_s22 = scalar_select %p1689_p12, 1, 0 }
  0x14   : > { %p1413_p2 = pneg %p1693_p13  ;;  %s119_s24 = sand.u32 1, %s1598_s11  }
  0x15   : > { %s1403_s25 = sshll.u32 %s1602_s12, 10  ;;  %p2254_p6 = scmp.eq.s32.totalorder %s1654_s13, 0 }
  0x16   : > { %p1707_p7 = pnand %p1426_p4, %p1672_p5  ;;  %s1292_s27 = sshll.u32 %s119_s24, 6 }
  0x17   : > { %p1414_p0 = pnand %p1413_p2, %p2254_p6  ;;  %s1489_s30 = scalar_lea.hbm %s2244_s1, 16 }
  0x18   : > { %p1490_p3 = scmp.ne.s32.totalorder %s2244_s1, %s1489_s30  ;;  %p1496_p6 = scmp.lt.u32.totalorder %s1489_s30, %s2244_s1 }
  0x19   : > { %p1491_p8 = pneg %p1414_p0 }
  0x1b   : > { %p1492_p9 = pnand %p1491_p8, %p1490_p3 }
  0x1d   : > { %p1493_p10 = pneg %p1492_p9 }
  0x1f   : > { %p1498_p4 = pnand %p1496_p6, %p1493_p10 }
  0x21   : > { %1501 = shalt.err (!%p1498_p4)
}
  0x22   : > { %s1604_s7 = smov [#allocation7]   ;;  %s1726_s19 = scalar_lea.hbm %s2243_s0, %s1403_s25 }
  0x23   : > { %1416 = dma.hbm_to_smem (!%p1414_p0), %s2244_s1, 16, %s1604_s7, [#allocation6]  }
  0x24   : > { %s123_s28 = scalar_lea.vmem [#allocation3], %s1292_s27  ;;  %s1730_s30 = scalar_lea.sflag [#allocation4], %s119_s24 }
  0x25   : > { %s130_s29 = sshll.u32 %s123_s28, 4  ;;  %s1502_s3 = scalar_lea.hbm %s1726_s19, 1024  ;;  %s1728_s29 = int_to_ptr.vmem [resolvable:$true] %s130_s29 }
  0x26   : > { %p1503_p5 = scmp.ne.s32.totalorder %s1726_s19, %s1502_s3  ;;  %p1504_p2 = pneg %p1707_p7 }
  0x27   : > { %s1507_s5 = scalar_lea.hbm %s2243_s0, 2048  ;;  %p1508_p8 = scmp.lt.u32.totalorder %s1726_s19, %s2243_s0 }
  0x28   : > { %p1505_p0 = pnand %p1504_p2, %p1503_p5  ;;  %p1509_p9 = scmp.lt.u32.totalorder %s1507_s5, %s1502_s3 }
  0x29   : > { %p1511_p6 = scmp.lt.u32.totalorder %s1502_s3, %s1726_s19 }
  0x2a   : > { %p1506_p3 = pneg %p1505_p0  ;;  %p1510_p10 = por %p1509_p9, %p1508_p8 }
  0x2c   : > { %p1512_p4 = por %p1511_p6, %p1510_p10 }
  0x2e   : > { %p1513_p1 = pnand %p1512_p4, %p1506_p3 }
  0x30   : > { %1516 = shalt.err (!%p1513_p1)
}
  0x31   : > { %s1517_s24 = scalar_lea.vmem %s1728_s29, 1024  ;;  %s1605_s27 = smov [#allocation3]  }
  0x32   : > { %p1518_p5 = scmp.ne.s32.totalorder %s1728_s29, %s1517_s24  ;;  %s1522_s8 = sshll.u32 %s1605_s27, 4  ;;  %s1523_s8 = int_to_ptr.vmem [resolvable:$false] %s1522_s8 }
  0x33   : > { %s1524_s14 = scalar_lea.vmem %s1523_s8, 2048  ;;  %p1525_p11 = scmp.lt.s32.totalorder %s1728_s29, %s1523_s8 }
  0x34   : > { %p1520_p0 = pnand %p1518_p5, %p1504_p2  ;;  %p1526_p8 = scmp.lt.s32.totalorder %s1524_s14, %s1517_s24 }
  0x36   : > { %p1521_p12 = pneg %p1520_p0  ;;  %p1527_p9 = por %p1526_p8, %p1525_p11 }
  0x38   : > { %p1528_p10 = pnand %p1527_p9, %p1521_p12 }
  0x3a   : > { %1531 = shalt.err (!%p1528_p10)
}
  0x3b   : > { %s1606_s16 = smov 128   ;;  %s1607_s17 = smov 8  }
  0x3c   : > { %1420 = dma.hbm_to_vmem [thread:$0]  (!%p1707_p7), %s1726_s19, 1024, %s1728_s29, %s1730_s30, %s1606_s16, %s1606_s16, %s1607_s17  }
  0x3d   : > { %142 = sbr.rel (%p1693_p13) target bundleno = 460 (0x1cc), region = 28  ;;  %s1761_s28 = sand.u32 (!%p1693_p13), 1, %s1594_s10  }
  0x3e   : > { %s1296_s3 = sshll.u32 (!%p1693_p13), %s1761_s28, 6  ;;  %s145_s25 = scalar_lea.sflag (!%p1693_p13), [#allocation4], %s1761_s28 }
  0x3f   : > { %s1767_s4 = scalar_lea.vmem (!%p1693_p13), [#allocation3], %s1296_s3  ;;  %p2256_p11 = scmp.ne.s32.totalorder (!%p1693_p13), %s2250_s20, 0 }
  0x44   : > { %1577 = dma.done.wait (%p2256_p11), %s145_s25, 1024  }
  0x45   : > { %1579 = vsyncadd (%p2256_p11), %s145_s25, 4294966272  ;;  %p2257_p12 = scmp.eq.s32.totalorder %s1654_s13, 0 }
  0x47   : > { %1581 = dma.done.wait (%p2257_p12), [#allocation6], 16   ;;  %p2258_p13 = pmov %p2257_p12 }
  0x49   : > { %1583 = vsyncadd (%p2258_p13), [#allocation6], 4294967280 }
  0x4a   : > { %157 = sfence }
  0x4b   : > { %vm174_vm0 = vcmask 130048   ;;  %v1778_v0 = vld [vmem:[%s1767_s4] sm:$0xff]  ;;  %v1781_v1 = vld [vmem:[%s1767_s4 + $0x10] sm:$0xff]  ;;  %v1608_v7 = vmov 0.0   ;;  %vm177_vm1 = vcmask 128000   ;;  %v219_v9 = vld [vmem:[%s1767_s4 + $0x8] sm:$0xff] }
  0x4c   : > { %v1784_v2 = vld [vmem:[%s1767_s4 + $0x20] sm:$0xff]  ;;  %v1787_v3 = vld [vmem:[%s1767_s4 + $0x30] sm:$0xff]  ;;  %v226_v4 = vsel %vm174_vm0, %v1778_v0, 0.0  ;;  %v227_v5 = vsel %vm174_vm0, %v1781_v1, 0.0  ;;  %185 = vst.msk [vmem:[#allocation2 + $0x48] sm:$0xff] %vm174_vm0, %v1608_v7  ;;  %186 = vst.msk [vmem:[#allocation2 + $0x50] sm:$0xff] %vm174_vm0, %v1608_v7 }
  0x4d   : > { %v229_v6 = vsel %vm174_vm0, %v1784_v2, 0.0  ;;  %175 = vst.msk [vmem:[#allocation2] sm:$0xff] %vm174_vm0, %v1608_v7  ;;  %176 = vst.msk [vmem:[#allocation2 + $0x8] sm:$0xff] %vm174_vm0, %v1608_v7  ;;  %v228_v8 = vadd.f32 %v227_v5, %v226_v4  ;;  %v221_v10 = vld [vmem:[%s1767_s4 + $0x18] sm:$0xff]  ;;  %v223_v11 = vld [vmem:[%s1767_s4 + $0x28] sm:$0xff]  ;;  %v231_v12 = vsel %vm174_vm0, %v1787_v3, 0.0 }
  0x4e   : > { %179 = vst.msk [vmem:[#allocation2 + $0x18] sm:$0xff] %vm174_vm0, %v1608_v7  ;;  %180 = vst.msk [vmem:[#allocation2 + $0x20] sm:$0xff] %vm174_vm0, %v1608_v7  ;;  %v225_v13 = vld [vmem:[%s1767_s4 + $0x38] sm:$0xff]  ;;  %v233_v14 = vsel %vm174_vm0, %v219_v9, 0.0  ;;  %v234_v15 = vsel %vm174_vm0, %v221_v10, 0.0  ;;  %v236_v16 = vsel %vm174_vm0, %v223_v11, 0.0 }
  0x4f   : > { %182 = vst.msk [vmem:[#allocation2 + $0x30] sm:$0xff] %vm174_vm0, %v1608_v7  ;;  %183 = vst.msk [vmem:[#allocation2 + $0x38] sm:$0xff] %vm174_vm0, %v1608_v7  ;;  %v230_v17 = vadd.f32 %v229_v6, %v228_v8  ;;  %v235_v18 = vadd.f32 %v234_v15, %v233_v14  ;;  %v238_v19 = vsel %vm174_vm0, %v225_v13, 0.0  ;;  %v249_v20 = vsel %vm174_vm0, %v219_v9, -inf  ;;  %s1609_s20 = smov 2   ;;  %s1610_s23 = smov 3  }
  0x50   : > { %188 = vst.msk [vmem:[#allocation2 + $0x60] sm:$0xff] %vm174_vm0, %v1608_v7  ;;  %189 = vst.msk [vmem:[#allocation2 + $0x68] sm:$0xff] %vm174_vm0, %v1608_v7  ;;  %v250_v21 = vsel %vm174_vm0, %v221_v10, -inf  ;;  %v251_v22 = vsel %vm174_vm0, %v223_v11, -inf  ;;  %v253_v23 = vsel %vm174_vm0, %v225_v13, -inf  ;;  %v242_v24 = vsel %vm174_vm0, %v1778_v0, -inf }
  0x51   : > { %191 = vst.msk [vmem:[#allocation2 + $0x78] sm:$0xff] %vm174_vm0, %v1608_v7  ;;  %192 = vst.msk [vmem:[#allocation2 + $0x80] sm:$0xff] %vm174_vm0, %v1608_v7  ;;  %v232_v25 = vadd.f32 %v231_v12, %v230_v17  ;;  %v237_v26 = vadd.f32 %v236_v16, %v235_v18  ;;  %v252_v27 = vmax.f32 %v249_v20, %v251_v22  ;;  %v243_v29 = vsel %vm174_vm0, %v1781_v1, -inf  ;;  %s1611_s26 = smov 1   ;;  %s1612_s19 = smov 127  }
  0x52   : > { %194 = vst.msk [vmem:[#allocation2 + $0x90] sm:$0xff] %vm174_vm0, %v1608_v7  ;;  %195 = vst.msk [vmem:[#allocation2 + $0x98] sm:$0xff] %vm174_vm0, %v1608_v7  ;;  %v254_v28 = vmax.f32 %v250_v21, %v253_v23  ;;  %v244_v30 = vsel %vm174_vm0, %v1784_v2, -inf  ;;  %v246_v31 = vsel %vm174_vm0, %v1787_v3, -inf  ;;  %s1613_s29 = smov 126   ;;  %s1614_s30 = smov 125  }
  0x53   : > { %197 = vst.msk [vmem:[#allocation2 + $0xa8] sm:$0xff] %vm174_vm0, %v1608_v7  ;;  %198 = vst.msk [vmem:[#allocation2 + $0xb0] sm:$0xff] %vm174_vm0, %v1608_v7  ;;  %v240_v32 = vmul.f32 0.25, %v232_v25  ;;  %v239_v33 = vadd.f32 %v238_v19, %v237_v26  ;;  %v245_v35 = vmax.f32 %v242_v24, %v244_v30  ;;  %v247_v36 = vmax.f32 %v243_v29, %v246_v31  ;;  %s1299_s5 = sld [smem:[#allocation7 + $0x1]]  ;;  %s379_s6 = sld [smem:[#allocation7]] }
  0x54   : > { %200 = vst.msk [vmem:[#allocation2 + $0xc0] sm:$0xff] %vm174_vm0, %v1608_v7  ;;  %201 = vst.msk [vmem:[#allocation2 + $0xc8] sm:$0xff] %vm174_vm0, %v1608_v7  ;;  %v255_v34 = vmax.f32 %v252_v27, %v254_v28  ;;  %vm274_vm2 = vcmask 130064   ;;  %vm264_vm3 = vcmask 130072   ;;  %vm284_vm4 = vcmask 130056   ;;  %s1869_s7 = sld [smem:[#allocation7 + $0x2]] }
  0x55   : > { %203 = vst.msk [vmem:[#allocation2 + $0xd8] sm:$0xff] %vm174_vm0, %v1608_v7  ;;  %204 = vst.msk [vmem:[#allocation2 + $0xe0] sm:$0xff] %vm174_vm0, %v1608_v7  ;;  %267 = vrot.lane.b32.xlu1 %v240_v32, %s1609_s20  ;;  %258 = vrot.lane.b32.xlu0 %v240_v32, %s1610_s23  ;;  %v241_v37 = vmul.f32 0.25, %v239_v33  ;;  %v248_v38 = vmax.f32 %v245_v35, %v247_v36  ;;  %vm297_vm5 = vcmask 121856   ;;  %s1873_s24 = sld [smem:[#allocation7 + $0x3]]  ;;  %vm307_vm6 = vcmask 113664  }
  0x56   : > { %206 = vst.msk [vmem:[#allocation2 + $0xf0] sm:$0xff] %vm174_vm0, %v1608_v7  ;;  %207 = vst.msk [vmem:[#allocation2 + $0xf8] sm:$0xff] %vm174_vm0, %v1608_v7  ;;  %s1878_s27 = sld [smem:[#allocation7 + $0x4]]  ;;  %vm317_vm7 = vcmask 105472   ;;  %s1880_s8 = sld [smem:[#allocation7 + $0x5]] }
  0x57   : > { %209 = vst.msk [vmem:[#allocation2 + $0x108] sm:$0xff] %vm174_vm0, %v1608_v7  ;;  %210 = vst.msk [vmem:[#allocation2 + $0x110] sm:$0xff] %vm174_vm0, %v1608_v7  ;;  %s1885_s14 = sld [smem:[#allocation7 + $0x6]]  ;;  %s1889_s16 = sld [smem:[#allocation7 + $0x7]] }
  0x58   : > { %212 = vst.msk [vmem:[#allocation2 + $0x120] sm:$0xff] %vm174_vm0, %v1608_v7  ;;  %213 = vst.msk [vmem:[#allocation2 + $0x128] sm:$0xff] %vm174_vm0, %v1608_v7  ;;  %s1892_s17 = sld [smem:[#allocation7 + $0x8]]  ;;  %s1895_s25 = sld [smem:[#allocation7 + $0xa]] }
  0x59   : > { %215 = vst.msk [vmem:[#allocation2 + $0x138] sm:$0xff] %vm174_vm0, %v1608_v7  ;;  %216 = vst.msk [vmem:[#allocation2 + $0x140] sm:$0xff] %vm174_vm0, %v1608_v7  ;;  %269 = vrot.lane.b32.xlu1 %v241_v37, %s1609_s20  ;;  %260 = vrot.lane.b32.xlu0 %v241_v37, %s1610_s23  ;;  %v388_v48 = vstv %s1299_s5  ;;  %v382_v49 = vstv %s379_s6  ;;  %s1923_s5 = sld [smem:[#allocation7 + $0x11]]  ;;  %s1925_s6 = sld [smem:[#allocation7 + $0x10]] }
  0x5a   : > { %187 = vst.msk [vmem:[#allocation2 + $0x58] sm:$0x3f] %vm177_vm1, %v1608_v7  ;;  %178 = vst.msk [vmem:[#allocation2 + $0x10] sm:$0x3f] %vm177_vm1, %v1608_v7  ;;  %v396_v55 = vstv %s1869_s7  ;;  %s1932_s7 = sld [smem:[#allocation7 + $0x12]]  ;;  %p2259_p7 = scmp.ne.s32.totalorder %s2251_s21, 0 }
  0x5b   : > { %181 = vst.msk [vmem:[#allocation2 + $0x28] sm:$0x3f] %vm177_vm1, %v1608_v7  ;;  %184 = vst.msk [vmem:[#allocation2 + $0x40] sm:$0x3f] %vm177_vm1, %v1608_v7  ;;  %v404_v2 = vstv %s1873_s24  ;;  %s1935_s24 = sld [smem:[#allocation7 + $0x13]] }
  0x5c   : > { %190 = vst.msk [vmem:[#allocation2 + $0x70] sm:$0x3f] %vm177_vm1, %v1608_v7  ;;  %193 = vst.msk [vmem:[#allocation2 + $0x88] sm:$0x3f] %vm177_vm1, %v1608_v7  ;;  %v412_v13 = vstv %s1878_s27  ;;  %v420_v16 = vstv %s1880_s8  ;;  %s1939_s27 = sld [smem:[#allocation7 + $0x14]]  ;;  %s1941_s8 = sld [smem:[#allocation7 + $0x15]] }
  0x5d   : > { %196 = vst.msk [vmem:[#allocation2 + $0xa0] sm:$0x3f] %vm177_vm1, %v1608_v7  ;;  %199 = vst.msk [vmem:[#allocation2 + $0xb8] sm:$0x3f] %vm177_vm1, %v1608_v7  ;;  %279 = vrot.lane.b32.xlu1 %v241_v37, %s1611_s26  ;;  %277 = vrot.lane.b32.xlu0 %v240_v32, %s1611_s26  ;;  %v428_v27 = vstv %s1885_s14  ;;  %v436_v33 = vstv %s1889_s16  ;;  %s1943_s14 = sld [smem:[#allocation7 + $0x16]]  ;;  %s1946_s16 = sld [smem:[#allocation7 + $0x18]] }
  0x5e   : > { %202 = vst.msk [vmem:[#allocation2 + $0xd0] sm:$0x3f] %vm177_vm1, %v1608_v7  ;;  %205 = vst.msk [vmem:[#allocation2 + $0xe8] sm:$0x3f] %vm177_vm1, %v1608_v7 }
  0x5f   : > { %208 = vst.msk [vmem:[#allocation2 + $0x100] sm:$0x3f] %vm177_vm1, %v1608_v7  ;;  %211 = vst.msk [vmem:[#allocation2 + $0x118] sm:$0x3f] %vm177_vm1, %v1608_v7 }
  0x60   : > { %214 = vst.msk [vmem:[#allocation2 + $0x130] sm:$0x3f] %vm177_vm1, %v1608_v7  ;;  %217 = vst.msk [vmem:[#allocation2 + $0x148] sm:$0x3f] %vm177_vm1, %v1608_v7 }
  0x61   : > { %288 = vst.msk [vmem:[#allocation2 + $0x4b] sm:$0xff] %vm174_vm0, %v240_v32  ;;  %351 = vst.msk [vmem:[#allocation2 + $0xfb] sm:$0xff] %vm174_vm0, %v255_v34  ;;  %292 = vrot.lane.b32.xlu1 %v241_v37, %s1612_s19  ;;  %290 = vrot.lane.b32.xlu0 %v240_v32, %s1612_s19 }
  0x62   : > { %289 = vst.msk [vmem:[#allocation2 + $0x53] sm:$0xff] %vm174_vm0, %v241_v37  ;;  %350 = vst.msk [vmem:[#allocation2 + $0xf3] sm:$0xff] %vm174_vm0, %v248_v38 }
  0x65   : > { %302 = vrot.lane.b32.xlu1 %v241_v37, %s1613_s29  ;;  %300 = vrot.lane.b32.xlu0 %v240_v32, %s1613_s29 }
  0x68   : > { %v402_v3 = vld [vmem:[#allocation2 + $0x48] sm:$0xff] }
  0x69   : > { %312 = vrot.lane.b32.xlu1 %v241_v37, %s1614_s30  ;;  %310 = vrot.lane.b32.xlu0 %v240_v32, %s1614_s30  ;;  %v403_v4 = vld [vmem:[#allocation2 + $0x50] sm:$0xff]  ;;  %v405_v11 = vmul.f32 %v404_v2, %v402_v3 }
  0x6a   : > { %v406_v12 = vmul.f32 %v404_v2, %v403_v4 }
  0x6d   : > { %324 = vrot.lane.b32.xlu1 %v255_v34, %s1610_s23  ;;  %322 = vrot.lane.b32.xlu0 %v248_v38, %s1610_s23  ;;  %s1905_s23 = sld [smem:[#allocation7 + $0xb]] }
  0x71   : > { %333 = vrot.lane.b32.xlu1 %v255_v34, %s1609_s20  ;;  %331 = vrot.lane.b32.xlu0 %v248_v38, %s1609_s20  ;;  %s1899_s20 = sld [smem:[#allocation7 + $0x9]] }
  0x73   : > { %v468_v4 = vstv %s1905_s23  ;;  %s1960_s23 = sld [smem:[#allocation7 + $0x1b]] }
  0x75   : > { %342 = vrot.lane.b32.xlu1 %v255_v34, %s1611_s26  ;;  %340 = vrot.lane.b32.xlu0 %v248_v38, %s1611_s26  ;;  %s1908_s26 = sld [smem:[#allocation7 + $0xc]] }
  0x79   : > { %354 = vrot.lane.b32.xlu1 %v255_v34, %s1612_s19  ;;  %352 = vrot.lane.b32.xlu0 %v248_v38, %s1612_s19  ;;  %s1914_s19 = sld [smem:[#allocation7 + $0xd]] }
  0x7d   : > { %363 = vrot.lane.b32.xlu1 %v255_v34, %s1613_s29  ;;  %361 = vrot.lane.b32.xlu0 %v248_v38, %s1613_s29  ;;  %s1916_s29 = sld [smem:[#allocation7 + $0xe]] }
  0x81   : > { %372 = vrot.lane.b32.xlu1 %v255_v34, %s1614_s30  ;;  %370 = vrot.lane.b32.xlu0 %v248_v38, %s1614_s30  ;;  %s1920_s30 = sld [smem:[#allocation7 + $0xf]] }
  0xc7   : > { %v268_v39 = vpop.permute.xlu1 %267  ;;  %v259_v40 = vpop.permute.xlu0 %258 }
  0xc8   : > { %275 = vst.msk [vmem:[#allocation2 + $0x1b] sm:$0xff] %vm274_vm2, %v268_v39 }
  0xc9   : > { %265 = vst.msk [vmem:[#allocation2 + $0x3] sm:$0xff] %vm264_vm3, %v259_v40 }
  0xcb   : > { %v270_v41 = vpop.permute.xlu1 %269  ;;  %v261_v42 = vpop.permute.xlu0 %260 }
  0xcc   : > { %276 = vst.msk [vmem:[#allocation2 + $0x23] sm:$0xff] %vm274_vm2, %v270_v41  ;;  %v444_v41 = vstv %s1892_s17  ;;  %s1948_s17 = sld [smem:[#allocation7 + $0x17]] }
  0xcd   : > { %266 = vst.msk [vmem:[#allocation2 + $0xb] sm:$0xff] %vm264_vm3, %v261_v42 }
  0xcf   : > { %v280_v43 = vpop.permute.xlu1 %279  ;;  %v278_v44 = vpop.permute.xlu0 %277  ;;  %v386_v47 = vld [vmem:[#allocation2 + $0x18] sm:$0xff] }
  0xd0   : > { %286 = vst.msk [vmem:[#allocation2 + $0x3b] sm:$0xff] %vm284_vm4, %v280_v43  ;;  %285 = vst.msk [vmem:[#allocation2 + $0x33] sm:$0xff] %vm284_vm4, %v278_v44  ;;  %v380_v50 = vld [vmem:[#allocation2] sm:$0xff]  ;;  %v389_v56 = vmul.f32 %v388_v48, %v386_v47  ;;  %v460_v44 = vstv %s1895_s25  ;;  %s1953_s25 = sld [smem:[#allocation7 + $0x19]] }
  0xd1   : > { %v383_v57 = vmul.f32 %v382_v49, %v380_v50  ;;  %v434_v30 = vld [vmem:[#allocation2 + $0x1] sm:$0xff]  ;;  %v442_v42 = vld [vmem:[#allocation2 + $0x19] sm:$0xff] }
  0xd2   : > { %v437_v47 = vmul.f32 %v436_v33, %v434_v30 }
  0xd3   : > { %v293_v45 = vpop.permute.xlu1 %292  ;;  %v291_v46 = vpop.permute.xlu0 %290  ;;  %v387_v51 = vld [vmem:[#allocation2 + $0x20] sm:$0xff]  ;;  %v391_v5 = vadd.f32 %v389_v56, %v383_v57  ;;  %v445_v56 = vmul.f32 %v444_v41, %v442_v42  ;;  %v508_v42 = vstv %s1925_s6  ;;  %s1977_s6 = sld [smem:[#allocation7 + $0x21]] }
  0xd4   : > { %299 = vst.msk [vmem:[#allocation2 + $0x6b] sm:$0xff] %vm297_vm5, %v293_v45  ;;  %298 = vst.msk [vmem:[#allocation2 + $0x63] sm:$0xff] %vm297_vm5, %v291_v46  ;;  %v381_v52 = vld [vmem:[#allocation2 + $0x8] sm:$0xff]  ;;  %v390_v58 = vmul.f32 %v388_v48, %v387_v51 }
  0xd5   : > { %v384_v59 = vmul.f32 %v382_v49, %v381_v52  ;;  %v435_v34 = vld [vmem:[#allocation2 + $0x9] sm:$0xff]  ;;  %v443_v43 = vld [vmem:[#allocation2 + $0x21] sm:$0xff]  ;;  %v459_v52 = vld [vmem:[#allocation2 + $0x51] sm:$0xff] }
  0xd6   : > { %v438_v48 = vmul.f32 %v436_v33, %v435_v34  ;;  %v458_v51 = vld [vmem:[#allocation2 + $0x49] sm:$0xff]  ;;  %v446_v57 = vmul.f32 %v444_v41, %v443_v43  ;;  %v498_v33 = vld [vmem:[#allocation2 + $0x1a] sm:$0xff]  ;;  %v515_v41 = vld [vmem:[#allocation2 + $0x52] sm:$0xff] }
  0xd7   : > { %v303_v53 = vpop.permute.xlu1 %302  ;;  %v301_v54 = vpop.permute.xlu0 %300  ;;  %v394_v60 = vld [vmem:[#allocation2 + $0x30] sm:$0xff]  ;;  %v395_v61 = vld [vmem:[#allocation2 + $0x38] sm:$0xff]  ;;  %v392_v6 = vadd.f32 %v390_v58, %v384_v59  ;;  %v499_v34 = vld [vmem:[#allocation2 + $0x22] sm:$0xff] }
  0xd8   : > { %309 = vst.msk [vmem:[#allocation2 + $0x83] sm:$0xff] %vm307_vm6, %v303_v53  ;;  %308 = vst.msk [vmem:[#allocation2 + $0x7b] sm:$0xff] %vm307_vm6, %v301_v54  ;;  %v397_v0 = vmul.f32 %v396_v55, %v394_v60  ;;  %v398_v1 = vmul.f32 %v396_v55, %v395_v61  ;;  %v452_v53 = vstv %s1899_s20  ;;  %v450_v54 = vld [vmem:[#allocation2 + $0x31] sm:$0xff]  ;;  %v451_v55 = vld [vmem:[#allocation2 + $0x39] sm:$0xff]  ;;  %v461_v60 = vmul.f32 %v460_v44, %v458_v51  ;;  %s1956_s20 = sld [smem:[#allocation7 + $0x1a]] }
  0xd9   : > { %v462_v61 = vmul.f32 %v460_v44, %v459_v52  ;;  %v506_v43 = vld [vmem:[#allocation2 + $0x32] sm:$0xff]  ;;  %v507_v44 = vld [vmem:[#allocation2 + $0x3a] sm:$0xff] }
  0xda   : > { %v399_v9 = vadd.f32 %v397_v0, %v391_v5  ;;  %v400_v10 = vadd.f32 %v398_v1, %v392_v6  ;;  %v453_v0 = vmul.f32 %v452_v53, %v450_v54  ;;  %v454_v1 = vmul.f32 %v452_v53, %v451_v55 }
  0xdb   : > { %v313_v62 = vpop.permute.xlu1 %312  ;;  %v311_v63 = vpop.permute.xlu0 %310  ;;  %v410_v14 = vld [vmem:[#allocation2 + $0x60] sm:$0xff]  ;;  %v411_v15 = vld [vmem:[#allocation2 + $0x68] sm:$0xff]  ;;  %v509_v51 = vmul.f32 %v508_v42, %v506_v43  ;;  %v510_v52 = vmul.f32 %v508_v42, %v507_v44  ;;  %v524_v55 = vstv %s1932_s7  ;;  %s1981_s7 = sld [smem:[#allocation7 + $0x22]] }
  0xdc   : > { %319 = vst.msk [vmem:[#allocation2 + $0x9b] sm:$0xff] %vm317_vm7, %v313_v62  ;;  %318 = vst.msk [vmem:[#allocation2 + $0x93] sm:$0xff] %vm317_vm7, %v311_v63  ;;  %v407_v19 = vadd.f32 %v405_v11, %v399_v9  ;;  %v408_v20 = vadd.f32 %v406_v12, %v400_v10  ;;  %v413_v21 = vmul.f32 %v412_v13, %v410_v14  ;;  %v466_v5 = vld [vmem:[#allocation2 + $0x61] sm:$0xff]  ;;  %v467_v6 = vld [vmem:[#allocation2 + $0x69] sm:$0xff]  ;;  %v476_v9 = vstv %s1908_s26  ;;  %s1962_s26 = sld [smem:[#allocation7 + $0x1c]] }
  0xdd   : > { %v414_v22 = vmul.f32 %v412_v13, %v411_v15  ;;  %v469_v14 = vmul.f32 %v468_v4, %v466_v5  ;;  %v470_v15 = vmul.f32 %v468_v4, %v467_v6  ;;  %v578_v42 = vld [vmem:[#allocation2 + $0x63] sm:$0xff] }
  0xde   : > { %v415_v31 = vadd.f32 %v413_v21, %v407_v19 }
  0xdf   : > { %v325_v7 = vpop.permute.xlu1 %324  ;;  %v323_v8 = vpop.permute.xlu0 %322  ;;  %v418_v23 = vld [vmem:[#allocation2 + $0x78] sm:$0xff]  ;;  %v419_v24 = vld [vmem:[#allocation2 + $0x80] sm:$0xff]  ;;  %v416_v32 = vadd.f32 %v414_v22, %v408_v20 }
  0xe0   : > { %330 = vst.msk [vmem:[#allocation2 + $0xb3] sm:$0xff] %vm264_vm3, %v325_v7  ;;  %329 = vst.msk [vmem:[#allocation2 + $0xab] sm:$0xff] %vm264_vm3, %v323_v8  ;;  %v421_v25 = vmul.f32 %v420_v16, %v418_v23  ;;  %v422_v26 = vmul.f32 %v420_v16, %v419_v24  ;;  %v474_v10 = vld [vmem:[#allocation2 + $0x79] sm:$0xff]  ;;  %v475_v11 = vld [vmem:[#allocation2 + $0x81] sm:$0xff] }
  0xe1   : > { %v477_v21 = vmul.f32 %v476_v9, %v474_v10  ;;  %v478_v22 = vmul.f32 %v476_v9, %v475_v11  ;;  %v548_v10 = vstv %s1941_s8  ;;  %v546_v11 = vld [vmem:[#allocation2 + $0x3] sm:$0xff]  ;;  %s1988_s8 = sld [smem:[#allocation7 + $0x26]] }
  0xe2   : > { %v423_v37 = vadd.f32 %v421_v25, %v415_v31  ;;  %v424_v38 = vadd.f32 %v422_v26, %v416_v32  ;;  %v492_v25 = vstv %s1916_s29  ;;  %v490_v26 = vld [vmem:[#allocation2 + $0x2] sm:$0xff]  ;;  %v500_v32 = vstv %s1920_s30  ;;  %s1967_s29 = sld [smem:[#allocation7 + $0x1f]]  ;;  %s1969_s30 = sld [smem:[#allocation7 + $0x1e]] }
  0xe3   : > { %v334_v17 = vpop.permute.xlu1 %333  ;;  %v332_v18 = vpop.permute.xlu0 %331  ;;  %v426_v35 = vld [vmem:[#allocation2 + $0x90] sm:$0xff]  ;;  %v427_v36 = vld [vmem:[#allocation2 + $0x98] sm:$0xff] }
  0xe4   : > { %339 = vst.msk [vmem:[#allocation2 + $0xcb] sm:$0xff] %vm274_vm2, %v334_v17  ;;  %338 = vst.msk [vmem:[#allocation2 + $0xc3] sm:$0xff] %vm274_vm2, %v332_v18  ;;  %v429_v39 = vmul.f32 %v428_v27, %v426_v35  ;;  %v430_v40 = vmul.f32 %v428_v27, %v427_v36  ;;  %v484_v18 = vstv %s1914_s19  ;;  %v482_v19 = vld [vmem:[#allocation2 + $0x91] sm:$0xff]  ;;  %v483_v20 = vld [vmem:[#allocation2 + $0x99] sm:$0xff]  ;;  %v516_v35 = vstv %s1923_s5  ;;  %s1964_s19 = sld [smem:[#allocation7 + $0x1d]]  ;;  %s1974_s5 = sld [smem:[#allocation7 + $0x20]] }
  0xe5   : > { %v491_v27 = vld [vmem:[#allocation2 + $0xa] sm:$0xff]  ;;  %v485_v30 = vmul.f32 %v484_v18, %v482_v19  ;;  %v486_v31 = vmul.f32 %v484_v18, %v483_v20  ;;  %v493_v36 = vmul.f32 %v492_v25, %v490_v26  ;;  %v538_v4 = vld [vmem:[#allocation2 + $0x92] sm:$0xff]  ;;  %v539_v5 = vld [vmem:[#allocation2 + $0x9a] sm:$0xff]  ;;  %v572_v20 = vstv %s1946_s16  ;;  %s1995_s16 = sld [smem:[#allocation7 + $0x27]] }
  0xe6   : > { %v431_v49 = vadd.f32 %v429_v39, %v423_v37  ;;  %v432_v50 = vadd.f32 %v430_v40, %v424_v38  ;;  %v494_v37 = vmul.f32 %v492_v25, %v491_v27  ;;  %v514_v40 = vld [vmem:[#allocation2 + $0x4a] sm:$0xff]  ;;  %v554_v18 = vld [vmem:[#allocation2 + $0x1b] sm:$0xff]  ;;  %v571_v26 = vld [vmem:[#allocation2 + $0x53] sm:$0xff]  ;;  %v564_v27 = vstv %s1948_s17  ;;  %s1998_s17 = sld [smem:[#allocation7 + $0x28]] }
  0xe7   : > { %v343_v28 = vpop.permute.xlu1 %342  ;;  %v341_v29 = vpop.permute.xlu0 %340  ;;  %v555_v19 = vld [vmem:[#allocation2 + $0x23] sm:$0xff]  ;;  %v570_v25 = vld [vmem:[#allocation2 + $0x4b] sm:$0xff] }
  0xe8   : > { %348 = vst.msk [vmem:[#allocation2 + $0xe3] sm:$0xff] %vm284_vm4, %v343_v28  ;;  %347 = vst.msk [vmem:[#allocation2 + $0xdb] sm:$0xff] %vm284_vm4, %v341_v29  ;;  %v439_v58 = vadd.f32 %v437_v47, %v431_v49  ;;  %v440_v59 = vadd.f32 %v438_v48, %v432_v50  ;;  %v517_v49 = vmul.f32 %v516_v35, %v514_v40  ;;  %v580_v40 = vstv %s1953_s25  ;;  %s2002_s25 = sld [smem:[#allocation7 + $0x29]] }
  0xe9   : > { %v518_v50 = vmul.f32 %v516_v35, %v515_v41  ;;  %v574_v35 = vmul.f32 %v572_v20, %v571_v26  ;;  %v579_v41 = vld [vmem:[#allocation2 + $0x6b] sm:$0xff] }
  0xea   : > { %v447_v2 = vadd.f32 %v445_v56, %v439_v58  ;;  %v448_v3 = vadd.f32 %v446_v57, %v440_v59  ;;  %v522_v56 = vld [vmem:[#allocation2 + $0x62] sm:$0xff]  ;;  %v523_v57 = vld [vmem:[#allocation2 + $0x6a] sm:$0xff] }
  0xeb   : > { %v355_v45 = vpop.permute.xlu1 %354  ;;  %v353_v46 = vpop.permute.xlu0 %352  ;;  %v635_v26 = vld [vmem:[#allocation2 + $0x6c] sm:$0xff] }
  0xec   : > { %360 = vst.msk [vmem:[#allocation2 + $0x113] sm:$0xff] %vm297_vm5, %v355_v45  ;;  %359 = vst.msk [vmem:[#allocation2 + $0x10b] sm:$0xff] %vm297_vm5, %v353_v46  ;;  %v455_v7 = vadd.f32 %v453_v0, %v447_v2  ;;  %v456_v8 = vadd.f32 %v454_v1, %v448_v3  ;;  %v501_v45 = vmul.f32 %v500_v32, %v498_v33  ;;  %v540_v3 = vstv %s1939_s27  ;;  %s1985_s27 = sld [smem:[#allocation7 + $0x24]] }
  0xed   : > { %v502_v46 = vmul.f32 %v500_v32, %v499_v34  ;;  %v526_v0 = vmul.f32 %v524_v55, %v523_v57  ;;  %v573_v34 = vmul.f32 %v572_v20, %v570_v25  ;;  %v636_v25 = vstv %s1974_s5  ;;  %s2023_s5 = sld [smem:[#allocation7 + $0x30]] }
  0xee   : > { %v463_v16 = vadd.f32 %v461_v60, %v455_v7  ;;  %v464_v17 = vadd.f32 %v462_v61, %v456_v8  ;;  %v532_v60 = vstv %s1935_s24  ;;  %v530_v61 = vld [vmem:[#allocation2 + $0x7a] sm:$0xff]  ;;  %s1983_s24 = sld [smem:[#allocation7 + $0x23]] }
  0xef   : > { %v364_v62 = vpop.permute.xlu1 %363  ;;  %v362_v63 = vpop.permute.xlu0 %361  ;;  %v533_v6 = vmul.f32 %v532_v60, %v530_v61  ;;  %v603_v61 = vld [vmem:[#allocation2 + $0xc] sm:$0xff] }
  0xf0   : > { %369 = vst.msk [vmem:[#allocation2 + $0x12b] sm:$0xff] %vm307_vm6, %v364_v62  ;;  %368 = vst.msk [vmem:[#allocation2 + $0x123] sm:$0xff] %vm307_vm6, %v362_v63  ;;  %v471_v23 = vadd.f32 %v469_v14, %v463_v16  ;;  %v472_v24 = vadd.f32 %v470_v15, %v464_v17  ;;  %v531_v62 = vld [vmem:[#allocation2 + $0x82] sm:$0xff]  ;;  %v525_v63 = vmul.f32 %v524_v55, %v522_v56  ;;  %v556_v17 = vstv %s1943_s14  ;;  %s1990_s14 = sld [smem:[#allocation7 + $0x25]] }
  0xf1   : > { %v534_v7 = vmul.f32 %v532_v60, %v531_v62  ;;  %v541_v15 = vmul.f32 %v540_v3, %v538_v4  ;;  %v542_v16 = vmul.f32 %v540_v3, %v539_v5  ;;  %v602_v60 = vld [vmem:[#allocation2 + $0x4] sm:$0xff]  ;;  %v610_v3 = vld [vmem:[#allocation2 + $0x1c] sm:$0xff]  ;;  %v628_v5 = vstv %s1967_s29  ;;  %s2016_s29 = sld [smem:[#allocation7 + $0x2e]] }
  0xf2   : > { %v479_v28 = vadd.f32 %v477_v21, %v471_v23  ;;  %v480_v29 = vadd.f32 %v478_v22, %v472_v24  ;;  %v549_v21 = vmul.f32 %v548_v10, %v546_v11  ;;  %v611_v4 = vld [vmem:[#allocation2 + $0x24] sm:$0xff]  ;;  %v627_v11 = vld [vmem:[#allocation2 + $0x54] sm:$0xff] }
  0xf3   : > { %v373_v12 = vpop.permute.xlu1 %372  ;;  %v371_v13 = vpop.permute.xlu0 %370  ;;  %v630_v20 = vmul.f32 %v628_v5, %v627_v11  ;;  %v691_v11 = vld [vmem:[#allocation2 + $0x6d] sm:$0xff] }
  0xf4   : > { %378 = vst.msk [vmem:[#allocation2 + $0x143] sm:$0xff] %vm317_vm7, %v373_v12  ;;  %377 = vst.msk [vmem:[#allocation2 + $0x13b] sm:$0xff] %vm317_vm7, %v371_v13  ;;  %v487_v38 = vadd.f32 %v485_v30, %v479_v28  ;;  %v488_v39 = vadd.f32 %v486_v31, %v480_v29  ;;  %v547_v12 = vld [vmem:[#allocation2 + $0xb] sm:$0xff]  ;;  %v563_v28 = vld [vmem:[#allocation2 + $0x3b] sm:$0xff]  ;;  %v557_v30 = vmul.f32 %v556_v17, %v554_v18 }
  0xf5   : > { %v550_v22 = vmul.f32 %v548_v10, %v547_v12  ;;  %v562_v29 = vld [vmem:[#allocation2 + $0x33] sm:$0xff]  ;;  %v558_v31 = vmul.f32 %v556_v17, %v555_v19  ;;  %v620_v12 = vstv %s1969_s30  ;;  %s2019_s30 = sld [smem:[#allocation7 + $0x2f]] }
  0xf6   : > { %v495_v47 = vadd.f32 %v493_v36, %v487_v38  ;;  %v496_v48 = vadd.f32 %v494_v37, %v488_v39  ;;  %v566_v36 = vmul.f32 %v564_v27, %v563_v28  ;;  %v565_v37 = vmul.f32 %v564_v27, %v562_v29  ;;  %v626_v10 = vld [vmem:[#allocation2 + $0x4c] sm:$0xff]  ;;  %v634_v27 = vld [vmem:[#allocation2 + $0x64] sm:$0xff] }
  0xf7   : > { %v629_v19 = vmul.f32 %v628_v5, %v626_v10  ;;  %v692_v10 = vstv %s1995_s16  ;;  %s2043_s16 = sld [smem:[#allocation7 + $0x37]] }
  0xf8   : > { %v503_v53 = vadd.f32 %v501_v45, %v495_v47  ;;  %v504_v54 = vadd.f32 %v502_v46, %v496_v48  ;;  %v588_v45 = vstv %s1956_s20  ;;  %v587_v46 = vld [vmem:[#allocation2 + $0x83] sm:$0xff]  ;;  %v586_v47 = vld [vmem:[#allocation2 + $0x7b] sm:$0xff]  ;;  %v582_v48 = vmul.f32 %v580_v40, %v579_v41  ;;  %s2004_s20 = sld [smem:[#allocation7 + $0x2a]] }
  0xf9   : > { %v590_v55 = vmul.f32 %v588_v45, %v587_v46  ;;  %v589_v56 = vmul.f32 %v588_v45, %v586_v47  ;;  %v658_v45 = vld [vmem:[#allocation2 + $0x5] sm:$0xff]  ;;  %v659_v46 = vld [vmem:[#allocation2 + $0xd] sm:$0xff] }
  0xfa   : > { %v511_v58 = vadd.f32 %v509_v51, %v503_v53  ;;  %v512_v59 = vadd.f32 %v510_v52, %v504_v54  ;;  %v596_v52 = vstv %s1960_s23  ;;  %v595_v53 = vld [vmem:[#allocation2 + $0x9b] sm:$0xff]  ;;  %v594_v54 = vld [vmem:[#allocation2 + $0x93] sm:$0xff]  ;;  %s2006_s23 = sld [smem:[#allocation7 + $0x2b]] }
  0xfb   : > { %v598_v62 = vmul.f32 %v596_v52, %v595_v53  ;;  %v667_v53 = vld [vmem:[#allocation2 + $0x25] sm:$0xff] }
  0xfc   : > { %v519_v1 = vadd.f32 %v517_v49, %v511_v58  ;;  %v520_v2 = vadd.f32 %v518_v50, %v512_v59  ;;  %v581_v49 = vmul.f32 %v580_v40, %v578_v42  ;;  %v604_v59 = vstv %s1962_s26  ;;  %s2009_s26 = sld [smem:[#allocation7 + $0x2d]] }
  0xfe   : > { %v527_v8 = vadd.f32 %v525_v63, %v519_v1  ;;  %v528_v9 = vadd.f32 %v526_v0, %v520_v2  ;;  %v597_v1 = vmul.f32 %v596_v52, %v594_v54  ;;  %v612_v2 = vstv %s1964_s19  ;;  %v666_v52 = vld [vmem:[#allocation2 + $0x1d] sm:$0xff]  ;;  %s2011_s19 = sld [smem:[#allocation7 + $0x2c]] }
  0xff   : > { %v684_v54 = vstv %s1988_s8  ;;  %s2037_s8 = sld [smem:[#allocation7 + $0x35]] }
 0x100   : > { %v535_v13 = vadd.f32 %v533_v6, %v527_v8  ;;  %v536_v14 = vadd.f32 %v534_v7, %v528_v9  ;;  %v605_v6 = vmul.f32 %v604_v59, %v602_v60  ;;  %v606_v7 = vmul.f32 %v604_v59, %v603_v61  ;;  %v682_v59 = vld [vmem:[#allocation2 + $0x4d] sm:$0xff]  ;;  %v683_v60 = vld [vmem:[#allocation2 + $0x55] sm:$0xff] }
 0x101   : > { %v676_v61 = vstv %s1990_s14  ;;  %v686_v5 = vmul.f32 %v684_v54, %v683_v60  ;;  %v747_v60 = vld [vmem:[#allocation2 + $0x6e] sm:$0xff]  ;;  %s2039_s14 = sld [smem:[#allocation7 + $0x36]] }
 0x102   : > { %v543_v23 = vadd.f32 %v541_v15, %v535_v13  ;;  %v544_v24 = vadd.f32 %v542_v16, %v536_v14  ;;  %v619_v13 = vld [vmem:[#allocation2 + $0x3c] sm:$0xff]  ;;  %v618_v14 = vld [vmem:[#allocation2 + $0x34] sm:$0xff]  ;;  %v613_v15 = vmul.f32 %v612_v2, %v610_v3  ;;  %v614_v16 = vmul.f32 %v612_v2, %v611_v4 }
 0x103   : > { %v685_v4 = vmul.f32 %v684_v54, %v682_v59  ;;  %v748_v59 = vstv %s2016_s29  ;;  %s2065_s29 = sld [smem:[#allocation7 + $0x3e]] }
 0x104   : > { %v551_v32 = vadd.f32 %v549_v21, %v543_v23  ;;  %v552_v33 = vadd.f32 %v550_v22, %v544_v24  ;;  %v622_v21 = vmul.f32 %v620_v12, %v619_v13  ;;  %v621_v22 = vmul.f32 %v620_v12, %v618_v14  ;;  %v690_v12 = vld [vmem:[#allocation2 + $0x65] sm:$0xff] }
 0x106   : > { %v559_v38 = vadd.f32 %v557_v30, %v551_v32  ;;  %v560_v39 = vadd.f32 %v558_v31, %v552_v33  ;;  %v644_v30 = vstv %s1977_s6  ;;  %v643_v31 = vld [vmem:[#allocation2 + $0x84] sm:$0xff]  ;;  %v642_v32 = vld [vmem:[#allocation2 + $0x7c] sm:$0xff]  ;;  %v638_v33 = vmul.f32 %v636_v25, %v635_v26  ;;  %s2025_s6 = sld [smem:[#allocation7 + $0x31]] }
 0x107   : > { %v646_v40 = vmul.f32 %v644_v30, %v643_v31  ;;  %v645_v41 = vmul.f32 %v644_v30, %v642_v32  ;;  %v714_v30 = vld [vmem:[#allocation2 + $0x6] sm:$0xff]  ;;  %v715_v31 = vld [vmem:[#allocation2 + $0xe] sm:$0xff] }
 0x108   : > { %v567_v43 = vadd.f32 %v565_v37, %v559_v38  ;;  %v568_v44 = vadd.f32 %v566_v36, %v560_v39  ;;  %v652_v37 = vstv %s1981_s7  ;;  %v651_v38 = vld [vmem:[#allocation2 + $0x9c] sm:$0xff]  ;;  %v650_v39 = vld [vmem:[#allocation2 + $0x94] sm:$0xff]  ;;  %s2028_s7 = sld [smem:[#allocation7 + $0x32]] }
 0x109   : > { %v654_v47 = vmul.f32 %v652_v37, %v651_v38  ;;  %v723_v38 = vld [vmem:[#allocation2 + $0x26] sm:$0xff] }
 0x10a   : > { %v575_v50 = vadd.f32 %v573_v34, %v567_v43  ;;  %v576_v51 = vadd.f32 %v574_v35, %v568_v44  ;;  %v637_v34 = vmul.f32 %v636_v25, %v634_v27  ;;  %v660_v44 = vstv %s1983_s24  ;;  %s2030_s24 = sld [smem:[#allocation7 + $0x34]] }
 0x10c   : > { %v583_v57 = vadd.f32 %v581_v49, %v575_v50  ;;  %v584_v58 = vadd.f32 %v582_v48, %v576_v51  ;;  %v653_v50 = vmul.f32 %v652_v37, %v650_v39  ;;  %v668_v51 = vstv %s1985_s27  ;;  %v722_v37 = vld [vmem:[#allocation2 + $0x1e] sm:$0xff]  ;;  %s2033_s27 = sld [smem:[#allocation7 + $0x33]] }
 0x10d   : > { %v740_v39 = vstv %s2009_s26  ;;  %s2058_s26 = sld [smem:[#allocation7 + $0x3c]] }
 0x10e   : > { %v591_v63 = vadd.f32 %v589_v56, %v583_v57  ;;  %v592_v0 = vadd.f32 %v590_v55, %v584_v58  ;;  %v661_v55 = vmul.f32 %v660_v44, %v658_v45  ;;  %v662_v56 = vmul.f32 %v660_v44, %v659_v46  ;;  %v739_v45 = vld [vmem:[#allocation2 + $0x56] sm:$0xff] }
 0x10f   : > { %v732_v46 = vstv %s2011_s19  ;;  %v742_v54 = vmul.f32 %v740_v39, %v739_v45  ;;  %v802_v45 = vld [vmem:[#allocation2 + $0x108] sm:$0xff]  ;;  %s2062_s19 = sld [smem:[#allocation7 + $0x3d]] }
 0x110   : > { %v599_v8 = vadd.f32 %v597_v1, %v591_v63  ;;  %v600_v9 = vadd.f32 %v598_v62, %v592_v0  ;;  %v675_v62 = vld [vmem:[#allocation2 + $0x3d] sm:$0xff]  ;;  %v674_v63 = vld [vmem:[#allocation2 + $0x35] sm:$0xff]  ;;  %v669_v0 = vmul.f32 %v668_v51, %v666_v52  ;;  %v670_v1 = vmul.f32 %v668_v51, %v667_v53 }
 0x112   : > { %v607_v17 = vadd.f32 %v605_v6, %v599_v8  ;;  %v608_v18 = vadd.f32 %v606_v7, %v600_v9  ;;  %v678_v6 = vmul.f32 %v676_v61, %v675_v62  ;;  %v677_v7 = vmul.f32 %v676_v61, %v674_v63  ;;  %v746_v61 = vld [vmem:[#allocation2 + $0x66] sm:$0xff] }
 0x114   : > { %v615_v23 = vadd.f32 %v613_v15, %v607_v17  ;;  %v616_v24 = vadd.f32 %v614_v16, %v608_v18  ;;  %v700_v15 = vstv %s1998_s17  ;;  %v699_v16 = vld [vmem:[#allocation2 + $0x85] sm:$0xff]  ;;  %v698_v17 = vld [vmem:[#allocation2 + $0x7d] sm:$0xff]  ;;  %v694_v18 = vmul.f32 %v692_v10, %v691_v11  ;;  %s2046_s17 = sld [smem:[#allocation7 + $0x38]] }
 0x115   : > { %v702_v25 = vmul.f32 %v700_v15, %v699_v16  ;;  %v701_v26 = vmul.f32 %v700_v15, %v698_v17  ;;  %v770_v15 = vld [vmem:[#allocation2 + $0xa8] sm:$0xff]  ;;  %v771_v16 = vld [vmem:[#allocation2 + $0xb0] sm:$0xff] }
 0x116   : > { %v623_v28 = vadd.f32 %v621_v22, %v615_v23  ;;  %v624_v29 = vadd.f32 %v622_v21, %v616_v24  ;;  %v708_v22 = vstv %s2002_s25  ;;  %v707_v23 = vld [vmem:[#allocation2 + $0x9d] sm:$0xff]  ;;  %v706_v24 = vld [vmem:[#allocation2 + $0x95] sm:$0xff]  ;;  %s2048_s25 = sld [smem:[#allocation7 + $0x39]] }
 0x117   : > { %v710_v32 = vmul.f32 %v708_v22, %v707_v23  ;;  %v779_v23 = vld [vmem:[#allocation2 + $0xc8] sm:$0xff] }
 0x118   : > { %v631_v35 = vadd.f32 %v629_v19, %v623_v28  ;;  %v632_v36 = vadd.f32 %v630_v20, %v624_v29  ;;  %v693_v19 = vmul.f32 %v692_v10, %v690_v12  ;;  %v716_v29 = vstv %s2004_s20  ;;  %s2050_s20 = sld [smem:[#allocation7 + $0x3a]] }
 0x11a   : > { %v639_v42 = vadd.f32 %v637_v34, %v631_v35  ;;  %v640_v43 = vadd.f32 %v638_v33, %v632_v36  ;;  %v709_v35 = vmul.f32 %v708_v22, %v706_v24  ;;  %v724_v36 = vstv %s2006_s23  ;;  %v778_v22 = vld [vmem:[#allocation2 + $0xc0] sm:$0xff]  ;;  %s2055_s23 = sld [smem:[#allocation7 + $0x3b]] }
 0x11b   : > { %v796_v24 = vstv %s2030_s24  ;;  %s2079_s24 = sld [smem:[#allocation7 + $0x43]] }
 0x11c   : > { %v647_v48 = vadd.f32 %v645_v41, %v639_v42  ;;  %v648_v49 = vadd.f32 %v646_v40, %v640_v43  ;;  %v717_v40 = vmul.f32 %v716_v29, %v714_v30  ;;  %v718_v41 = vmul.f32 %v716_v29, %v715_v31  ;;  %v738_v43 = vld [vmem:[#allocation2 + $0x4e] sm:$0xff]  ;;  %v795_v30 = vld [vmem:[#allocation2 + $0xf8] sm:$0xff] }
 0x11d   : > { %v741_v53 = vmul.f32 %v740_v39, %v738_v43  ;;  %v794_v29 = vld [vmem:[#allocation2 + $0xf0] sm:$0xff]  ;;  %v788_v31 = vstv %s2033_s27  ;;  %v798_v39 = vmul.f32 %v796_v24, %v795_v30  ;;  %s2083_s27 = sld [smem:[#allocation7 + $0x44]] }
 0x11e   : > { %v655_v57 = vadd.f32 %v653_v50, %v647_v48  ;;  %v656_v58 = vadd.f32 %v654_v47, %v648_v49  ;;  %v731_v47 = vld [vmem:[#allocation2 + $0x3e] sm:$0xff]  ;;  %v730_v48 = vld [vmem:[#allocation2 + $0x36] sm:$0xff]  ;;  %v725_v49 = vmul.f32 %v724_v36, %v722_v37  ;;  %v726_v50 = vmul.f32 %v724_v36, %v723_v38  ;;  %v858_v30 = vld [vmem:[#allocation2 + $0x109] sm:$0xff] }
 0x11f   : > { %v797_v38 = vmul.f32 %v796_v24, %v794_v29  ;;  %v860_v29 = vstv %s2058_s26  ;;  %s2106_s26 = sld [smem:[#allocation7 + $0x4c]] }
 0x120   : > { %v663_v2 = vadd.f32 %v661_v55, %v655_v57  ;;  %v664_v3 = vadd.f32 %v662_v56, %v656_v58  ;;  %v734_v55 = vmul.f32 %v732_v46, %v731_v47  ;;  %v733_v56 = vmul.f32 %v732_v46, %v730_v48  ;;  %v803_v46 = vld [vmem:[#allocation2 + $0x110] sm:$0xff] }
 0x122   : > { %v671_v8 = vadd.f32 %v669_v0, %v663_v2  ;;  %v672_v9 = vadd.f32 %v670_v1, %v664_v3  ;;  %v756_v0 = vstv %s2019_s30  ;;  %v755_v1 = vld [vmem:[#allocation2 + $0x86] sm:$0xff]  ;;  %v754_v2 = vld [vmem:[#allocation2 + $0x7e] sm:$0xff]  ;;  %v750_v3 = vmul.f32 %v748_v59, %v747_v60  ;;  %s2067_s30 = sld [smem:[#allocation7 + $0x3f]] }
 0x123   : > { %v758_v10 = vmul.f32 %v756_v0, %v755_v1  ;;  %v757_v11 = vmul.f32 %v756_v0, %v754_v2  ;;  %v828_v1 = vstv %s2046_s17  ;;  %v826_v2 = vld [vmem:[#allocation2 + $0xa9] sm:$0xff]  ;;  %s2092_s17 = sld [smem:[#allocation7 + $0x48]] }
 0x124   : > { %v679_v13 = vadd.f32 %v677_v7, %v671_v8  ;;  %v680_v14 = vadd.f32 %v678_v6, %v672_v9  ;;  %v764_v7 = vstv %s2023_s5  ;;  %v763_v8 = vld [vmem:[#allocation2 + $0x9e] sm:$0xff]  ;;  %v762_v9 = vld [vmem:[#allocation2 + $0x96] sm:$0xff]  ;;  %s2069_s5 = sld [smem:[#allocation7 + $0x40]] }
 0x125   : > { %v766_v17 = vmul.f32 %v764_v7, %v763_v8  ;;  %v835_v8 = vld [vmem:[#allocation2 + $0xc9] sm:$0xff] }
 0x126   : > { %v687_v20 = vadd.f32 %v685_v4, %v679_v13  ;;  %v688_v21 = vadd.f32 %v686_v5, %v680_v14  ;;  %v749_v4 = vmul.f32 %v748_v59, %v746_v61  ;;  %v772_v14 = vstv %s2025_s6  ;;  %s2071_s6 = sld [smem:[#allocation7 + $0x41]] }
 0x128   : > { %v695_v27 = vadd.f32 %v693_v19, %v687_v20  ;;  %v696_v28 = vadd.f32 %v694_v18, %v688_v21  ;;  %v765_v19 = vmul.f32 %v764_v7, %v762_v9  ;;  %v780_v21 = vstv %s2028_s7  ;;  %v834_v7 = vld [vmem:[#allocation2 + $0xc1] sm:$0xff]  ;;  %s2075_s7 = sld [smem:[#allocation7 + $0x42]] }
 0x129   : > { %v781_v36 = vmul.f32 %v780_v21, %v778_v22  ;;  %v782_v37 = vmul.f32 %v780_v21, %v779_v23  ;;  %v844_v9 = vstv %s2050_s20  ;;  %s2100_s20 = sld [smem:[#allocation7 + $0x4a]] }
 0x12a   : > { %v703_v33 = vadd.f32 %v701_v26, %v695_v27  ;;  %v704_v34 = vadd.f32 %v702_v25, %v696_v28  ;;  %v773_v27 = vmul.f32 %v772_v14, %v770_v15  ;;  %v774_v28 = vmul.f32 %v772_v14, %v771_v16 }
 0x12b   : > { %v852_v16 = vstv %s2055_s23  ;;  %s2104_s23 = sld [smem:[#allocation7 + $0x4b]] }
 0x12c   : > { %v711_v42 = vadd.f32 %v709_v35, %v703_v33  ;;  %v712_v44 = vadd.f32 %v710_v32, %v704_v34  ;;  %v786_v32 = vld [vmem:[#allocation2 + $0xd8] sm:$0xff]  ;;  %v787_v33 = vld [vmem:[#allocation2 + $0xe0] sm:$0xff] }
 0x12d   : > { %v790_v43 = vmul.f32 %v788_v31, %v787_v33 }
 0x12e   : > { %v719_v51 = vadd.f32 %v717_v40, %v711_v42  ;;  %v720_v52 = vadd.f32 %v718_v41, %v712_v44  ;;  %v789_v42 = vmul.f32 %v788_v31, %v786_v32  ;;  %v804_v44 = vstv %s2037_s8  ;;  %v859_v31 = vld [vmem:[#allocation2 + $0x111] sm:$0xff]  ;;  %s2086_s8 = sld [smem:[#allocation7 + $0x45]] }
 0x130   : > { %v727_v57 = vadd.f32 %v725_v49, %v719_v51  ;;  %v728_v58 = vadd.f32 %v726_v50, %v720_v52  ;;  %v812_v49 = vstv %s2039_s14  ;;  %v810_v50 = vld [vmem:[#allocation2 + $0x120] sm:$0xff]  ;;  %v811_v51 = vld [vmem:[#allocation2 + $0x128] sm:$0xff]  ;;  %v820_v52 = vstv %s2043_s16  ;;  %s2088_s14 = sld [smem:[#allocation7 + $0x46]]  ;;  %s2090_s16 = sld [smem:[#allocation7 + $0x47]] }
 0x131   : > { %v813_v59 = vmul.f32 %v812_v49, %v810_v50  ;;  %v814_v60 = vmul.f32 %v812_v49, %v811_v51  ;;  %v882_v49 = vld [vmem:[#allocation2 + $0xaa] sm:$0xff]  ;;  %v883_v50 = vld [vmem:[#allocation2 + $0xb2] sm:$0xff] }
 0x132   : > { %v735_v62 = vadd.f32 %v733_v56, %v727_v57  ;;  %v736_v63 = vadd.f32 %v734_v55, %v728_v58  ;;  %v805_v57 = vmul.f32 %v804_v44, %v802_v45  ;;  %v806_v58 = vmul.f32 %v804_v44, %v803_v46 }
 0x134   : > { %v743_v5 = vadd.f32 %v741_v53, %v735_v62  ;;  %v744_v6 = vadd.f32 %v742_v54, %v736_v63  ;;  %v818_v53 = vld [vmem:[#allocation2 + $0x138] sm:$0xff]  ;;  %v819_v54 = vld [vmem:[#allocation2 + $0x140] sm:$0xff] }
 0x135   : > { %v821_v63 = vmul.f32 %v820_v52, %v818_v53  ;;  %v822_v0 = vmul.f32 %v820_v52, %v819_v54 }
 0x136   : > { %v751_v12 = vadd.f32 %v749_v4, %v743_v5  ;;  %v752_v13 = vadd.f32 %v750_v3, %v744_v6  ;;  %v827_v3 = vld [vmem:[#allocation2 + $0xb1] sm:$0xff]  ;;  %v836_v6 = vstv %s2048_s25  ;;  %s2096_s25 = sld [smem:[#allocation7 + $0x49]] }
 0x138   : > { %v759_v18 = vadd.f32 %v757_v11, %v751_v12  ;;  %v760_v20 = vadd.f32 %v758_v10, %v752_v13  ;;  %v829_v10 = vmul.f32 %v828_v1, %v826_v2  ;;  %v830_v11 = vmul.f32 %v828_v1, %v827_v3  ;;  %v842_v12 = vld [vmem:[#allocation2 + $0xd9] sm:$0xff]  ;;  %v843_v13 = vld [vmem:[#allocation2 + $0xe1] sm:$0xff] }
 0x139   : > { %v845_v23 = vmul.f32 %v844_v9, %v842_v12  ;;  %v846_v24 = vmul.f32 %v844_v9, %v843_v13  ;;  %v908_v1 = vstv %s2075_s7  ;;  %v906_v2 = vld [vmem:[#allocation2 + $0xf2] sm:$0xff]  ;;  %v907_v3 = vld [vmem:[#allocation2 + $0xfa] sm:$0xff]  ;;  %s2125_s7 = sld [smem:[#allocation7 + $0x52]] }
 0x13a   : > { %v767_v25 = vadd.f32 %v765_v19, %v759_v18  ;;  %v768_v26 = vadd.f32 %v766_v17, %v760_v20  ;;  %v850_v17 = vld [vmem:[#allocation2 + $0xf1] sm:$0xff]  ;;  %v851_v18 = vld [vmem:[#allocation2 + $0xf9] sm:$0xff]  ;;  %v837_v19 = vmul.f32 %v836_v6, %v834_v7  ;;  %v838_v20 = vmul.f32 %v836_v6, %v835_v8 }
 0x13b   : > { %v909_v12 = vmul.f32 %v908_v1, %v906_v2  ;;  %v910_v13 = vmul.f32 %v908_v1, %v907_v3  ;;  %v970_v1 = vld [vmem:[#allocation2 + $0x10b] sm:$0xff] }
 0x13c   : > { %v775_v34 = vadd.f32 %v773_v27, %v767_v25  ;;  %v776_v35 = vadd.f32 %v774_v28, %v768_v26  ;;  %v853_v27 = vmul.f32 %v852_v16, %v850_v17  ;;  %v854_v28 = vmul.f32 %v852_v16, %v851_v18  ;;  %v915_v16 = vld [vmem:[#allocation2 + $0x112] sm:$0xff] }
 0x13e   : > { %v783_v40 = vadd.f32 %v781_v36, %v775_v34  ;;  %v784_v41 = vadd.f32 %v782_v37, %v776_v35  ;;  %v868_v34 = vstv %s2062_s19  ;;  %v866_v35 = vld [vmem:[#allocation2 + $0x121] sm:$0xff]  ;;  %v867_v36 = vld [vmem:[#allocation2 + $0x129] sm:$0xff]  ;;  %v861_v37 = vmul.f32 %v860_v29, %v858_v30  ;;  %s2109_s19 = sld [smem:[#allocation7 + $0x4d]] }
 0x13f   : > { %v869_v44 = vmul.f32 %v868_v34, %v866_v35  ;;  %v870_v45 = vmul.f32 %v868_v34, %v867_v36  ;;  %v939_v34 = vld [vmem:[#allocation2 + $0xb3] sm:$0xff]  ;;  %v938_v35 = vld [vmem:[#allocation2 + $0xab] sm:$0xff] }
 0x140   : > { %v791_v47 = vadd.f32 %v789_v42, %v783_v40  ;;  %v792_v48 = vadd.f32 %v790_v43, %v784_v41  ;;  %v876_v41 = vstv %s2065_s29  ;;  %v874_v42 = vld [vmem:[#allocation2 + $0x139] sm:$0xff]  ;;  %v875_v43 = vld [vmem:[#allocation2 + $0x141] sm:$0xff]  ;;  %s2111_s29 = sld [smem:[#allocation7 + $0x4e]] }
 0x141   : > { %v877_v53 = vmul.f32 %v876_v41, %v874_v42  ;;  %v878_v54 = vmul.f32 %v876_v41, %v875_v43  ;;  %v947_v41 = vld [vmem:[#allocation2 + $0xcb] sm:$0xff]  ;;  %v946_v42 = vld [vmem:[#allocation2 + $0xc3] sm:$0xff]  ;;  %v956_v43 = vstv %s2092_s17  ;;  %s2142_s17 = sld [smem:[#allocation7 + $0x58]] }
 0x142   : > { %v799_v55 = vadd.f32 %v797_v38, %v791_v47  ;;  %v800_v56 = vadd.f32 %v798_v39, %v792_v48  ;;  %v862_v38 = vmul.f32 %v860_v29, %v859_v31  ;;  %v884_v48 = vstv %s2067_s30  ;;  %s2113_s30 = sld [smem:[#allocation7 + $0x4f]] }
 0x144   : > { %v807_v61 = vadd.f32 %v805_v57, %v799_v55  ;;  %v808_v62 = vadd.f32 %v806_v58, %v800_v56  ;;  %v892_v55 = vstv %s2069_s5  ;;  %v890_v56 = vld [vmem:[#allocation2 + $0xc2] sm:$0xff]  ;;  %v891_v57 = vld [vmem:[#allocation2 + $0xca] sm:$0xff]  ;;  %v900_v58 = vstv %s2071_s6  ;;  %s2117_s5 = sld [smem:[#allocation7 + $0x50]]  ;;  %s2121_s6 = sld [smem:[#allocation7 + $0x51]] }
 0x146   : > { %v815_v4 = vadd.f32 %v813_v59, %v807_v61  ;;  %v816_v5 = vadd.f32 %v814_v60, %v808_v62  ;;  %v885_v59 = vmul.f32 %v884_v48, %v882_v49  ;;  %v886_v60 = vmul.f32 %v884_v48, %v883_v50  ;;  %v898_v61 = vld [vmem:[#allocation2 + $0xda] sm:$0xff]  ;;  %v899_v62 = vld [vmem:[#allocation2 + $0xe2] sm:$0xff] }
 0x147   : > { %v901_v8 = vmul.f32 %v900_v58, %v898_v61  ;;  %v902_v9 = vmul.f32 %v900_v58, %v899_v62  ;;  %v964_v50 = vstv %s2096_s25  ;;  %s2146_s25 = sld [smem:[#allocation7 + $0x59]] }
 0x148   : > { %v823_v14 = vadd.f32 %v821_v63, %v815_v4  ;;  %v824_v15 = vadd.f32 %v822_v0, %v816_v5  ;;  %v893_v4 = vmul.f32 %v892_v55, %v890_v56  ;;  %v894_v5 = vmul.f32 %v892_v55, %v891_v57 }
 0x14a   : > { %v831_v21 = vadd.f32 %v829_v10, %v823_v14  ;;  %v832_v22 = vadd.f32 %v830_v11, %v824_v15  ;;  %v916_v14 = vstv %s2079_s24  ;;  %v914_v15 = vld [vmem:[#allocation2 + $0x10a] sm:$0xff]  ;;  %s2127_s24 = sld [smem:[#allocation7 + $0x53]] }
 0x14c   : > { %v839_v25 = vadd.f32 %v837_v19, %v831_v21  ;;  %v840_v26 = vadd.f32 %v838_v20, %v832_v22  ;;  %v924_v19 = vstv %s2083_s27  ;;  %v922_v20 = vld [vmem:[#allocation2 + $0x122] sm:$0xff]  ;;  %v923_v21 = vld [vmem:[#allocation2 + $0x12a] sm:$0xff]  ;;  %v917_v22 = vmul.f32 %v916_v14, %v914_v15  ;;  %s2130_s27 = sld [smem:[#allocation7 + $0x54]] }
 0x14d   : > { %v925_v29 = vmul.f32 %v924_v19, %v922_v20  ;;  %v926_v30 = vmul.f32 %v924_v19, %v923_v21  ;;  %v995_v19 = vld [vmem:[#allocation2 + $0xb4] sm:$0xff]  ;;  %v994_v20 = vld [vmem:[#allocation2 + $0xac] sm:$0xff] }
 0x14e   : > { %v847_v32 = vadd.f32 %v845_v23, %v839_v25  ;;  %v848_v33 = vadd.f32 %v846_v24, %v840_v26  ;;  %v918_v23 = vmul.f32 %v916_v14, %v915_v16  ;;  %v932_v26 = vstv %s2086_s8  ;;  %s2132_s8 = sld [smem:[#allocation7 + $0x55]] }
 0x150   : > { %v855_v39 = vadd.f32 %v853_v27, %v847_v32  ;;  %v856_v40 = vadd.f32 %v854_v28, %v848_v33  ;;  %v930_v27 = vld [vmem:[#allocation2 + $0x13a] sm:$0xff]  ;;  %v931_v28 = vld [vmem:[#allocation2 + $0x142] sm:$0xff]  ;;  %v940_v33 = vstv %s2088_s14  ;;  %s2134_s14 = sld [smem:[#allocation7 + $0x56]] }
 0x152   : > { %v863_v46 = vadd.f32 %v861_v37, %v855_v39  ;;  %v864_v47 = vadd.f32 %v862_v38, %v856_v40  ;;  %v933_v38 = vmul.f32 %v932_v26, %v930_v27  ;;  %v934_v39 = vmul.f32 %v932_v26, %v931_v28  ;;  %v1003_v26 = vld [vmem:[#allocation2 + $0xcc] sm:$0xff]  ;;  %v1002_v27 = vld [vmem:[#allocation2 + $0xc4] sm:$0xff] }
 0x153   : > { %v948_v40 = vstv %s2090_s16  ;;  %v1012_v28 = vstv %s2113_s30  ;;  %s2138_s16 = sld [smem:[#allocation7 + $0x57]] }
 0x154   : > { %v871_v51 = vadd.f32 %v869_v44, %v863_v46  ;;  %v872_v52 = vadd.f32 %v870_v45, %v864_v47  ;;  %v942_v44 = vmul.f32 %v940_v33, %v939_v34  ;;  %v941_v45 = vmul.f32 %v940_v33, %v938_v35  ;;  %v955_v46 = vld [vmem:[#allocation2 + $0xe3] sm:$0xff]  ;;  %v954_v47 = vld [vmem:[#allocation2 + $0xdb] sm:$0xff]  ;;  %s2163_s30 = sld [smem:[#allocation7 + $0x5f]] }
 0x155   : > { %v958_v57 = vmul.f32 %v956_v43, %v955_v46  ;;  %v957_v58 = vmul.f32 %v956_v43, %v954_v47  ;;  %v1020_v35 = vstv %s2117_s5  ;;  %s2167_s5 = sld [smem:[#allocation7 + $0x60]] }
 0x156   : > { %v879_v63 = vadd.f32 %v877_v53, %v871_v51  ;;  %v880_v0 = vadd.f32 %v878_v54, %v872_v52  ;;  %v962_v51 = vld [vmem:[#allocation2 + $0xf3] sm:$0xff]  ;;  %v963_v52 = vld [vmem:[#allocation2 + $0xfb] sm:$0xff]  ;;  %v950_v53 = vmul.f32 %v948_v40, %v947_v41  ;;  %v949_v54 = vmul.f32 %v948_v40, %v946_v42 }
 0x157   : > { %v965_v61 = vmul.f32 %v964_v50, %v962_v51  ;;  %v966_v62 = vmul.f32 %v964_v50, %v963_v52  ;;  %v1026_v50 = vld [vmem:[#allocation2 + $0x10c] sm:$0xff] }
 0x158   : > { %v887_v6 = vadd.f32 %v885_v59, %v879_v63  ;;  %v888_v7 = vadd.f32 %v886_v60, %v880_v0  ;;  %v972_v63 = vstv %s2100_s20  ;;  %v971_v0 = vld [vmem:[#allocation2 + $0x113] sm:$0xff]  ;;  %s2148_s20 = sld [smem:[#allocation7 + $0x5a]] }
 0x15a   : > { %v895_v10 = vadd.f32 %v893_v4, %v887_v6  ;;  %v896_v11 = vadd.f32 %v894_v5, %v888_v7  ;;  %v980_v4 = vstv %s2104_s23  ;;  %v979_v5 = vld [vmem:[#allocation2 + $0x12b] sm:$0xff]  ;;  %v978_v6 = vld [vmem:[#allocation2 + $0x123] sm:$0xff]  ;;  %v974_v7 = vmul.f32 %v972_v63, %v971_v0  ;;  %s2151_s23 = sld [smem:[#allocation7 + $0x5b]] }
 0x15b   : > { %v982_v14 = vmul.f32 %v980_v4, %v979_v5  ;;  %v981_v15 = vmul.f32 %v980_v4, %v978_v6  ;;  %v1051_v4 = vld [vmem:[#allocation2 + $0xb5] sm:$0xff]  ;;  %v1050_v5 = vld [vmem:[#allocation2 + $0xad] sm:$0xff] }
 0x15c   : > { %v903_v17 = vadd.f32 %v901_v8, %v895_v10  ;;  %v904_v18 = vadd.f32 %v902_v9, %v896_v11  ;;  %v973_v8 = vmul.f32 %v972_v63, %v970_v1  ;;  %v988_v11 = vstv %s2106_s26  ;;  %s2153_s26 = sld [smem:[#allocation7 + $0x5c]] }
 0x15e   : > { %v911_v24 = vadd.f32 %v909_v12, %v903_v17  ;;  %v912_v25 = vadd.f32 %v910_v13, %v904_v18  ;;  %v987_v12 = vld [vmem:[#allocation2 + $0x143] sm:$0xff]  ;;  %v986_v13 = vld [vmem:[#allocation2 + $0x13b] sm:$0xff]  ;;  %v996_v18 = vstv %s2109_s19  ;;  %s2155_s19 = sld [smem:[#allocation7 + $0x5d]] }
 0x15f   : > { %v990_v21 = vmul.f32 %v988_v11, %v987_v12  ;;  %v1058_v12 = vld [vmem:[#allocation2 + $0xc5] sm:$0xff] }
 0x160   : > { %v919_v31 = vadd.f32 %v917_v22, %v911_v24  ;;  %v920_v32 = vadd.f32 %v918_v23, %v912_v25  ;;  %v989_v24 = vmul.f32 %v988_v11, %v986_v13  ;;  %v1004_v25 = vstv %s2111_s29  ;;  %v1059_v11 = vld [vmem:[#allocation2 + $0xcd] sm:$0xff]  ;;  %s2159_s29 = sld [smem:[#allocation7 + $0x5e]] }
 0x161   : > { %v1068_v13 = vstv %s2134_s14 }
 0x162   : > { %v927_v36 = vadd.f32 %v925_v29, %v919_v31  ;;  %v928_v37 = vadd.f32 %v926_v30, %v920_v32  ;;  %v998_v29 = vmul.f32 %v996_v18, %v995_v19  ;;  %v997_v30 = vmul.f32 %v996_v18, %v994_v20  ;;  %v1011_v31 = vld [vmem:[#allocation2 + $0xe4] sm:$0xff]  ;;  %v1010_v32 = vld [vmem:[#allocation2 + $0xdc] sm:$0xff] }
 0x163   : > { %v1014_v42 = vmul.f32 %v1012_v28, %v1011_v31  ;;  %v1013_v43 = vmul.f32 %v1012_v28, %v1010_v32  ;;  %v1076_v20 = vstv %s2138_s16  ;;  %s1615_s16 = smov [#allocation8]  }
 0x164   : > { %v935_v48 = vadd.f32 %v933_v38, %v927_v36  ;;  %v936_v49 = vadd.f32 %v934_v39, %v928_v37  ;;  %v1018_v36 = vld [vmem:[#allocation2 + $0xf4] sm:$0xff]  ;;  %v1019_v37 = vld [vmem:[#allocation2 + $0xfc] sm:$0xff]  ;;  %v1006_v38 = vmul.f32 %v1004_v25, %v1003_v26  ;;  %v1005_v39 = vmul.f32 %v1004_v25, %v1002_v27 }
 0x165   : > { %v1021_v46 = vmul.f32 %v1020_v35, %v1018_v36  ;;  %v1022_v47 = vmul.f32 %v1020_v35, %v1019_v37  ;;  %v1082_v35 = vld [vmem:[#allocation2 + $0x10d] sm:$0xff] }
 0x166   : > { %v943_v55 = vadd.f32 %v941_v45, %v935_v48  ;;  %v944_v56 = vadd.f32 %v942_v44, %v936_v49  ;;  %v1028_v48 = vstv %s2121_s6  ;;  %v1027_v49 = vld [vmem:[#allocation2 + $0x114] sm:$0xff]  ;;  %s2169_s6 = sld [smem:[#allocation7 + $0x61]] }
 0x168   : > { %v951_v59 = vadd.f32 %v949_v54, %v943_v55  ;;  %v952_v60 = vadd.f32 %v950_v53, %v944_v56  ;;  %v1036_v53 = vstv %s2125_s7  ;;  %v1035_v54 = vld [vmem:[#allocation2 + $0x12c] sm:$0xff]  ;;  %v1034_v55 = vld [vmem:[#allocation2 + $0x124] sm:$0xff]  ;;  %v1030_v56 = vmul.f32 %v1028_v48, %v1027_v49  ;;  %s1404_s7 = sshll.u32 %s1654_s13, 10 }
 0x169   : > { %v1038_v63 = vmul.f32 %v1036_v53, %v1035_v54  ;;  %v1037_v0 = vmul.f32 %v1036_v53, %v1034_v55  ;;  %v1107_v53 = vld [vmem:[#allocation2 + $0xb6] sm:$0xff]  ;;  %v1106_v54 = vld [vmem:[#allocation2 + $0xae] sm:$0xff]  ;;  %s2185_s13 = scalar_lea.hbm %s2245_s2, %s1404_s7 }
 0x16a   : > { %v959_v2 = vadd.f32 %v957_v58, %v951_v59  ;;  %v960_v3 = vadd.f32 %v958_v57, %v952_v60  ;;  %v1029_v57 = vmul.f32 %v1028_v48, %v1026_v50  ;;  %v1044_v60 = vstv %s2127_s24  ;;  %s173_s24 = scalar_lea.vmem [#allocation8], %s1296_s3  ;;  %s1190_s3 = scalar_lea.sflag [#allocation5], %s1761_s28 }
 0x16c   : > { %v967_v9 = vadd.f32 %v965_v61, %v959_v2  ;;  %v968_v10 = vadd.f32 %v966_v62, %v960_v3  ;;  %v1043_v61 = vld [vmem:[#allocation2 + $0x144] sm:$0xff]  ;;  %v1042_v62 = vld [vmem:[#allocation2 + $0x13c] sm:$0xff]  ;;  %v1052_v3 = vstv %s2130_s27  ;;  %s1203_s27 = sshll.u32 %s173_s24, 4  ;;  %s2187_s27 = int_to_ptr.vmem [resolvable:$true] %s1203_s27 }
 0x16d   : > { %v1046_v6 = vmul.f32 %v1044_v60, %v1043_v61  ;;  %v1114_v61 = vld [vmem:[#allocation2 + $0xc6] sm:$0xff] }
 0x16e   : > { %v975_v16 = vadd.f32 %v973_v8, %v967_v9  ;;  %v976_v17 = vadd.f32 %v974_v7, %v968_v10  ;;  %v1045_v9 = vmul.f32 %v1044_v60, %v1042_v62  ;;  %v1060_v10 = vstv %s2132_s8  ;;  %v1115_v60 = vld [vmem:[#allocation2 + $0xce] sm:$0xff] }
 0x16f   : > { %v1124_v62 = vstv %s2155_s19 }
 0x170   : > { %v983_v22 = vadd.f32 %v981_v15, %v975_v16  ;;  %v984_v23 = vadd.f32 %v982_v14, %v976_v17  ;;  %v1054_v14 = vmul.f32 %v1052_v3, %v1051_v4  ;;  %v1053_v15 = vmul.f32 %v1052_v3, %v1050_v5  ;;  %v1067_v16 = vld [vmem:[#allocation2 + $0xe5] sm:$0xff]  ;;  %v1066_v17 = vld [vmem:[#allocation2 + $0xdd] sm:$0xff] }
 0x171   : > { %v1070_v27 = vmul.f32 %v1068_v13, %v1067_v16  ;;  %v1069_v28 = vmul.f32 %v1068_v13, %v1066_v17  ;;  %v1132_v5 = vstv %s2159_s29 }
 0x172   : > { %v991_v33 = vadd.f32 %v989_v24, %v983_v22  ;;  %v992_v34 = vadd.f32 %v990_v21, %v984_v23  ;;  %v1074_v21 = vld [vmem:[#allocation2 + $0xf5] sm:$0xff]  ;;  %v1075_v22 = vld [vmem:[#allocation2 + $0xfd] sm:$0xff]  ;;  %v1062_v23 = vmul.f32 %v1060_v10, %v1059_v11  ;;  %v1061_v24 = vmul.f32 %v1060_v10, %v1058_v12 }
 0x173   : > { %v1077_v31 = vmul.f32 %v1076_v20, %v1074_v21  ;;  %v1078_v32 = vmul.f32 %v1076_v20, %v1075_v22  ;;  %v1138_v20 = vld [vmem:[#allocation2 + $0x10e] sm:$0xff] }
 0x174   : > { %v999_v40 = vadd.f32 %v997_v30, %v991_v33  ;;  %v1000_v41 = vadd.f32 %v998_v29, %v992_v34  ;;  %v1084_v33 = vstv %s2142_s17  ;;  %v1083_v34 = vld [vmem:[#allocation2 + $0x115] sm:$0xff]  ;;  %s1536_s17 = sshll.u32 %s1615_s16, 4  ;;  %s1537_s17 = int_to_ptr.vmem [resolvable:$false] %s1536_s17 }
 0x175   : > { %p1539_p6 = scmp.lt.s32.totalorder %s2187_s27, %s1537_s17 }
 0x176   : > { %v1007_v44 = vadd.f32 %v1005_v39, %v999_v40  ;;  %v1008_v45 = vadd.f32 %v1006_v38, %v1000_v41  ;;  %v1092_v38 = vstv %s2146_s25  ;;  %v1091_v39 = vld [vmem:[#allocation2 + $0x12d] sm:$0xff]  ;;  %v1090_v40 = vld [vmem:[#allocation2 + $0x125] sm:$0xff]  ;;  %v1086_v41 = vmul.f32 %v1084_v33, %v1083_v34  ;;  %s1538_s25 = scalar_lea.vmem %s1537_s17, 2048 }
 0x177   : > { %v1094_v48 = vmul.f32 %v1092_v38, %v1091_v39  ;;  %v1093_v49 = vmul.f32 %v1092_v38, %v1090_v40 }
 0x178   : > { %v1015_v51 = vadd.f32 %v1013_v43, %v1007_v44  ;;  %v1016_v52 = vadd.f32 %v1014_v42, %v1008_v45  ;;  %v1085_v42 = vmul.f32 %v1084_v33, %v1082_v35  ;;  %v1100_v45 = vstv %s2148_s20 }
 0x17a   : > { %v1023_v58 = vadd.f32 %v1021_v46, %v1015_v51  ;;  %v1024_v59 = vadd.f32 %v1022_v47, %v1016_v52  ;;  %v1099_v46 = vld [vmem:[#allocation2 + $0x145] sm:$0xff]  ;;  %v1098_v47 = vld [vmem:[#allocation2 + $0x13d] sm:$0xff]  ;;  %v1108_v52 = vstv %s2151_s23 }
 0x17b   : > { %v1102_v55 = vmul.f32 %v1100_v45, %v1099_v46 }
 0x17c   : > { %v1031_v1 = vadd.f32 %v1029_v57, %v1023_v58  ;;  %v1032_v2 = vadd.f32 %v1030_v56, %v1024_v59  ;;  %v1101_v58 = vmul.f32 %v1100_v45, %v1098_v47  ;;  %v1116_v59 = vstv %s2153_s26 }
 0x17e   : > { %v1039_v7 = vadd.f32 %v1037_v0, %v1031_v1  ;;  %v1040_v8 = vadd.f32 %v1038_v63, %v1032_v2  ;;  %v1110_v63 = vmul.f32 %v1108_v52, %v1107_v53  ;;  %v1109_v0 = vmul.f32 %v1108_v52, %v1106_v54  ;;  %v1123_v1 = vld [vmem:[#allocation2 + $0xe6] sm:$0xff]  ;;  %v1122_v2 = vld [vmem:[#allocation2 + $0xde] sm:$0xff] }
 0x17f   : > { %v1126_v12 = vmul.f32 %v1124_v62, %v1123_v1  ;;  %v1125_v13 = vmul.f32 %v1124_v62, %v1122_v2  ;;  %v1482_v53 = vld [vmem:[%s1767_s4 + $0x10] sm:$0xff]  ;;  %v1488_v1 = vld [vmem:[%s1767_s4 + $0x38] sm:$0xff] }
 0x180   : > { %v1047_v18 = vadd.f32 %v1045_v9, %v1039_v7  ;;  %v1048_v19 = vadd.f32 %v1046_v6, %v1040_v8  ;;  %v1130_v6 = vld [vmem:[#allocation2 + $0xf6] sm:$0xff]  ;;  %v1131_v7 = vld [vmem:[#allocation2 + $0xfe] sm:$0xff]  ;;  %v1118_v8 = vmul.f32 %v1116_v59, %v1115_v60  ;;  %v1117_v9 = vmul.f32 %v1116_v59, %v1114_v61  ;;  %v1486_v61 = vld [vmem:[%s1767_s4 + $0x18] sm:$0xff] }
 0x181   : > { %v1133_v16 = vmul.f32 %v1132_v5, %v1130_v6  ;;  %v1134_v17 = vmul.f32 %v1132_v5, %v1131_v7  ;;  %v1485_v59 = vld [vmem:[%s1767_s4 + $0x8] sm:$0xff] }
 0x182   : > { %v1055_v25 = vadd.f32 %v1053_v15, %v1047_v18  ;;  %v1056_v26 = vadd.f32 %v1054_v14, %v1048_v19  ;;  %v1140_v18 = vstv %s2163_s30  ;;  %v1139_v19 = vld [vmem:[#allocation2 + $0x116] sm:$0xff] }
 0x184   : > { %v1063_v29 = vadd.f32 %v1061_v24, %v1055_v25  ;;  %v1064_v30 = vadd.f32 %v1062_v23, %v1056_v26  ;;  %v1148_v23 = vstv %s2167_s5  ;;  %v1147_v24 = vld [vmem:[#allocation2 + $0x12e] sm:$0xff]  ;;  %v1146_v25 = vld [vmem:[#allocation2 + $0x126] sm:$0xff]  ;;  %v1142_v26 = vmul.f32 %v1140_v18, %v1139_v19 }
 0x185   : > { %v1150_v33 = vmul.f32 %v1148_v23, %v1147_v24  ;;  %v1149_v34 = vmul.f32 %v1148_v23, %v1146_v25 }
 0x186   : > { %v1071_v36 = vadd.f32 %v1069_v28, %v1063_v29  ;;  %v1072_v37 = vadd.f32 %v1070_v27, %v1064_v30  ;;  %v1141_v27 = vmul.f32 %v1140_v18, %v1138_v20  ;;  %v1156_v30 = vstv %s2169_s6 }
 0x188   : > { %v1079_v43 = vadd.f32 %v1077_v31, %v1071_v36  ;;  %v1080_v44 = vadd.f32 %v1078_v32, %v1072_v37  ;;  %v1155_v31 = vld [vmem:[#allocation2 + $0x146] sm:$0xff]  ;;  %v1154_v32 = vld [vmem:[#allocation2 + $0x13e] sm:$0xff] }
 0x189   : > { %v1158_v37 = vmul.f32 %v1156_v30, %v1155_v31  ;;  %v1157_v40 = vmul.f32 %v1156_v30, %v1154_v32 }
 0x18a   : > { %v1087_v50 = vadd.f32 %v1085_v42, %v1079_v43  ;;  %v1088_v51 = vadd.f32 %v1086_v41, %v1080_v44 }
 0x18c   : > { %v1095_v56 = vadd.f32 %v1093_v49, %v1087_v50  ;;  %v1096_v57 = vadd.f32 %v1094_v48, %v1088_v51  ;;  %v1481_v51 = vld [vmem:[%s1767_s4] sm:$0xff] }
 0x18e   : > { %v1103_v3 = vadd.f32 %v1101_v58, %v1095_v56  ;;  %v1104_v4 = vadd.f32 %v1102_v55, %v1096_v57  ;;  %v1483_v55 = vld [vmem:[%s1767_s4 + $0x20] sm:$0xff]  ;;  %v1484_v57 = vld [vmem:[%s1767_s4 + $0x30] sm:$0xff] }
 0x190   : > { %v1111_v10 = vadd.f32 %v1109_v0, %v1103_v3  ;;  %v1112_v11 = vadd.f32 %v1110_v63, %v1104_v4  ;;  %v1487_v63 = vld [vmem:[%s1767_s4 + $0x28] sm:$0xff]  ;;  %s1532_s4 = scalar_lea.vmem %s2187_s27, 1024 }
 0x191   : > { %p1533_p1 = scmp.ne.s32.totalorder %s2187_s27, %s1532_s4  ;;  %p1540_p4 = scmp.lt.s32.totalorder %s1538_s25, %s1532_s4 }
 0x192   : > { %v1119_v14 = vadd.f32 %v1117_v9, %v1111_v10  ;;  %v1120_v15 = vadd.f32 %v1118_v8, %v1112_v11 }
 0x193   : > { %p1534_p2 = pnand %p1533_p1, %p2259_p7  ;;  %p1541_p5 = por %p1540_p4, %p1539_p6 }
 0x194   : > { %v1127_v21 = vadd.f32 %v1125_v13, %v1119_v14  ;;  %v1128_v22 = vadd.f32 %v1126_v12, %v1120_v15 }
 0x195   : > { %p1535_p3 = pneg %p1534_p2 }
 0x196   : > { %v1135_v28 = vadd.f32 %v1133_v16, %v1127_v21  ;;  %v1136_v29 = vadd.f32 %v1134_v17, %v1128_v22 }
 0x197   : > { %p1542_p0 = pnand %p1541_p5, %p1535_p3 }
 0x198   : > { %v1143_v35 = vadd.f32 %v1141_v27, %v1135_v28  ;;  %v1144_v36 = vadd.f32 %v1142_v26, %v1136_v29 }
 0x19a   : > { %v1151_v38 = vadd.f32 %v1149_v34, %v1143_v35  ;;  %v1152_v39 = vadd.f32 %v1150_v33, %v1144_v36 }
 0x19c   : > { %v1159_v41 = vadd.f32 %v1157_v40, %v1151_v38  ;;  %v1160_v42 = vadd.f32 %v1158_v37, %v1152_v39 }
 0x19e   : > { %v1396_v43 = vmul.f32 -1.442695, %v1159_v41  ;;  %v1397_v44 = vmul.f32 -1.442695, %v1160_v42 }
 0x1a0   : > { %1473 = vpow2.f32 %v1396_v43 }
 0x1a1   : > { %1475 = vpow2.f32 %v1397_v44 }
 0x1aa   : > { %v1474_v45 = vpop.eup %1473 }
 0x1ab   : > { %v1476_v46 = vpop.eup %1475  ;;  %v1167_v47 = vadd.f32 1.0, %v1474_v45 }
 0x1ac   : > { %v1168_v48 = vadd.f32 1.0, %v1476_v46 }
 0x1ad   : > { %1477 = vrcp.f32 %v1167_v47 }
 0x1ae   : > { %1479 = vrcp.f32 %v1168_v48 }
 0x1b7   : > { %v1478_v49 = vpop.eup %1477 }
 0x1b8   : > { %v1480_v50 = vpop.eup %1479  ;;  %v1173_v52 = vmul.f32 %v1481_v51, %v1478_v49  ;;  %v1175_v54 = vmul.f32 %v1482_v53, %v1478_v49  ;;  %v1177_v56 = vmul.f32 %v1483_v55, %v1478_v49  ;;  %v1179_v58 = vmul.f32 %v1484_v57, %v1478_v49 }
 0x1b9   : > { %v1174_v60 = vmul.f32 %v1485_v59, %v1480_v50  ;;  %v1176_v62 = vmul.f32 %v1486_v61, %v1480_v50  ;;  %v1178_v0 = vmul.f32 %v1487_v63, %v1480_v50  ;;  %v1180_v2 = vmul.f32 %v1488_v1, %v1480_v50 }
 0x1ba   : > { %1181 = vst.msk [vmem:[%s173_s24] sm:$0xff] %vm174_vm0, %v1173_v52  ;;  %1183 = vst.msk [vmem:[%s173_s24 + $0x10] sm:$0xff] %vm174_vm0, %v1175_v54 }
 0x1bb   : > { %1185 = vst.msk [vmem:[%s173_s24 + $0x20] sm:$0xff] %vm174_vm0, %v1177_v56  ;;  %1187 = vst.msk [vmem:[%s173_s24 + $0x30] sm:$0xff] %vm174_vm0, %v1179_v58 }
 0x1bc   : > { %1182 = vst.msk [vmem:[%s173_s24 + $0x8] sm:$0xff] %vm174_vm0, %v1174_v60  ;;  %1184 = vst.msk [vmem:[%s173_s24 + $0x18] sm:$0xff] %vm174_vm0, %v1176_v62 }
 0x1bd   : > { %1186 = vst.msk [vmem:[%s173_s24 + $0x28] sm:$0xff] %vm174_vm0, %v1178_v0  ;;  %1188 = vst.msk [vmem:[%s173_s24 + $0x38] sm:$0xff] %vm174_vm0, %v1180_v2 }
 0x1be   : > { %1545 = shalt.err (!%p1542_p0)
}
 0x1bf   : > { %s1546_s20 = scalar_lea.hbm %s2185_s13, 1024  ;;  %s1550_s19 = scalar_lea.hbm %s2245_s2, 2048 }
 0x1c0   : > { %p1547_p8 = scmp.ne.s32.totalorder %s2185_s13, %s1546_s20  ;;  %p1551_p11 = scmp.lt.u32.totalorder %s2185_s13, %s2245_s2 }
 0x1c1   : > { %p1552_p12 = scmp.lt.u32.totalorder %s1550_s19, %s1546_s20  ;;  %p1554_p1 = scmp.lt.u32.totalorder %s1546_s20, %s2185_s13 }
 0x1c2   : > { %p1548_p9 = pnand %p1547_p8, %p2259_p7 }
 0x1c3   : > { %p1553_p13 = por %p1552_p12, %p1551_p11 }
 0x1c4   : > { %p1549_p10 = pneg %p1548_p9 }
 0x1c5   : > { %p1555_p2 = por %p1554_p1, %p1553_p13 }
 0x1c7   : > { %p1556_p3 = pnand %p1555_p2, %p1549_p10 }
 0x1c9   : > { %1559 = shalt.err (!%p1556_p3)
}
 0x1ca   : > { %s1616_s5 = smov 128   ;;  %s1617_s6 = smov 8  }
 0x1cb   : > { %1411 = dma.vmem_to_hbm [thread:$0]  (%p2259_p7), %s2187_s27, 1024, %s2185_s13, %s1190_s3, %s1616_s5, %s1616_s5, %s1617_s6  }
 0x1cc PF: > { %s1218_s7 = sand.u32 1, %s1590_s9   ;;  %p2260_p6 = scmp.ne.s32.totalorder %s2252_s22, 0 }
 0x1cd   : > { %p2261_p4 = scmp.ge.s32.totalorder %s1602_s12, 2  ;;  %s1219_s24 = scalar_lea.sflag [#allocation5], %s1218_s7 }
 0x1cf   : > { %p1422_p5 = pnand %p2261_p4, %p2260_p6 }
 0x1d1   : > { %1585 = dma.done.wait (!%p1422_p5), %s1219_s24, 1024  }
 0x1d2   : > { %1587 = vsyncadd (!%p1422_p5), %s1219_s24, 4294966272  ;;  %p16_p0 = scmp.ge.s32.totalorder %s1658_s15, 4   ;;  %s2262_s9 = smov %s1594_s10 }
 0x1d3   : > { %s2263_s10 = smov %s1598_s11  ;;  %s2264_s11 = smov %s1670_s18 }
 0x1d4   : > { %s2265_s12 = smov %s1658_s15  ;;  %18 = sbr.rel (!%p16_p0) target bundleno = 6 (0x6), region = 91 }
 0x1db   :  { %1224 = vsyncpa [#allocation4], 1 }
 0x1dc   :  { %1226 = vsyncpa [#allocation4 + $0x1], 1 }
 0x1dd   :  { %1227 = vsyncpa [#allocation5], 1 }
 0x1de   :  { %1229 = vsyncpa [#allocation5 + $0x1], 1 }
 0x1df   :  { %1230 = vsyncpa [#allocation6], 1 }
 0x1e0   :  { %1232 = vsyncpa [#allocation6 + $0x1], 1 }

</bundles_post_ra>
